<compile_context>
chip_gen: v7x
topology: tpu7x:2x2x1
jax: 0.10.0
libtpu: 0.0.40
codegen_flags: <defaults>
</compile_context>

<pallas_src>
import jax
import jax.numpy as jnp
from jax.experimental import pallas as pl
from jax.experimental.pallas import tpu as pltpu


# ---------------------------------------------------------------------------
# Pallas kernels
# ---------------------------------------------------------------------------

def _cor_matmul_kernel(xp_ref, timg_ref, out_ref):
    """Per-image self correlation as one MXU matmul.

    xp_ref  : (H, H*PW)   xp[i, a*PW + q]   = xpad[i + a, q]
    timg_ref: (H*PW, W)   timg[a*PW + q, j] = img[a, q - j]   (0 outside [0, W))
    out_ref : (H, W)      out[i, j] = sum_{a,b} img[a, b] * xpad[i+a, j+b]
                          (== scipy.ndimage.correlate(img, img, mode='constant'))
    """
    out_ref[...] = jnp.dot(xp_ref[...], timg_ref[...],
                           preferred_element_type=jnp.float32)


def _fused_net_kernel(p1_ref, w1_ref, b1_ref,
                      sel2_ref, w2_ref, b2_ref, summat_ref,
                      sel3_ref, w3_ref, b3_ref, out_ref):
    """Fused conv1 -> conv2(+add_channel) -> conv3 -> GAP -> log_softmax.

    p1_ref    : (169, 9)      im2col patches of the correlation map
    w1_ref    : (9, 32)       conv1 weights (flattened),  b1_ref: (1, 32)
    sel2_ref  : (9, 36, 169)  0/1 row-selection matrices (conv2 im2col)
    w2_ref    : (9, 32, 64)   conv2 block-diagonal weights per kernel position
    b2_ref    : (1, 64)
    summat_ref: (64, 8)       0/1 add_channel (per-group sum) matrix
    sel3_ref  : (9, 16, 36)   0/1 row-selection matrices (conv3 im2col)
    w3_ref    : (9, 8, 10)    conv3 weights per kernel position, b3_ref: (1, 10)
    out_ref   : (1, 10)       log-probabilities
    """
    # conv1 + ReLU: (169, 9) @ (9, 32)
    y1 = jnp.dot(p1_ref[...], w1_ref[...], preferred_element_type=jnp.float32)
    y1 = jnp.maximum(y1 + b1_ref[...], 0.0)                       # (169, 32)

    # conv2 (grouped, folded into a block-diagonal matmul) + ReLU.
    # Spatial patch extraction is a matmul with a 0/1 selection matrix.
    p2 = sel2_ref.shape[1]
    co2 = w2_ref.shape[2]
    acc2 = jnp.zeros((p2, co2), jnp.float32)
    for k in range(sel2_ref.shape[0]):
        part = jnp.dot(sel2_ref[k], y1, preferred_element_type=jnp.float32)
        acc2 = acc2 + jnp.dot(part, w2_ref[k],
                              preferred_element_type=jnp.float32)
    y2 = jnp.maximum(acc2 + b2_ref[...], 0.0)                     # (36, 64)

    # add_channel(., 8): per-group channel sum as a matmul (MXU has slack).
    y2c = jnp.dot(y2, summat_ref[...], preferred_element_type=jnp.float32)  # (36, 8)

    # conv3 + ReLU (same selection-matmul scheme).
    p3 = sel3_ref.shape[1]
    co3 = w3_ref.shape[2]
    acc3 = jnp.zeros((p3, co3), jnp.float32)
    for k in range(sel3_ref.shape[0]):
        part = jnp.dot(sel3_ref[k], y2c, preferred_element_type=jnp.float32)
        acc3 = acc3 + jnp.dot(part, w3_ref[k],
                              preferred_element_type=jnp.float32)
    h = jnp.maximum(acc3 + b3_ref[...], 0.0)                      # (16, 10)

    # GAP over the full 4x4 map + log_softmax.
    logits = jnp.mean(h, axis=0, keepdims=True)                   # (1, 10)
    m = jnp.max(logits, axis=1, keepdims=True)
    lse = jnp.log(jnp.sum(jnp.exp(logits - m), axis=1, keepdims=True)) + m
    out_ref[...] = logits - lse


# ---------------------------------------------------------------------------
# Glue (layout only): padding, Toeplitz / selection matrices, weight packing
# ---------------------------------------------------------------------------

def _self_correlation_inputs(x2d):
    """x2d: (N, H, W) -> (XP, Timg) operands for the cor matmul kernel."""
    n, h, w = x2d.shape
    ch, cw = h // 2, w // 2
    xpad = jnp.pad(x2d, ((0, 0), (ch, h - 1 - ch), (cw, w - 1 - cw)))  # (N, 2H-1, 2W-1)
    pw = 2 * w - 1
    # XP[n, i, a*PW + q] = xpad[n, i + a, q]
    xp = jnp.stack([xpad[:, a:a + h, :] for a in range(h)], axis=2)    # (N, H, H, PW)
    xp = xp.reshape(n, h, h * pw)
    # Timg[n, a*PW + q, j] = img[n, a, q - j]  (0 outside [0, W))
    q = jnp.arange(pw)[:, None]
    j = jnp.arange(w)[None, :]
    b = q - j
    valid = (b >= 0) & (b < w)
    timg = jnp.where(valid[None, None, :, :],
                     x2d[:, :, jnp.clip(b, 0, w - 1)], 0.0)            # (N, H, PW, W)
    timg = timg.reshape(n, h * pw, w)
    return xp, timg


def _self_correlation(x2d):
    """Batched self correlation (constant/0 boundary) on the MXU."""
    n, h, w = x2d.shape
    pw = 2 * w - 1
    xp, timg = _self_correlation_inputs(x2d)
    return pl.pallas_call(
        _cor_matmul_kernel,
        out_shape=jax.ShapeDtypeStruct((n, h, w), jnp.float32),
        grid=(n,),
        in_specs=[
            pl.BlockSpec((None, h, h * pw), lambda i: (i, 0, 0)),
            pl.BlockSpec((None, h * pw, w), lambda i: (i, 0, 0)),
        ],
        out_specs=pl.BlockSpec((None, h, w), lambda i: (i, 0, 0)),
        compiler_params=pltpu.CompilerParams(
            dimension_semantics=("parallel",)),
    )(xp, timg)


def _conv_row_selection(h_in, w_in, k, stride):
    """0/1 matrices Sel[kk, q, p]: flat input row p is patch element kk of
    output position q (row-major spatial flattening). Shape (k*k, Pout, Pin)."""
    h_out = (h_in - k) // stride + 1
    w_out = (w_in - k) // stride + 1
    io, jo = jnp.meshgrid(jnp.arange(h_out), jnp.arange(w_out), indexing="ij")
    kh, kw = jnp.meshgrid(jnp.arange(k), jnp.arange(k), indexing="ij")
    kh = kh.reshape(k * k, 1, 1)
    kw = kw.reshape(k * k, 1, 1)
    rows = (stride * io[None] + kh) * w_in + (stride * jo[None] + kw)
    rows = rows.reshape(k * k, h_out * w_out)
    sel = rows[:, :, None] == jnp.arange(h_in * w_in)[None, None, :]
    return sel.astype(jnp.float32)


def _pack_params(params):
    w1, b1, w2, b2, w3, b3 = params
    # conv1 (32, 1, 3, 3) -> (9, 32):  w1f[kh*3+kw, co] = w1[co, 0, kh, kw]
    w1f = jnp.transpose(w1[:, 0], (1, 2, 0)).reshape(9, 32)
    b1f = b1.reshape(1, 32)
    # conv2 (64, 4, 3, 3), groups=8 -> block-diagonal (9, 32, 64)
    g, cog, cig = 8, 8, 4
    w2r = w2.reshape(g, cog, cig, 3, 3)                 # (g, cog, ci, kh, kw)
    w2t = jnp.transpose(w2r, (3, 4, 0, 2, 1))           # (kh, kw, g, ci, cog)
    w2bd = jnp.einsum("hwgic,gG->hwgiGc", w2t, jnp.eye(g, dtype=w2.dtype))
    w2k = w2bd.reshape(9, g * cig, g * cog)             # (9, 32, 64)
    b2f = b2.reshape(1, 64)
    # add_channel(., 8): sum channels co with co//8 == group
    summat = (jnp.arange(64)[:, None] // cog
              == jnp.arange(g)[None, :]).astype(jnp.float32)        # (64, 8)
    # conv3 (10, 8, 3, 3) -> (9, 8, 10)
    w3k = jnp.transpose(w3, (2, 3, 1, 0)).reshape(9, 8, 10)
    b3f = b3.reshape(1, 10)
    return w1f, b1f, w2k, b2f, summat, w3k, b3f


# ---------------------------------------------------------------------------
# Forward pass
# ---------------------------------------------------------------------------

def net_forward(x, params):
    """x: (N, 1, 28, 28) float32, NCHW. Returns (N, 10) log-probabilities."""
    n, _, h, w = x.shape
    x2d = x[:, 0].astype(jnp.float32)

    # ---- cor(x): self-correlation on the MXU --------------------------------
    # TODO(synk): reference cor() runs in float64 (numpy); TPU kernel uses float32.
    corr = _self_correlation(x2d)                                   # (N, 28, 28)

    # ---- im2col for conv1 (pure layout, tiny) --------------------------------
    h1 = (h - 3) // 2 + 1
    w1o = (w - 3) // 2 + 1
    cols = []
    for kh in range(3):
        for kw in range(3):
            sl = corr[:, kh:kh + 2 * (h1 - 1) + 1:2,
                      kw:kw + 2 * (w1o - 1) + 1:2]
            cols.append(sl.reshape(n, h1 * w1o, 1))
    p1 = jnp.concatenate(cols, axis=-1)                             # (N, 169, 9)

    # ---- fused conv1 -> conv2(+add_channel) -> conv3 -> GAP -> log_softmax ---
    w1f, b1f, w2k, b2f, summat, w3k, b3f = _pack_params(params)
    h2 = (h1 - 3) // 2 + 1                 # 6
    h3 = h2 - 3 + 1                        # 4
    sel2 = _conv_row_selection(h1, w1o, 3, 2)                       # (9, 36, 169)
    sel3 = _conv_row_selection(h2, h2, 3, 1)                        # (9, 16, 36)
    p1n, p2n, p3n = h1 * w1o, h2 * h2, h3 * h3

    out = pl.pallas_call(
        _fused_net_kernel,
        out_shape=jax.ShapeDtypeStruct((n, 1, 10), jnp.float32),
        grid=(n,),
        in_specs=[
            pl.BlockSpec((None, p1n, 9), lambda i: (i, 0, 0)),
            pl.BlockSpec((9, 32), lambda i: (0, 0)),
            pl.BlockSpec((1, 32), lambda i: (0, 0)),
            pl.BlockSpec((9, p2n, p1n), lambda i: (0, 0, 0)),
            pl.BlockSpec((9, 32, 64), lambda i: (0, 0, 0)),
            pl.BlockSpec((1, 64), lambda i: (0, 0)),
            pl.BlockSpec((64, 8), lambda i: (0, 0)),
            pl.BlockSpec((9, p3n, p2n), lambda i: (0, 0, 0)),
            pl.BlockSpec((9, 8, 10), lambda i: (0, 0, 0)),
            pl.BlockSpec((1, 10), lambda i: (0, 0)),
        ],
        out_specs=pl.BlockSpec((None, 1, 10), lambda i: (i, 0, 0)),
        compiler_params=pltpu.CompilerParams(
            dimension_semantics=("parallel",)),
    )(p1, w1f, b1f, sel2, w2k, b2f, summat, sel3, w3k, b3f)
    return out.reshape(n, 10)


def init_params(key):
    ks = jax.random.split(key, 6)
    w1 = 0.05 * jax.random.normal(ks[0], (32, 1, 3, 3), jnp.float32)
    b1 = 0.05 * jax.random.normal(ks[1], (32,), jnp.float32)
    w2 = 0.05 * jax.random.normal(ks[2], (64, 4, 3, 3), jnp.float32)   # groups=8 -> 32/8=4 in-ch
    b2 = 0.05 * jax.random.normal(ks[3], (64,), jnp.float32)
    w3 = 0.05 * jax.random.normal(ks[4], (10, 8, 3, 3), jnp.float32)
    b3 = 0.05 * jax.random.normal(ks[5], (10,), jnp.float32)
    return (w1, b1, w2, b2, w3, b3)


if __name__ == "__main__":
    key = jax.random.PRNGKey(0)
    pkey, xkey = jax.random.split(key)
    params = init_params(pkey)
    # MNIST-like input: batch=2, 1 channel, 28x28 (NCHW like the PyTorch module)
    x = jax.random.uniform(xkey, (2, 1, 28, 28), dtype=jnp.float32)

    out = jax.jit(net_forward)(x, params)
    out = jax.block_until_ready(out)

    assert out.shape == (2, 10)
    lse = jnp.log(jnp.sum(jnp.exp(out), axis=1))        # log_softmax rows sum to 1
    assert bool(jnp.all(jnp.isfinite(out)))
    assert bool(jnp.all(jnp.abs(lse) < 1e-3))
    print("KERNEL_OK")
</pallas_src>

<mosaic_0001>
module attributes {stable_mosaic.version = 11 : i64} {
  func.func @_cor_matmul_kernel(%arg0: i32, %arg1: memref<1x28x1540xf32, #tpu.memory_space<vmem>>, %arg2: memref<1x1540x28xf32, #tpu.memory_space<vmem>>, %arg3: memref<1x28x28xf32, #tpu.memory_space<vmem>>) attributes {dimension_semantics = [#tpu.dimension_semantics<parallel>], iteration_bounds = array<i64: 2>, scalar_prefetch = 0 : i64, scratch_operands = 0 : i64, tpu.core_type = #tpu.core_type<tc>, window_params = [{transform_indices = @transform_0, window_bounds = array<i64: 1, 28, 1540>}, {transform_indices = @transform_1, window_bounds = array<i64: 1, 1540, 28>}, {transform_indices = @transform_2, window_bounds = array<i64: 1, 28, 28>}]} {
    %c0 = arith.constant 0 : index
    %c0_0 = arith.constant 0 : index
    %c0_1 = arith.constant 0 : index
    %0 = vector.load %arg1[%c0, %c0_0, %c0_1] : memref<1x28x1540xf32, #tpu.memory_space<vmem>>, vector<1x28x1540xf32>
    %1 = vector.shape_cast %0 : vector<1x28x1540xf32> to vector<28x1540xf32>
    %c0_2 = arith.constant 0 : index
    %c0_3 = arith.constant 0 : index
    %c0_4 = arith.constant 0 : index
    %2 = vector.load %arg2[%c0_2, %c0_3, %c0_4] : memref<1x1540x28xf32, #tpu.memory_space<vmem>>, vector<1x1540x28xf32>
    %3 = vector.shape_cast %2 : vector<1x1540x28xf32> to vector<1540x28xf32>
    %cst = arith.constant dense<0.000000e+00> : vector<28x28xf32>
    %4 = tpu.matmul %1, %3, %cst {dimension_numbers = #tpu.dot_dimension_numbers<[1], [0], [0], [1], [0, 0, 1, 1], [], []>} : vector<28x1540xf32>, vector<1540x28xf32>, vector<28x28xf32> -> vector<28x28xf32>
    %c0_5 = arith.constant 0 : index
    %c0_6 = arith.constant 0 : index
    %c0_7 = arith.constant 0 : index
    %5 = vector.load %arg3[%c0_5, %c0_6, %c0_7] : memref<1x28x28xf32, #tpu.memory_space<vmem>>, vector<1x28x28xf32>
    %6 = vector.shape_cast %5 : vector<1x28x28xf32> to vector<28x28xf32>
    %7 = vector.shape_cast %4 : vector<28x28xf32> to vector<1x28x28xf32>
    tpu.vector_store %arg3[%c0_5, %c0_6, %c0_7], %7 {strides = array<i32>} : memref<1x28x28xf32, #tpu.memory_space<vmem>>, vector<1x28x28xf32>,
    return
  }
  func.func @transform_0(%arg0: i32) -> (i32, i32, i32) {
    %c0_i32 = arith.constant 0 : i32
    %c0_i32_0 = arith.constant 0 : i32
    %c0_i32_1 = arith.constant 0 : i32
    return %arg0, %c0_i32, %c0_i32_0 : i32, i32, i32
  }
  func.func @transform_1(%arg0: i32) -> (i32, i32, i32) {
    %c0_i32 = arith.constant 0 : i32
    %c0_i32_0 = arith.constant 0 : i32
    %c0_i32_1 = arith.constant 0 : i32
    return %arg0, %c0_i32, %c0_i32_0 : i32, i32, i32
  }
  func.func @transform_2(%arg0: i32) -> (i32, i32, i32) {
    %c0_i32 = arith.constant 0 : i32
    %c0_i32_0 = arith.constant 0 : i32
    %c0_i32_1 = arith.constant 0 : i32
    return %arg0, %c0_i32, %c0_i32_0 : i32, i32, i32
  }
}

module attributes {stable_mosaic.version = 11 : i64} {
  func.func @_fused_net_kernel(%arg0: i32, %arg1: memref<1x169x9xf32, #tpu.memory_space<vmem>>, %arg2: memref<9x32xf32, #tpu.memory_space<vmem>>, %arg3: memref<1x32xf32, #tpu.memory_space<vmem>>, %arg4: memref<9x36x169xf32, #tpu.memory_space<vmem>>, %arg5: memref<9x32x64xf32, #tpu.memory_space<vmem>>, %arg6: memref<1x64xf32, #tpu.memory_space<vmem>>, %arg7: memref<64x8xf32, #tpu.memory_space<vmem>>, %arg8: memref<9x16x36xf32, #tpu.memory_space<vmem>>, %arg9: memref<9x8x10xf32, #tpu.memory_space<vmem>>, %arg10: memref<1x10xf32, #tpu.memory_space<vmem>>, %arg11: memref<1x1x10xf32, #tpu.memory_space<vmem>>) attributes {dimension_semantics = [#tpu.dimension_semantics<parallel>], iteration_bounds = array<i64: 2>, scalar_prefetch = 0 : i64, scratch_operands = 0 : i64, tpu.core_type = #tpu.core_type<tc>, window_params = [{transform_indices = @transform_0, window_bounds = array<i64: 1, 169, 9>}, {pipeline_mode = #tpu.pipeline_mode<synchronous>, transform_indices = @transform_1, window_bounds = array<i64: 9, 32>}, {pipeline_mode = #tpu.pipeline_mode<synchronous>, transform_indices = @transform_2, window_bounds = array<i64: 1, 32>}, {pipeline_mode = #tpu.pipeline_mode<synchronous>, transform_indices = @transform_3, window_bounds = array<i64: 9, 36, 169>}, {pipeline_mode = #tpu.pipeline_mode<synchronous>, transform_indices = @transform_4, window_bounds = array<i64: 9, 32, 64>}, {pipeline_mode = #tpu.pipeline_mode<synchronous>, transform_indices = @transform_5, window_bounds = array<i64: 1, 64>}, {pipeline_mode = #tpu.pipeline_mode<synchronous>, transform_indices = @transform_6, window_bounds = array<i64: 64, 8>}, {pipeline_mode = #tpu.pipeline_mode<synchronous>, transform_indices = @transform_7, window_bounds = array<i64: 9, 16, 36>}, {pipeline_mode = #tpu.pipeline_mode<synchronous>, transform_indices = @transform_8, window_bounds = array<i64: 9, 8, 10>}, {pipeline_mode = #tpu.pipeline_mode<synchronous>, transform_indices = @transform_9, window_bounds = array<i64: 1, 10>}, {transform_indices = @transform_10, window_bounds = array<i64: 1, 1, 10>}]} {
    %c0 = arith.constant 0 : index
    %c0_0 = arith.constant 0 : index
    %c0_1 = arith.constant 0 : index
    %0 = vector.load %arg1[%c0, %c0_0, %c0_1] : memref<1x169x9xf32, #tpu.memory_space<vmem>>, vector<1x169x9xf32>
    %1 = vector.shape_cast %0 : vector<1x169x9xf32> to vector<169x9xf32>
    %c0_2 = arith.constant 0 : index
    %c0_3 = arith.constant 0 : index
    %2 = vector.load %arg2[%c0_2, %c0_3] : memref<9x32xf32, #tpu.memory_space<vmem>>, vector<9x32xf32>
    %cst = arith.constant dense<0.000000e+00> : vector<169x32xf32>
    %3 = tpu.matmul %1, %2, %cst {dimension_numbers = #tpu.dot_dimension_numbers<[1], [0], [0], [1], [0, 0, 1, 1], [], []>} : vector<169x9xf32>, vector<9x32xf32>, vector<169x32xf32> -> vector<169x32xf32>
    %c0_4 = arith.constant 0 : index
    %c0_5 = arith.constant 0 : index
    %4 = vector.load %arg3[%c0_4, %c0_5] : memref<1x32xf32, #tpu.memory_space<vmem>>, vector<1x32xf32>
    %5 = vector.broadcast %4 : vector<1x32xf32> to vector<169x32xf32>
    %6 = arith.addf %3, %5 : vector<169x32xf32>
    %cst_6 = arith.constant 0.000000e+00 : f32
    %7 = vector.broadcast %cst_6 : f32 to vector<169x32xf32>
    %8 = arith.maximumf %6, %7 : vector<169x32xf32>
    %cst_7 = arith.constant 0.000000e+00 : f32
    %9 = vector.broadcast %cst_7 : f32 to vector<36x64xf32>
    %c0_8 = arith.constant 0 : index
    %c0_9 = arith.constant 0 : index
    %c0_10 = arith.constant 0 : index
    %10 = vector.load %arg4[%c0_8, %c0_9, %c0_10] : memref<9x36x169xf32, #tpu.memory_space<vmem>>, vector<1x36x169xf32>
    %11 = vector.shape_cast %10 : vector<1x36x169xf32> to vector<36x169xf32>
    %cst_11 = arith.constant dense<0.000000e+00> : vector<36x32xf32>
    %12 = tpu.matmul %11, %8, %cst_11 {dimension_numbers = #tpu.dot_dimension_numbers<[1], [0], [0], [1], [0, 0, 1, 1], [], []>} : vector<36x169xf32>, vector<169x32xf32>, vector<36x32xf32> -> vector<36x32xf32>
    %c0_12 = arith.constant 0 : index
    %c0_13 = arith.constant 0 : index
    %c0_14 = arith.constant 0 : index
    %13 = vector.load %arg5[%c0_12, %c0_13, %c0_14] : memref<9x32x64xf32, #tpu.memory_space<vmem>>, vector<1x32x64xf32>
    %14 = vector.shape_cast %13 : vector<1x32x64xf32> to vector<32x64xf32>
    %cst_15 = arith.constant dense<0.000000e+00> : vector<36x64xf32>
    %15 = tpu.matmul %12, %14, %cst_15 {dimension_numbers = #tpu.dot_dimension_numbers<[1], [0], [0], [1], [0, 0, 1, 1], [], []>} : vector<36x32xf32>, vector<32x64xf32>, vector<36x64xf32> -> vector<36x64xf32>
    %16 = arith.addf %9, %15 : vector<36x64xf32>
    %c1 = arith.constant 1 : index
    %c0_16 = arith.constant 0 : index
    %c0_17 = arith.constant 0 : index
    %17 = vector.load %arg4[%c1, %c0_16, %c0_17] : memref<9x36x169xf32, #tpu.memory_space<vmem>>, vector<1x36x169xf32>
    %18 = vector.shape_cast %17 : vector<1x36x169xf32> to vector<36x169xf32>
    %cst_18 = arith.constant dense<0.000000e+00> : vector<36x32xf32>
    %19 = tpu.matmul %18, %8, %cst_18 {dimension_numbers = #tpu.dot_dimension_numbers<[1], [0], [0], [1], [0, 0, 1, 1], [], []>} : vector<36x169xf32>, vector<169x32xf32>, vector<36x32xf32> -> vector<36x32xf32>
    %c1_19 = arith.constant 1 : index
    %c0_20 = arith.constant 0 : index
    %c0_21 = arith.constant 0 : index
    %20 = vector.load %arg5[%c1_19, %c0_20, %c0_21] : memref<9x32x64xf32, #tpu.memory_space<vmem>>, vector<1x32x64xf32>
    %21 = vector.shape_cast %20 : vector<1x32x64xf32> to vector<32x64xf32>
    %cst_22 = arith.constant dense<0.000000e+00> : vector<36x64xf32>
    %22 = tpu.matmul %19, %21, %cst_22 {dimension_numbers = #tpu.dot_dimension_numbers<[1], [0], [0], [1], [0, 0, 1, 1], [], []>} : vector<36x32xf32>, vector<32x64xf32>, vector<36x64xf32> -> vector<36x64xf32>
    %23 = arith.addf %16, %22 : vector<36x64xf32>
    %c2 = arith.constant 2 : index
    %c0_23 = arith.constant 0 : index
    %c0_24 = arith.constant 0 : index
    %24 = vector.load %arg4[%c2, %c0_23, %c0_24] : memref<9x36x169xf32, #tpu.memory_space<vmem>>, vector<1x36x169xf32>
    %25 = vector.shape_cast %24 : vector<1x36x169xf32> to vector<36x169xf32>
    %cst_25 = arith.constant dense<0.000000e+00> : vector<36x32xf32>
    %26 = tpu.matmul %25, %8, %cst_25 {dimension_numbers = #tpu.dot_dimension_numbers<[1], [0], [0], [1], [0, 0, 1, 1], [], []>} : vector<36x169xf32>, vector<169x32xf32>, vector<36x32xf32> -> vector<36x32xf32>
    %c2_26 = arith.constant 2 : index
    %c0_27 = arith.constant 0 : index
    %c0_28 = arith.constant 0 : index
    %27 = vector.load %arg5[%c2_26, %c0_27, %c0_28] : memref<9x32x64xf32, #tpu.memory_space<vmem>>, vector<1x32x64xf32>
    %28 = vector.shape_cast %27 : vector<1x32x64xf32> to vector<32x64xf32>
    %cst_29 = arith.constant dense<0.000000e+00> : vector<36x64xf32>
    %29 = tpu.matmul %26, %28, %cst_29 {dimension_numbers = #tpu.dot_dimension_numbers<[1], [0], [0], [1], [0, 0, 1, 1], [], []>} : vector<36x32xf32>, vector<32x64xf32>, vector<36x64xf32> -> vector<36x64xf32>
    %30 = arith.addf %23, %29 : vector<36x64xf32>
    %c3 = arith.constant 3 : index
    %c0_30 = arith.constant 0 : index
    %c0_31 = arith.constant 0 : index
    %31 = vector.load %arg4[%c3, %c0_30, %c0_31] : memref<9x36x169xf32, #tpu.memory_space<vmem>>, vector<1x36x169xf32>
    %32 = vector.shape_cast %31 : vector<1x36x169xf32> to vector<36x169xf32>
    %cst_32 = arith.constant dense<0.000000e+00> : vector<36x32xf32>
    %33 = tpu.matmul %32, %8, %cst_32 {dimension_numbers = #tpu.dot_dimension_numbers<[1], [0], [0], [1], [0, 0, 1, 1], [], []>} : vector<36x169xf32>, vector<169x32xf32>, vector<36x32xf32> -> vector<36x32xf32>
    %c3_33 = arith.constant 3 : index
    %c0_34 = arith.constant 0 : index
    %c0_35 = arith.constant 0 : index
    %34 = vector.load %arg5[%c3_33, %c0_34, %c0_35] : memref<9x32x64xf32, #tpu.memory_space<vmem>>, vector<1x32x64xf32>
    %35 = vector.shape_cast %34 : vector<1x32x64xf32> to vector<32x64xf32>
    %cst_36 = arith.constant dense<0.000000e+00> : vector<36x64xf32>
    %36 = tpu.matmul %33, %35, %cst_36 {dimension_numbers = #tpu.dot_dimension_numbers<[1], [0], [0], [1], [0, 0, 1, 1], [], []>} : vector<36x32xf32>, vector<32x64xf32>, vector<36x64xf32> -> vector<36x64xf32>
    %37 = arith.addf %30, %36 : vector<36x64xf32>
    %c4 = arith.constant 4 : index
    %c0_37 = arith.constant 0 : index
    %c0_38 = arith.constant 0 : index
    %38 = vector.load %arg4[%c4, %c0_37, %c0_38] : memref<9x36x169xf32, #tpu.memory_space<vmem>>, vector<1x36x169xf32>
    %39 = vector.shape_cast %38 : vector<1x36x169xf32> to vector<36x169xf32>
    %cst_39 = arith.constant dense<0.000000e+00> : vector<36x32xf32>
    %40 = tpu.matmul %39, %8, %cst_39 {dimension_numbers = #tpu.dot_dimension_numbers<[1], [0], [0], [1], [0, 0, 1, 1], [], []>} : vector<36x169xf32>, vector<169x32xf32>, vector<36x32xf32> -> vector<36x32xf32>
    %c4_40 = arith.constant 4 : index
    %c0_41 = arith.constant 0 : index
    %c0_42 = arith.constant 0 : index
    %41 = vector.load %arg5[%c4_40, %c0_41, %c0_42] : memref<9x32x64xf32, #tpu.memory_space<vmem>>, vector<1x32x64xf32>
    %42 = vector.shape_cast %41 : vector<1x32x64xf32> to vector<32x64xf32>
    %cst_43 = arith.constant dense<0.000000e+00> : vector<36x64xf32>
    %43 = tpu.matmul %40, %42, %cst_43 {dimension_numbers = #tpu.dot_dimension_numbers<[1], [0], [0], [1], [0, 0, 1, 1], [], []>} : vector<36x32xf32>, vector<32x64xf32>, vector<36x64xf32> -> vector<36x64xf32>
    %44 = arith.addf %37, %43 : vector<36x64xf32>
    %c5 = arith.constant 5 : index
    %c0_44 = arith.constant 0 : index
    %c0_45 = arith.constant 0 : index
    %45 = vector.load %arg4[%c5, %c0_44, %c0_45] : memref<9x36x169xf32, #tpu.memory_space<vmem>>, vector<1x36x169xf32>
    %46 = vector.shape_cast %45 : vector<1x36x169xf32> to vector<36x169xf32>
    %cst_46 = arith.constant dense<0.000000e+00> : vector<36x32xf32>
    %47 = tpu.matmul %46, %8, %cst_46 {dimension_numbers = #tpu.dot_dimension_numbers<[1], [0], [0], [1], [0, 0, 1, 1], [], []>} : vector<36x169xf32>, vector<169x32xf32>, vector<36x32xf32> -> vector<36x32xf32>
    %c5_47 = arith.constant 5 : index
    %c0_48 = arith.constant 0 : index
    %c0_49 = arith.constant 0 : index
    %48 = vector.load %arg5[%c5_47, %c0_48, %c0_49] : memref<9x32x64xf32, #tpu.memory_space<vmem>>, vector<1x32x64xf32>
    %49 = vector.shape_cast %48 : vector<1x32x64xf32> to vector<32x64xf32>
    %cst_50 = arith.constant dense<0.000000e+00> : vector<36x64xf32>
    %50 = tpu.matmul %47, %49, %cst_50 {dimension_numbers = #tpu.dot_dimension_numbers<[1], [0], [0], [1], [0, 0, 1, 1], [], []>} : vector<36x32xf32>, vector<32x64xf32>, vector<36x64xf32> -> vector<36x64xf32>
    %51 = arith.addf %44, %50 : vector<36x64xf32>
    %c6 = arith.constant 6 : index
    %c0_51 = arith.constant 0 : index
    %c0_52 = arith.constant 0 : index
    %52 = vector.load %arg4[%c6, %c0_51, %c0_52] : memref<9x36x169xf32, #tpu.memory_space<vmem>>, vector<1x36x169xf32>
    %53 = vector.shape_cast %52 : vector<1x36x169xf32> to vector<36x169xf32>
    %cst_53 = arith.constant dense<0.000000e+00> : vector<36x32xf32>
    %54 = tpu.matmul %53, %8, %cst_53 {dimension_numbers = #tpu.dot_dimension_numbers<[1], [0], [0], [1], [0, 0, 1, 1], [], []>} : vector<36x169xf32>, vector<169x32xf32>, vector<36x32xf32> -> vector<36x32xf32>
    %c6_54 = arith.constant 6 : index
    %c0_55 = arith.constant 0 : index
    %c0_56 = arith.constant 0 : index
    %55 = vector.load %arg5[%c6_54, %c0_55, %c0_56] : memref<9x32x64xf32, #tpu.memory_space<vmem>>, vector<1x32x64xf32>
    %56 = vector.shape_cast %55 : vector<1x32x64xf32> to vector<32x64xf32>
    %cst_57 = arith.constant dense<0.000000e+00> : vector<36x64xf32>
    %57 = tpu.matmul %54, %56, %cst_57 {dimension_numbers = #tpu.dot_dimension_numbers<[1], [0], [0], [1], [0, 0, 1, 1], [], []>} : vector<36x32xf32>, vector<32x64xf32>, vector<36x64xf32> -> vector<36x64xf32>
    %58 = arith.addf %51, %57 : vector<36x64xf32>
    %c7 = arith.constant 7 : index
    %c0_58 = arith.constant 0 : index
    %c0_59 = arith.constant 0 : index
    %59 = vector.load %arg4[%c7, %c0_58, %c0_59] : memref<9x36x169xf32, #tpu.memory_space<vmem>>, vector<1x36x169xf32>
    %60 = vector.shape_cast %59 : vector<1x36x169xf32> to vector<36x169xf32>
    %cst_60 = arith.constant dense<0.000000e+00> : vector<36x32xf32>
    %61 = tpu.matmul %60, %8, %cst_60 {dimension_numbers = #tpu.dot_dimension_numbers<[1], [0], [0], [1], [0, 0, 1, 1], [], []>} : vector<36x169xf32>, vector<169x32xf32>, vector<36x32xf32> -> vector<36x32xf32>
    %c7_61 = arith.constant 7 : index
    %c0_62 = arith.constant 0 : index
    %c0_63 = arith.constant 0 : index
    %62 = vector.load %arg5[%c7_61, %c0_62, %c0_63] : memref<9x32x64xf32, #tpu.memory_space<vmem>>, vector<1x32x64xf32>
    %63 = vector.shape_cast %62 : vector<1x32x64xf32> to vector<32x64xf32>
    %cst_64 = arith.constant dense<0.000000e+00> : vector<36x64xf32>
    %64 = tpu.matmul %61, %63, %cst_64 {dimension_numbers = #tpu.dot_dimension_numbers<[1], [0], [0], [1], [0, 0, 1, 1], [], []>} : vector<36x32xf32>, vector<32x64xf32>, vector<36x64xf32> -> vector<36x64xf32>
    %65 = arith.addf %58, %64 : vector<36x64xf32>
    %c8 = arith.constant 8 : index
    %c0_65 = arith.constant 0 : index
    %c0_66 = arith.constant 0 : index
    %66 = vector.load %arg4[%c8, %c0_65, %c0_66] : memref<9x36x169xf32, #tpu.memory_space<vmem>>, vector<1x36x169xf32>
    %67 = vector.shape_cast %66 : vector<1x36x169xf32> to vector<36x169xf32>
    %cst_67 = arith.constant dense<0.000000e+00> : vector<36x32xf32>
    %68 = tpu.matmul %67, %8, %cst_67 {dimension_numbers = #tpu.dot_dimension_numbers<[1], [0], [0], [1], [0, 0, 1, 1], [], []>} : vector<36x169xf32>, vector<169x32xf32>, vector<36x32xf32> -> vector<36x32xf32>
    %c8_68 = arith.constant 8 : index
    %c0_69 = arith.constant 0 : index
    %c0_70 = arith.constant 0 : index
    %69 = vector.load %arg5[%c8_68, %c0_69, %c0_70] : memref<9x32x64xf32, #tpu.memory_space<vmem>>, vector<1x32x64xf32>
    %70 = vector.shape_cast %69 : vector<1x32x64xf32> to vector<32x64xf32>
    %cst_71 = arith.constant dense<0.000000e+00> : vector<36x64xf32>
    %71 = tpu.matmul %68, %70, %cst_71 {dimension_numbers = #tpu.dot_dimension_numbers<[1], [0], [0], [1], [0, 0, 1, 1], [], []>} : vector<36x32xf32>, vector<32x64xf32>, vector<36x64xf32> -> vector<36x64xf32>
    %72 = arith.addf %65, %71 : vector<36x64xf32>
    %c0_72 = arith.constant 0 : index
    %c0_73 = arith.constant 0 : index
    %73 = vector.load %arg6[%c0_72, %c0_73] : memref<1x64xf32, #tpu.memory_space<vmem>>, vector<1x64xf32>
    %74 = vector.broadcast %73 : vector<1x64xf32> to vector<36x64xf32>
    %75 = arith.addf %72, %74 : vector<36x64xf32>
    %cst_74 = arith.constant 0.000000e+00 : f32
    %76 = vector.broadcast %cst_74 : f32 to vector<36x64xf32>
    %77 = arith.maximumf %75, %76 : vector<36x64xf32>
    %c0_75 = arith.constant 0 : index
    %c0_76 = arith.constant 0 : index
    %78 = vector.load %arg7[%c0_75, %c0_76] : memref<64x8xf32, #tpu.memory_space<vmem>>, vector<64x8xf32>
    %cst_77 = arith.constant dense<0.000000e+00> : vector<36x8xf32>
    %79 = tpu.matmul %77, %78, %cst_77 {dimension_numbers = #tpu.dot_dimension_numbers<[1], [0], [0], [1], [0, 0, 1, 1], [], []>} : vector<36x64xf32>, vector<64x8xf32>, vector<36x8xf32> -> vector<36x8xf32>
    %cst_78 = arith.constant 0.000000e+00 : f32
    %80 = vector.broadcast %cst_78 : f32 to vector<16x10xf32>
    %c0_79 = arith.constant 0 : index
    %c0_80 = arith.constant 0 : index
    %c0_81 = arith.constant 0 : index
    %81 = vector.load %arg8[%c0_79, %c0_80, %c0_81] : memref<9x16x36xf32, #tpu.memory_space<vmem>>, vector<1x16x36xf32>
    %82 = vector.shape_cast %81 : vector<1x16x36xf32> to vector<16x36xf32>
    %cst_82 = arith.constant dense<0.000000e+00> : vector<16x8xf32>
    %83 = tpu.matmul %82, %79, %cst_82 {dimension_numbers = #tpu.dot_dimension_numbers<[1], [0], [0], [1], [0, 0, 1, 1], [], []>} : vector<16x36xf32>, vector<36x8xf32>, vector<16x8xf32> -> vector<16x8xf32>
    %c0_83 = arith.constant 0 : index
    %c0_84 = arith.constant 0 : index
    %c0_85 = arith.constant 0 : index
    %84 = vector.load %arg9[%c0_83, %c0_84, %c0_85] : memref<9x8x10xf32, #tpu.memory_space<vmem>>, vector<1x8x10xf32>
    %85 = vector.shape_cast %84 : vector<1x8x10xf32> to vector<8x10xf32>
    %cst_86 = arith.constant dense<0.000000e+00> : vector<16x10xf32>
    %86 = tpu.matmul %83, %85, %cst_86 {dimension_numbers = #tpu.dot_dimension_numbers<[1], [0], [0], [1], [0, 0, 1, 1], [], []>} : vector<16x8xf32>, vector<8x10xf32>, vector<16x10xf32> -> vector<16x10xf32>
    %87 = arith.addf %80, %86 : vector<16x10xf32>
    %c1_87 = arith.constant 1 : index
    %c0_88 = arith.constant 0 : index
    %c0_89 = arith.constant 0 : index
    %88 = vector.load %arg8[%c1_87, %c0_88, %c0_89] : memref<9x16x36xf32, #tpu.memory_space<vmem>>, vector<1x16x36xf32>
    %89 = vector.shape_cast %88 : vector<1x16x36xf32> to vector<16x36xf32>
    %cst_90 = arith.constant dense<0.000000e+00> : vector<16x8xf32>
    %90 = tpu.matmul %89, %79, %cst_90 {dimension_numbers = #tpu.dot_dimension_numbers<[1], [0], [0], [1], [0, 0, 1, 1], [], []>} : vector<16x36xf32>, vector<36x8xf32>, vector<16x8xf32> -> vector<16x8xf32>
    %c1_91 = arith.constant 1 : index
    %c0_92 = arith.constant 0 : index
    %c0_93 = arith.constant 0 : index
    %91 = vector.load %arg9[%c1_91, %c0_92, %c0_93] : memref<9x8x10xf32, #tpu.memory_space<vmem>>, vector<1x8x10xf32>
    %92 = vector.shape_cast %91 : vector<1x8x10xf32> to vector<8x10xf32>
    %cst_94 = arith.constant dense<0.000000e+00> : vector<16x10xf32>
    %93 = tpu.matmul %90, %92, %cst_94 {dimension_numbers = #tpu.dot_dimension_numbers<[1], [0], [0], [1], [0, 0, 1, 1], [], []>} : vector<16x8xf32>, vector<8x10xf32>, vector<16x10xf32> -> vector<16x10xf32>
    %94 = arith.addf %87, %93 : vector<16x10xf32>
    %c2_95 = arith.constant 2 : index
    %c0_96 = arith.constant 0 : index
    %c0_97 = arith.constant 0 : index
    %95 = vector.load %arg8[%c2_95, %c0_96, %c0_97] : memref<9x16x36xf32, #tpu.memory_space<vmem>>, vector<1x16x36xf32>
    %96 = vector.shape_cast %95 : vector<1x16x36xf32> to vector<16x36xf32>
    %cst_98 = arith.constant dense<0.000000e+00> : vector<16x8xf32>
    %97 = tpu.matmul %96, %79, %cst_98 {dimension_numbers = #tpu.dot_dimension_numbers<[1], [0], [0], [1], [0, 0, 1, 1], [], []>} : vector<16x36xf32>, vector<36x8xf32>, vector<16x8xf32> -> vector<16x8xf32>
    %c2_99 = arith.constant 2 : index
    %c0_100 = arith.constant 0 : index
    %c0_101 = arith.constant 0 : index
    %98 = vector.load %arg9[%c2_99, %c0_100, %c0_101] : memref<9x8x10xf32, #tpu.memory_space<vmem>>, vector<1x8x10xf32>
    %99 = vector.shape_cast %98 : vector<1x8x10xf32> to vector<8x10xf32>
    %cst_102 = arith.constant dense<0.000000e+00> : vector<16x10xf32>
    %100 = tpu.matmul %97, %99, %cst_102 {dimension_numbers = #tpu.dot_dimension_numbers<[1], [0], [0], [1], [0, 0, 1, 1], [], []>} : vector<16x8xf32>, vector<8x10xf32>, vector<16x10xf32> -> vector<16x10xf32>
    %101 = arith.addf %94, %100 : vector<16x10xf32>
    %c3_103 = arith.constant 3 : index
    %c0_104 = arith.constant 0 : index
    %c0_105 = arith.constant 0 : index
    %102 = vector.load %arg8[%c3_103, %c0_104, %c0_105] : memref<9x16x36xf32, #tpu.memory_space<vmem>>, vector<1x16x36xf32>
    %103 = vector.shape_cast %102 : vector<1x16x36xf32> to vector<16x36xf32>
    %cst_106 = arith.constant dense<0.000000e+00> : vector<16x8xf32>
    %104 = tpu.matmul %103, %79, %cst_106 {dimension_numbers = #tpu.dot_dimension_numbers<[1], [0], [0], [1], [0, 0, 1, 1], [], []>} : vector<16x36xf32>, vector<36x8xf32>, vector<16x8xf32> -> vector<16x8xf32>
    %c3_107 = arith.constant 3 : index
    %c0_108 = arith.constant 0 : index
    %c0_109 = arith.constant 0 : index
    %105 = vector.load %arg9[%c3_107, %c0_108, %c0_109] : memref<9x8x10xf32, #tpu.memory_space<vmem>>, vector<1x8x10xf32>
    %106 = vector.shape_cast %105 : vector<1x8x10xf32> to vector<8x10xf32>
    %cst_110 = arith.constant dense<0.000000e+00> : vector<16x10xf32>
    %107 = tpu.matmul %104, %106, %cst_110 {dimension_numbers = #tpu.dot_dimension_numbers<[1], [0], [0], [1], [0, 0, 1, 1], [], []>} : vector<16x8xf32>, vector<8x10xf32>, vector<16x10xf32> -> vector<16x10xf32>
    %108 = arith.addf %101, %107 : vector<16x10xf32>
    %c4_111 = arith.constant 4 : index
    %c0_112 = arith.constant 0 : index
    %c0_113 = arith.constant 0 : index
    %109 = vector.load %arg8[%c4_111, %c0_112, %c0_113] : memref<9x16x36xf32, #tpu.memory_space<vmem>>, vector<1x16x36xf32>
    %110 = vector.shape_cast %109 : vector<1x16x36xf32> to vector<16x36xf32>
    %cst_114 = arith.constant dense<0.000000e+00> : vector<16x8xf32>
    %111 = tpu.matmul %110, %79, %cst_114 {dimension_numbers = #tpu.dot_dimension_numbers<[1], [0], [0], [1], [0, 0, 1, 1], [], []>} : vector<16x36xf32>, vector<36x8xf32>, vector<16x8xf32> -> vector<16x8xf32>
    %c4_115 = arith.constant 4 : index
    %c0_116 = arith.constant 0 : index
    %c0_117 = arith.constant 0 : index
    %112 = vector.load %arg9[%c4_115, %c0_116, %c0_117] : memref<9x8x10xf32, #tpu.memory_space<vmem>>, vector<1x8x10xf32>
    %113 = vector.shape_cast %112 : vector<1x8x10xf32> to vector<8x10xf32>
    %cst_118 = arith.constant dense<0.000000e+00> : vector<16x10xf32>
    %114 = tpu.matmul %111, %113, %cst_118 {dimension_numbers = #tpu.dot_dimension_numbers<[1], [0], [0], [1], [0, 0, 1, 1], [], []>} : vector<16x8xf32>, vector<8x10xf32>, vector<16x10xf32> -> vector<16x10xf32>
    %115 = arith.addf %108, %114 : vector<16x10xf32>
    %c5_119 = arith.constant 5 : index
    %c0_120 = arith.constant 0 : index
    %c0_121 = arith.constant 0 : index
    %116 = vector.load %arg8[%c5_119, %c0_120, %c0_121] : memref<9x16x36xf32, #tpu.memory_space<vmem>>, vector<1x16x36xf32>
    %117 = vector.shape_cast %116 : vector<1x16x36xf32> to vector<16x36xf32>
    %cst_122 = arith.constant dense<0.000000e+00> : vector<16x8xf32>
    %118 = tpu.matmul %117, %79, %cst_122 {dimension_numbers = #tpu.dot_dimension_numbers<[1], [0], [0], [1], [0, 0, 1, 1], [], []>} : vector<16x36xf32>, vector<36x8xf32>, vector<16x8xf32> -> vector<16x8xf32>
    %c5_123 = arith.constant 5 : index
    %c0_124 = arith.constant 0 : index
    %c0_125 = arith.constant 0 : index
    %119 = vector.load %arg9[%c5_123, %c0_124, %c0_125] : memref<9x8x10xf32, #tpu.memory_space<vmem>>, vector<1x8x10xf32>
    %120 = vector.shape_cast %119 : vector<1x8x10xf32> to vector<8x10xf32>
    %cst_126 = arith.constant dense<0.000000e+00> : vector<16x10xf32>
    %121 = tpu.matmul %118, %120, %cst_126 {dimension_numbers = #tpu.dot_dimension_numbers<[1], [0], [0], [1], [0, 0, 1, 1], [], []>} : vector<16x8xf32>, vector<8x10xf32>, vector<16x10xf32> -> vector<16x10xf32>
    %122 = arith.addf %115, %121 : vector<16x10xf32>
    %c6_127 = arith.constant 6 : index
    %c0_128 = arith.constant 0 : index
    %c0_129 = arith.constant 0 : index
    %123 = vector.load %arg8[%c6_127, %c0_128, %c0_129] : memref<9x16x36xf32, #tpu.memory_space<vmem>>, vector<1x16x36xf32>
    %124 = vector.shape_cast %123 : vector<1x16x36xf32> to vector<16x36xf32>
    %cst_130 = arith.constant dense<0.000000e+00> : vector<16x8xf32>
    %125 = tpu.matmul %124, %79, %cst_130 {dimension_numbers = #tpu.dot_dimension_numbers<[1], [0], [0], [1], [0, 0, 1, 1], [], []>} : vector<16x36xf32>, vector<36x8xf32>, vector<16x8xf32> -> vector<16x8xf32>
    %c6_131 = arith.constant 6 : index
    %c0_132 = arith.constant 0 : index
    %c0_133 = arith.constant 0 : index
    %126 = vector.load %arg9[%c6_131, %c0_132, %c0_133] : memref<9x8x10xf32, #tpu.memory_space<vmem>>, vector<1x8x10xf32>
    %127 = vector.shape_cast %126 : vector<1x8x10xf32> to vector<8x10xf32>
    %cst_134 = arith.constant dense<0.000000e+00> : vector<16x10xf32>
    %128 = tpu.matmul %125, %127, %cst_134 {dimension_numbers = #tpu.dot_dimension_numbers<[1], [0], [0], [1], [0, 0, 1, 1], [], []>} : vector<16x8xf32>, vector<8x10xf32>, vector<16x10xf32> -> vector<16x10xf32>
    %129 = arith.addf %122, %128 : vector<16x10xf32>
    %c7_135 = arith.constant 7 : index
    %c0_136 = arith.constant 0 : index
    %c0_137 = arith.constant 0 : index
    %130 = vector.load %arg8[%c7_135, %c0_136, %c0_137] : memref<9x16x36xf32, #tpu.memory_space<vmem>>, vector<1x16x36xf32>
    %131 = vector.shape_cast %130 : vector<1x16x36xf32> to vector<16x36xf32>
    %cst_138 = arith.constant dense<0.000000e+00> : vector<16x8xf32>
    %132 = tpu.matmul %131, %79, %cst_138 {dimension_numbers = #tpu.dot_dimension_numbers<[1], [0], [0], [1], [0, 0, 1, 1], [], []>} : vector<16x36xf32>, vector<36x8xf32>, vector<16x8xf32> -> vector<16x8xf32>
    %c7_139 = arith.constant 7 : index
    %c0_140 = arith.constant 0 : index
    %c0_141 = arith.constant 0 : index
    %133 = vector.load %arg9[%c7_139, %c0_140, %c0_141] : memref<9x8x10xf32, #tpu.memory_space<vmem>>, vector<1x8x10xf32>
    %134 = vector.shape_cast %133 : vector<1x8x10xf32> to vector<8x10xf32>
    %cst_142 = arith.constant dense<0.000000e+00> : vector<16x10xf32>
    %135 = tpu.matmul %132, %134, %cst_142 {dimension_numbers = #tpu.dot_dimension_numbers<[1], [0], [0], [1], [0, 0, 1, 1], [], []>} : vector<16x8xf32>, vector<8x10xf32>, vector<16x10xf32> -> vector<16x10xf32>
    %136 = arith.addf %129, %135 : vector<16x10xf32>
    %c8_143 = arith.constant 8 : index
    %c0_144 = arith.constant 0 : index
    %c0_145 = arith.constant 0 : index
    %137 = vector.load %arg8[%c8_143, %c0_144, %c0_145] : memref<9x16x36xf32, #tpu.memory_space<vmem>>, vector<1x16x36xf32>
    %138 = vector.shape_cast %137 : vector<1x16x36xf32> to vector<16x36xf32>
    %cst_146 = arith.constant dense<0.000000e+00> : vector<16x8xf32>
    %139 = tpu.matmul %138, %79, %cst_146 {dimension_numbers = #tpu.dot_dimension_numbers<[1], [0], [0], [1], [0, 0, 1, 1], [], []>} : vector<16x36xf32>, vector<36x8xf32>, vector<16x8xf32> -> vector<16x8xf32>
    %c8_147 = arith.constant 8 : index
    %c0_148 = arith.constant 0 : index
    %c0_149 = arith.constant 0 : index
    %140 = vector.load %arg9[%c8_147, %c0_148, %c0_149] : memref<9x8x10xf32, #tpu.memory_space<vmem>>, vector<1x8x10xf32>
    %141 = vector.shape_cast %140 : vector<1x8x10xf32> to vector<8x10xf32>
    %cst_150 = arith.constant dense<0.000000e+00> : vector<16x10xf32>
    %142 = tpu.matmul %139, %141, %cst_150 {dimension_numbers = #tpu.dot_dimension_numbers<[1], [0], [0], [1], [0, 0, 1, 1], [], []>} : vector<16x8xf32>, vector<8x10xf32>, vector<16x10xf32> -> vector<16x10xf32>
    %143 = arith.addf %136, %142 : vector<16x10xf32>
    %c0_151 = arith.constant 0 : index
    %c0_152 = arith.constant 0 : index
    %144 = vector.load %arg10[%c0_151, %c0_152] : memref<1x10xf32, #tpu.memory_space<vmem>>, vector<1x10xf32>
    %145 = vector.broadcast %144 : vector<1x10xf32> to vector<16x10xf32>
    %146 = arith.addf %143, %145 : vector<16x10xf32>
    %cst_153 = arith.constant 0.000000e+00 : f32
    %147 = vector.broadcast %cst_153 : f32 to vector<16x10xf32>
    %148 = arith.maximumf %146, %147 : vector<16x10xf32>
    %cst_154 = arith.constant dense<0.000000e+00> : vector<10xf32>
    %149 = vector.multi_reduction <add>, %148, %cst_154 [0] : vector<16x10xf32> to vector<10xf32>
    %150 = vector.shape_cast %149 : vector<10xf32> to vector<1x10xf32>
    %cst_155 = arith.constant 1.600000e+01 : f32
    %151 = vector.broadcast %cst_155 : f32 to vector<1x10xf32>
    %152 = arith.divf %150, %151 : vector<1x10xf32>
    %cst_156 = arith.constant dense<0xFF800000> : vector<1xf32>
    %153 = vector.multi_reduction <maximumf>, %152, %cst_156 [1] : vector<1x10xf32> to vector<1xf32>
    %154 = vector.shape_cast %153 : vector<1xf32> to vector<1x1xf32>
    %155 = vector.broadcast %154 : vector<1x1xf32> to vector<1x10xf32>
    %156 = arith.subf %152, %155 : vector<1x10xf32>
    %157 = math.exp %156 : vector<1x10xf32>
    %cst_157 = arith.constant dense<0.000000e+00> : vector<1xf32>
    %158 = vector.multi_reduction <add>, %157, %cst_157 [1] : vector<1x10xf32> to vector<1xf32>
    %159 = vector.shape_cast %158 : vector<1xf32> to vector<1x1xf32>
    %160 = math.log %159 : vector<1x1xf32>
    %161 = arith.addf %160, %154 : vector<1x1xf32>
    %162 = vector.broadcast %161 : vector<1x1xf32> to vector<1x10xf32>
    %163 = arith.subf %152, %162 : vector<1x10xf32>
    %c0_158 = arith.constant 0 : index
    %c0_159 = arith.constant 0 : index
    %c0_160 = arith.constant 0 : index
    %164 = vector.load %arg11[%c0_158, %c0_159, %c0_160] : memref<1x1x10xf32, #tpu.memory_space<vmem>>, vector<1x1x10xf32>
    %165 = vector.shape_cast %164 : vector<1x1x10xf32> to vector<1x10xf32>
    %166 = vector.shape_cast %163 : vector<1x10xf32> to vector<1x1x10xf32>
    tpu.vector_store %arg11[%c0_158, %c0_159, %c0_160], %166 {strides = array<i32>} : memref<1x1x10xf32, #tpu.memory_space<vmem>>, vector<1x1x10xf32>,
    return
  }
  func.func @transform_0(%arg0: i32) -> (i32, i32, i32) {
    %c0_i32 = arith.constant 0 : i32
    %c0_i32_0 = arith.constant 0 : i32
    %c0_i32_1 = arith.constant 0 : i32
    return %arg0, %c0_i32, %c0_i32_0 : i32, i32, i32
  }
  func.func @transform_1(%arg0: i32) -> (i32, i32) {
    %c0_i32 = arith.constant 0 : i32
    %c0_i32_0 = arith.constant 0 : i32
    %c0_i32_1 = arith.constant 0 : i32
    return %c0_i32, %c0_i32_0 : i32, i32
  }
  func.func @transform_2(%arg0: i32) -> (i32, i32) {
    %c0_i32 = arith.constant 0 : i32
    %c0_i32_0 = arith.constant 0 : i32
    %c0_i32_1 = arith.constant 0 : i32
    return %c0_i32, %c0_i32_0 : i32, i32
  }
  func.func @transform_3(%arg0: i32) -> (i32, i32, i32) {
    %c0_i32 = arith.constant 0 : i32
    %c0_i32_0 = arith.constant 0 : i32
    %c0_i32_1 = arith.constant 0 : i32
    %c0_i32_2 = arith.constant 0 : i32
    return %c0_i32, %c0_i32_0, %c0_i32_1 : i32, i32, i32
  }
  func.func @transform_4(%arg0: i32) -> (i32, i32, i32) {
    %c0_i32 = arith.constant 0 : i32
    %c0_i32_0 = arith.constant 0 : i32
    %c0_i32_1 = arith.constant 0 : i32
    %c0_i32_2 = arith.constant 0 : i32
    return %c0_i32, %c0_i32_0, %c0_i32_1 : i32, i32, i32
  }
  func.func @transform_5(%arg0: i32) -> (i32, i32) {
    %c0_i32 = arith.constant 0 : i32
    %c0_i32_0 = arith.constant 0 : i32
    %c0_i32_1 = arith.constant 0 : i32
    return %c0_i32, %c0_i32_0 : i32, i32
  }
  func.func @transform_6(%arg0: i32) -> (i32, i32) {
    %c0_i32 = arith.constant 0 : i32
    %c0_i32_0 = arith.constant 0 : i32
    %c0_i32_1 = arith.constant 0 : i32
    return %c0_i32, %c0_i32_0 : i32, i32
  }
  func.func @transform_7(%arg0: i32) -> (i32, i32, i32) {
    %c0_i32 = arith.constant 0 : i32
    %c0_i32_0 = arith.constant 0 : i32
    %c0_i32_1 = arith.constant 0 : i32
    %c0_i32_2 = arith.constant 0 : i32
    return %c0_i32, %c0_i32_0, %c0_i32_1 : i32, i32, i32
  }
  func.func @transform_8(%arg0: i32) -> (i32, i32, i32) {
    %c0_i32 = arith.constant 0 : i32
    %c0_i32_0 = arith.constant 0 : i32
    %c0_i32_1 = arith.constant 0 : i32
    %c0_i32_2 = arith.constant 0 : i32
    return %c0_i32, %c0_i32_0, %c0_i32_1 : i32, i32, i32
  }
  func.func @transform_9(%arg0: i32) -> (i32, i32) {
    %c0_i32 = arith.constant 0 : i32
    %c0_i32_0 = arith.constant 0 : i32
    %c0_i32_1 = arith.constant 0 : i32
    return %c0_i32, %c0_i32_0 : i32, i32
  }
  func.func @transform_10(%arg0: i32) -> (i32, i32, i32) {
    %c0_i32 = arith.constant 0 : i32
    %c0_i32_0 = arith.constant 0 : i32
    %c0_i32_1 = arith.constant 0 : i32
    return %arg0, %c0_i32, %c0_i32_0 : i32, i32, i32
  }
}

</mosaic_0001>

<bundles_post_ra>
// kernel: net_forward.2
= control target key start
LH: loop header
LB: loop body
LE: loop exit
PB: predicated region body
PF: predicated region fallthrough
CT: control target
= control target key end

     0   :  { %s1615_s9 = smov 0   ;;  %s1889_s0 = inlined_call_operand.vmem [shape: f32[2,28,1540], index: 0, kind: input, shape index: {}]   ;;  %s1890_s1 = inlined_call_operand.vmem [shape: f32[2,1540,28], index: 1, kind: input, shape index: {}]   ;;  %s1891_s2 = inlined_call_operand.vmem [shape: f32[2,28,28], index: 2, kind: output, shape index: {}]  }
   0x1 LB: > { %s1094_s10 = sadd.s32 4294967295, %s1598_s9   ;;  %p1098_p0 = scmp.ge.s32.totalorder %s1598_s9, 1  ;;  %s1598_s9 = sphi %s1615_s9, %s12_s9  }
   0x2   : > { %p122_p1 = scmp.lt.s32.totalorder %s1598_s9, 3 }
   0x4   : > { %p123_p2 = pnand %p1098_p0, %p122_p1 }
   0x5   : > { %p149_p3 = scmp.lt.s32.totalorder (!%p123_p2), %s1094_s10, 1  ;;  %vm422_vm0 = vcmask (!%p123_p2), 1043456   ;;  %vm409_vm1 = vcmask (!%p123_p2), 31744   ;;  %vm1021_vm2 = vcmask (!%p123_p2), 228352   ;;  %vm1025_vm3 = vcmask (!%p123_p2), 224256  }
   0x6   : > { %126 = sbr.rel (%p123_p2) target bundleno = 351 (0x15f), region = 28 }
   0xd   : > { %s1893_s10 = smov (!%p149_p3, %s1094_s10), 1 }
   0xe   : > { %s1583_s11 = smul.u32 1544, %s1893_s10  ;;  %s1110_s19 = sshll.u32 %s1893_s10, 5 }
   0xf   : > { %s1582_s15 = smul.u32 416, %s1893_s10  ;;  %s163_s22 = scalar_lea.vmem %s1891_s2, %s1110_s19 }
  0x10   : > { %s1629_s14 = scalar_lea.vmem %s1890_s1, %s1583_s11 }
  0x11   : > { %v232_v0 = vld [vmem:[%s1629_s14 + $0x80] sm:$0xff]  ;;  %v233_v1 = vld [vmem:[%s1629_s14 + $0x88] sm:$0xff]  ;;  %v234_v11 = vld [vmem:[%s1629_s14 + $0x90] sm:$0xff]  ;;  %s1685_s18 = scalar_lea.vmem %s1889_s0, %s1582_s15 }
  0x12   : > { %v264_v2 = vld [vmem:[%s1629_s14 + $0x180] sm:$0xff]  ;;  %v1388_v3 = vpack.c.bf16 %v233_v1, %v232_v0  ;;  %v265_v4 = vld [vmem:[%s1629_s14 + $0x188] sm:$0xff]  ;;  %v235_v13 = vld [vmem:[%s1629_s14 + $0x98] sm:$0xff] }
  0x13   : > { %v216_v5 = vld [vmem:[%s1629_s14] sm:$0xff]  ;;  %v217_v6 = vld [vmem:[%s1629_s14 + $0x8] sm:$0xff]  ;;  %v1420_v7 = vpack.c.bf16 %v265_v4, %v264_v2  ;;  %v266_v14 = vld [vmem:[%s1629_s14 + $0x190] sm:$0xff]  ;;  %v1392_v16 = vpack.c.bf16 %v235_v13, %v234_v11 }
  0x14   : > { %v1390_v8 = vpack.c.bf16 %v217_v6, %v216_v5  ;;  %v248_v9 = vld [vmem:[%s1629_s14 + $0x100] sm:$0xff]  ;;  %v249_v10 = vld [vmem:[%s1629_s14 + $0x108] sm:$0xff]  ;;  %1389 = vmatprep.subr.bf16.mxu0 %v1388_v3  ;;  %v267_v15 = vld [vmem:[%s1629_s14 + $0x198] sm:$0xff] }
  0x15   : > { %v1422_v12 = vpack.c.bf16 %v249_v10, %v248_v9  ;;  %1421 = vmatprep.subr.bf16.mxu1 %v1420_v7  ;;  %v1424_v17 = vpack.c.bf16 %v267_v15, %v266_v14  ;;  %v218_v18 = vld [vmem:[%s1629_s14 + $0x10] sm:$0xff]  ;;  %v219_v19 = vld [vmem:[%s1629_s14 + $0x18] sm:$0xff]  ;;  %v236_v23 = vld [vmem:[%s1629_s14 + $0xa0] sm:$0xff] }
  0x16   : > { %1391 = vmatpush3.bf16.msra.mxu0 %v1390_v8  ;;  %v250_v20 = vld [vmem:[%s1629_s14 + $0x110] sm:$0xff]  ;;  %v1394_v21 = vpack.c.bf16 %v219_v19, %v218_v18  ;;  %v251_v22 = vld [vmem:[%s1629_s14 + $0x118] sm:$0xff]  ;;  %v237_v24 = vld [vmem:[%s1629_s14 + $0xa8] sm:$0xff] }
  0x17   : > { %1423 = vmatpush3.bf16.msra.mxu1 %v1422_v12  ;;  %1393 = vmatprep.subr.bf16.mxu0 %v1392_v16  ;;  %v1426_v25 = vpack.c.bf16 %v251_v22, %v250_v20  ;;  %v1396_v26 = vpack.c.bf16 %v237_v24, %v236_v23  ;;  %v268_v27 = vld [vmem:[%s1629_s14 + $0x1a0] sm:$0xff]  ;;  %v269_v28 = vld [vmem:[%s1629_s14 + $0x1a8] sm:$0xff]  ;;  %v238_v35 = vld [vmem:[%s1629_s14 + $0xb0] sm:$0xff] }
  0x18   : > { %1425 = vmatprep.subr.bf16.mxu1 %v1424_v17  ;;  %v220_v29 = vld [vmem:[%s1629_s14 + $0x20] sm:$0xff]  ;;  %v1428_v30 = vpack.c.bf16 %v269_v28, %v268_v27  ;;  %v221_v31 = vld [vmem:[%s1629_s14 + $0x28] sm:$0xff]  ;;  %v239_v36 = vld [vmem:[%s1629_s14 + $0xb8] sm:$0xff] }
  0x19   : > { %v252_v32 = vld [vmem:[%s1629_s14 + $0x120] sm:$0xff]  ;;  %v253_v33 = vld [vmem:[%s1629_s14 + $0x128] sm:$0xff]  ;;  %v1398_v34 = vpack.c.bf16 %v221_v31, %v220_v29  ;;  %v270_v37 = vld [vmem:[%s1629_s14 + $0x1b0] sm:$0xff]  ;;  %v1400_v39 = vpack.c.bf16 %v239_v36, %v238_v35 }
  0x1a   : > { %1395 = vmatpush3.bf16.msra.mxu0 %v1394_v21  ;;  %v1430_v38 = vpack.c.bf16 %v253_v33, %v252_v32  ;;  %v271_v40 = vld [vmem:[%s1629_s14 + $0x1b8] sm:$0xff]  ;;  %v222_v41 = vld [vmem:[%s1629_s14 + $0x30] sm:$0xff]  ;;  %v240_v46 = vld [vmem:[%s1629_s14 + $0xc0] sm:$0xff] }
  0x1b   : > { %1427 = vmatpush3.bf16.msra.mxu1 %v1426_v25  ;;  %1397 = vmatprep.subr.bf16.mxu0 %v1396_v26  ;;  %v223_v42 = vld [vmem:[%s1629_s14 + $0x38] sm:$0xff]  ;;  %v1432_v43 = vpack.c.bf16 %v271_v40, %v270_v37  ;;  %v254_v44 = vld [vmem:[%s1629_s14 + $0x130] sm:$0xff]  ;;  %v241_v47 = vld [vmem:[%s1629_s14 + $0xc8] sm:$0xff] }
  0x1c   : > { %1429 = vmatprep.subr.bf16.mxu1 %v1428_v30  ;;  %v255_v45 = vld [vmem:[%s1629_s14 + $0x138] sm:$0xff]  ;;  %v272_v48 = vld [vmem:[%s1629_s14 + $0x1c0] sm:$0xff]  ;;  %v273_v49 = vld [vmem:[%s1629_s14 + $0x1c8] sm:$0xff]  ;;  %v1402_v50 = vpack.c.bf16 %v223_v42, %v222_v41  ;;  %v1404_v52 = vpack.c.bf16 %v241_v47, %v240_v46 }
  0x1d   : > { %v1434_v51 = vpack.c.bf16 %v255_v45, %v254_v44  ;;  %v224_v53 = vld [vmem:[%s1629_s14 + $0x40] sm:$0xff]  ;;  %v225_v54 = vld [vmem:[%s1629_s14 + $0x48] sm:$0xff]  ;;  %v1436_v56 = vpack.c.bf16 %v273_v49, %v272_v48  ;;  %v242_v58 = vld [vmem:[%s1629_s14 + $0xd0] sm:$0xff] }
  0x1e   : > { %1399 = vmatpush3.bf16.msra.mxu0 %v1398_v34  ;;  %v256_v55 = vld [vmem:[%s1629_s14 + $0x140] sm:$0xff]  ;;  %v257_v57 = vld [vmem:[%s1629_s14 + $0x148] sm:$0xff]  ;;  %v243_v59 = vld [vmem:[%s1629_s14 + $0xd8] sm:$0xff]  ;;  %v1406_v62 = vpack.c.bf16 %v225_v54, %v224_v53 }
  0x1f   : > { %1431 = vmatpush3.bf16.msra.mxu1 %v1430_v38  ;;  %1401 = vmatprep.subr.bf16.mxu0 %v1400_v39  ;;  %v274_v60 = vld [vmem:[%s1629_s14 + $0x1d0] sm:$0xff]  ;;  %v275_v61 = vld [vmem:[%s1629_s14 + $0x1d8] sm:$0xff]  ;;  %v1438_v63 = vpack.c.bf16 %v257_v57, %v256_v55  ;;  %v1408_v0 = vpack.c.bf16 %v243_v59, %v242_v58  ;;  %v244_v6 = vld [vmem:[%s1629_s14 + $0xe0] sm:$0xff] }
  0x20   : > { %1433 = vmatprep.subr.bf16.mxu1 %v1432_v43  ;;  %v226_v1 = vld [vmem:[%s1629_s14 + $0x50] sm:$0xff]  ;;  %v227_v2 = vld [vmem:[%s1629_s14 + $0x58] sm:$0xff]  ;;  %v1440_v4 = vpack.c.bf16 %v275_v61, %v274_v60  ;;  %v245_v7 = vld [vmem:[%s1629_s14 + $0xe8] sm:$0xff] }
  0x21   : > { %v258_v3 = vld [vmem:[%s1629_s14 + $0x150] sm:$0xff]  ;;  %v259_v5 = vld [vmem:[%s1629_s14 + $0x158] sm:$0xff]  ;;  %v276_v8 = vld [vmem:[%s1629_s14 + $0x1e0] sm:$0xff]  ;;  %v1410_v10 = vpack.c.bf16 %v227_v2, %v226_v1  ;;  %v1412_v14 = vpack.c.bf16 %v245_v7, %v244_v6 }
  0x22   : > { %1403 = vmatpush3.bf16.msra.mxu0 %v1402_v50  ;;  %v277_v9 = vld [vmem:[%s1629_s14 + $0x1e8] sm:$0xff]  ;;  %v228_v11 = vld [vmem:[%s1629_s14 + $0x60] sm:$0xff]  ;;  %v1442_v13 = vpack.c.bf16 %v259_v5, %v258_v3  ;;  %v167_v17 = vld [vmem:[%s1685_s18 + $0x18] sm:$0xff] }
  0x23   : > { %1435 = vmatpush3.bf16.msra.mxu1 %v1434_v51  ;;  %1405 = vmatprep.subr.bf16.mxu0 %v1404_v52  ;;  %v229_v12 = vld [vmem:[%s1629_s14 + $0x68] sm:$0xff]  ;;  %v260_v15 = vld [vmem:[%s1629_s14 + $0x160] sm:$0xff]  ;;  %v1444_v18 = vpack.c.bf16 %v277_v9, %v276_v8  ;;  %v246_v20 = vld [vmem:[%s1629_s14 + $0xf0] sm:$0xff] }
  0x24   : > { %1437 = vmatprep.subr.bf16.mxu1 %v1436_v56  ;;  %v165_v16 = vld [vmem:[%s1685_s18 + $0x8] sm:$0xff]  ;;  %v247_v21 = vld [vmem:[%s1629_s14 + $0xf8] sm:$0xff]  ;;  %v278_v22 = vld [vmem:[%s1629_s14 + $0x1f0] sm:$0xff]  ;;  %575 = vmatprep.mubr.f32.mxu1 %v167_v17  ;;  %v1414_v24 = vpack.c.bf16 %v229_v12, %v228_v11 }
  0x25   : > { %v261_v19 = vld [vmem:[%s1629_s14 + $0x168] sm:$0xff]  ;;  %490 = vmatprep.mubr.f32.mxu0 %v165_v16  ;;  %v279_v23 = vld [vmem:[%s1629_s14 + $0x1f8] sm:$0xff]  ;;  %v1416_v26 = vpack.c.bf16 %v247_v21, %v246_v20  ;;  %v230_v27 = vld [vmem:[%s1629_s14 + $0x70] sm:$0xff] }
  0x26   : > { %1407 = vmatpush3.bf16.msra.mxu0 %v1406_v62  ;;  %v1446_v25 = vpack.c.bf16 %v261_v19, %v260_v15  ;;  %v231_v28 = vld [vmem:[%s1629_s14 + $0x78] sm:$0xff]  ;;  %v262_v29 = vld [vmem:[%s1629_s14 + $0x170] sm:$0xff]  ;;  %v1448_v30 = vpack.c.bf16 %v279_v23, %v278_v22  ;;  %v296_v32 = vld [vmem:[%s1629_s14 + $0x280] sm:$0xff] }
  0x27   : > { %1439 = vmatpush3.bf16.msra.mxu1 %v1438_v63  ;;  %1409 = vmatprep.subr.bf16.mxu0 %v1408_v0  ;;  %v263_v31 = vld [vmem:[%s1629_s14 + $0x178] sm:$0xff]  ;;  %v297_v33 = vld [vmem:[%s1629_s14 + $0x288] sm:$0xff]  ;;  %v328_v34 = vld [vmem:[%s1629_s14 + $0x380] sm:$0xff]  ;;  %v1418_v36 = vpack.c.bf16 %v231_v28, %v230_v27 }
  0x28   : > { %1441 = vmatprep.subr.bf16.mxu1 %v1440_v4  ;;  %v329_v35 = vld [vmem:[%s1629_s14 + $0x388] sm:$0xff]  ;;  %v1450_v37 = vpack.c.bf16 %v263_v31, %v262_v29  ;;  %v1452_v38 = vpack.c.bf16 %v297_v33, %v296_v32  ;;  %v280_v39 = vld [vmem:[%s1629_s14 + $0x200] sm:$0xff]  ;;  %v298_v44 = vld [vmem:[%s1629_s14 + $0x290] sm:$0xff] }
  0x29   : > { %v281_v40 = vld [vmem:[%s1629_s14 + $0x208] sm:$0xff]  ;;  %v312_v41 = vld [vmem:[%s1629_s14 + $0x300] sm:$0xff]  ;;  %v1484_v42 = vpack.c.bf16 %v329_v35, %v328_v34  ;;  %v299_v45 = vld [vmem:[%s1629_s14 + $0x298] sm:$0xff] }
  0x2a   : > { %1411 = vmatpush3.bf16.msra.mxu0 %v1410_v10  ;;  %v313_v43 = vld [vmem:[%s1629_s14 + $0x308] sm:$0xff]  ;;  %v330_v46 = vld [vmem:[%s1629_s14 + $0x390] sm:$0xff]  ;;  %v331_v47 = vld [vmem:[%s1629_s14 + $0x398] sm:$0xff]  ;;  %v1454_v50 = vpack.c.bf16 %v281_v40, %v280_v39  ;;  %v1456_v52 = vpack.c.bf16 %v299_v45, %v298_v44 }
  0x2b   : > { %1443 = vmatpush3.bf16.msra.mxu1 %v1442_v13  ;;  %1413 = vmatprep.subr.bf16.mxu0 %v1412_v14  ;;  %v164_v48 = vld [vmem:[%s1685_s18] sm:$0xff]  ;;  %v166_v49 = vld [vmem:[%s1685_s18 + $0x10] sm:$0xff]  ;;  %v1486_v51 = vpack.c.bf16 %v313_v43, %v312_v41  ;;  %v283_v54 = vld [vmem:[%s1629_s14 + $0x218] sm:$0xff]  ;;  %v1488_v56 = vpack.c.bf16 %v331_v47, %v330_v46 }
  0x2c   : > { %1445 = vmatprep.subr.bf16.mxu1 %v1444_v18  ;;  %v282_v53 = vld [vmem:[%s1629_s14 + $0x210] sm:$0xff]  ;;  %v315_v57 = vld [vmem:[%s1629_s14 + $0x318] sm:$0xff]  ;;  %v300_v58 = vld [vmem:[%s1629_s14 + $0x2a0] sm:$0xff] }
  0x2d   : > { %v314_v55 = vld [vmem:[%s1629_s14 + $0x310] sm:$0xff]  ;;  %v301_v59 = vld [vmem:[%s1629_s14 + $0x2a8] sm:$0xff]  ;;  %v332_v60 = vld [vmem:[%s1629_s14 + $0x3a0] sm:$0xff]  ;;  %v1458_v63 = vpack.c.bf16 %v283_v54, %v282_v53 }
  0x2e   : > { %1415 = vmatpush3.bf16.msra.mxu0 %v1414_v24  ;;  %v333_v61 = vld [vmem:[%s1629_s14 + $0x3a8] sm:$0xff]  ;;  %v284_v62 = vld [vmem:[%s1629_s14 + $0x220] sm:$0xff]  ;;  %v178_v0 = vld [vmem:[%s1685_s18 + $0x70] sm:$0xff]  ;;  %v1490_v3 = vpack.c.bf16 %v315_v57, %v314_v55  ;;  %v1460_v4 = vpack.c.bf16 %v301_v59, %v300_v58 }
  0x2f   : > { %1447 = vmatpush3.bf16.msra.mxu1 %v1446_v25  ;;  %1417 = vmatprep.subr.bf16.mxu0 %v1416_v26  ;;  %v180_v1 = vld [vmem:[%s1685_s18 + $0x80] sm:$0xff]  ;;  %v177_v2 = vld [vmem:[%s1685_s18 + $0x68] sm:$0xff]  ;;  %v179_v7 = vld [vmem:[%s1685_s18 + $0x78] sm:$0xff]  ;;  %v1492_v8 = vpack.c.bf16 %v333_v61, %v332_v60 }
  0x30   : > { %1449 = vmatprep.subr.bf16.mxu1 %v1448_v30  ;;  %v285_v5 = vld [vmem:[%s1629_s14 + $0x228] sm:$0xff]  ;;  %v316_v6 = vld [vmem:[%s1629_s14 + $0x320] sm:$0xff]  ;;  %v302_v10 = vld [vmem:[%s1629_s14 + $0x2b0] sm:$0xff] }
  0x31   : > { %v317_v9 = vld [vmem:[%s1629_s14 + $0x328] sm:$0xff]  ;;  %v303_v11 = vld [vmem:[%s1629_s14 + $0x2b8] sm:$0xff]  ;;  %v334_v12 = vld [vmem:[%s1629_s14 + $0x3b0] sm:$0xff]  ;;  %v1462_v15 = vpack.c.bf16 %v285_v5, %v284_v62 }
  0x32   : > { %1419 = vmatpush3.bf16.msra.mxu0 %v1418_v36  ;;  %v335_v13 = vld [vmem:[%s1629_s14 + $0x3b8] sm:$0xff]  ;;  %v286_v14 = vld [vmem:[%s1629_s14 + $0x230] sm:$0xff]  ;;  %v193_v17 = vld [vmem:[%s1685_s18 + $0xe8] sm:$0xff]  ;;  %v1494_v19 = vpack.c.bf16 %v317_v9, %v316_v6  ;;  %v1464_v20 = vpack.c.bf16 %v303_v11, %v302_v10 }
  0x33   : > { %1451 = vmatpush3.bf16.msra.mxu1 %v1450_v37  ;;  %1453 = vmatprep.subr.bf16.mxu0 %v1452_v38  ;;  %v191_v16 = vld [vmem:[%s1685_s18 + $0xd8] sm:$0xff]  ;;  %v190_v18 = vld [vmem:[%s1685_s18 + $0xd0] sm:$0xff]  ;;  %v192_v23 = vld [vmem:[%s1685_s18 + $0xe0] sm:$0xff]  ;;  %v1496_v24 = vpack.c.bf16 %v335_v13, %v334_v12 }
  0x34   : > { %1485 = vmatprep.subr.bf16.mxu1 %v1484_v42  ;;  %v287_v21 = vld [vmem:[%s1629_s14 + $0x238] sm:$0xff]  ;;  %v318_v22 = vld [vmem:[%s1629_s14 + $0x330] sm:$0xff]  ;;  %v304_v26 = vld [vmem:[%s1629_s14 + $0x2c0] sm:$0xff] }
  0x35   : > { %491 = vmatmul.mubr.f32.vlgmr.msra.gmra.mrb[0].mxu0 %v164_v48  ;;  %v319_v25 = vld [vmem:[%s1629_s14 + $0x338] sm:$0xff]  ;;  %v305_v27 = vld [vmem:[%s1629_s14 + $0x2c8] sm:$0xff]  ;;  %v336_v28 = vld [vmem:[%s1629_s14 + $0x3c0] sm:$0xff]  ;;  %v1466_v31 = vpack.c.bf16 %v287_v21, %v286_v14 }
  0x36   : > { %576 = vmatmul.mubr.f32.vlgmr.msra.gmra.mrb[0].mxu1 %v166_v49  ;;  %1455 = vmatpush3.bf16.msra.mxu0 %v1454_v50  ;;  %v337_v29 = vld [vmem:[%s1629_s14 + $0x3c8] sm:$0xff]  ;;  %v288_v30 = vld [vmem:[%s1629_s14 + $0x240] sm:$0xff]  ;;  %v206_v33 = vld [vmem:[%s1685_s18 + $0x150] sm:$0xf]  ;;  %v1498_v35 = vpack.c.bf16 %v319_v25, %v318_v22  ;;  %v1468_v36 = vpack.c.bf16 %v305_v27, %v304_v26 }
  0x37   : > { %1487 = vmatpush3.bf16.msra.mxu1 %v1486_v51  ;;  %1457 = vmatprep.subr.bf16.mxu0 %v1456_v52  ;;  %v204_v32 = vld [vmem:[%s1685_s18 + $0x140] sm:$0xf]  ;;  %v203_v34 = vld [vmem:[%s1685_s18 + $0x138] sm:$0xf]  ;;  %v289_v37 = vld [vmem:[%s1629_s14 + $0x248] sm:$0xff]  ;;  %v1500_v40 = vpack.c.bf16 %v337_v29, %v336_v28 }
  0x38   : > { %1489 = vmatprep.subr.bf16.mxu1 %v1488_v56  ;;  %495 = vmatprep.mubr.f32.mxu0 %v178_v0  ;;  %v320_v38 = vld [vmem:[%s1629_s14 + $0x340] sm:$0xff]  ;;  %v205_v39 = vld [vmem:[%s1685_s18 + $0x148] sm:$0xf]  ;;  %v306_v42 = vld [vmem:[%s1629_s14 + $0x2d0] sm:$0xff]  ;;  %v1470_v46 = vpack.c.bf16 %v289_v37, %v288_v30 }
  0x39   : > { %580 = vmatprep.mubr.f32.mxu1 %v180_v1  ;;  %496 = vmatmul.mubr.f32.gmra.mrb[2].mxu0 %v177_v2  ;;  %v321_v41 = vld [vmem:[%s1629_s14 + $0x348] sm:$0xff]  ;;  %v307_v43 = vld [vmem:[%s1629_s14 + $0x2d8] sm:$0xff]  ;;  %v338_v44 = vld [vmem:[%s1629_s14 + $0x3d0] sm:$0xff] }
  0x3a   : > { %1459 = vmatpush3.bf16.msra.mxu0 %v1458_v63  ;;  %581 = vmatmul.mubr.f32.gmra.mrb[2].mxu1 %v179_v7  ;;  %v339_v45 = vld [vmem:[%s1629_s14 + $0x3d8] sm:$0xff]  ;;  %v169_v47 = vld [vmem:[%s1685_s18 + $0x28] sm:$0xff]  ;;  %v1502_v49 = vpack.c.bf16 %v321_v41, %v320_v38  ;;  %v1472_v50 = vpack.c.bf16 %v307_v43, %v306_v42  ;;  %v290_v51 = vld [vmem:[%s1629_s14 + $0x250] sm:$0xff] }
  0x3b   : > { %1491 = vmatpush3.bf16.msra.mxu1 %v1490_v3  ;;  %1461 = vmatprep.subr.bf16.mxu0 %v1460_v4  ;;  %v171_v48 = vld [vmem:[%s1685_s18 + $0x38] sm:$0xff]  ;;  %v322_v53 = vld [vmem:[%s1629_s14 + $0x350] sm:$0xff]  ;;  %v1504_v54 = vpack.c.bf16 %v339_v45, %v338_v44  ;;  %v308_v56 = vld [vmem:[%s1629_s14 + $0x2e0] sm:$0xff] }
  0x3c   : > { %1493 = vmatprep.subr.bf16.mxu1 %v1492_v8  ;;  %500 = vmatprep.mubr.f32.mxu0 %v191_v16  ;;  %v291_v52 = vld [vmem:[%s1629_s14 + $0x258] sm:$0xff]  ;;  %v309_v57 = vld [vmem:[%s1629_s14 + $0x2e8] sm:$0xff]  ;;  %v340_v58 = vld [vmem:[%s1629_s14 + $0x3e0] sm:$0xff] }
  0x3d   : > { %585 = vmatprep.mubr.f32.mxu1 %v193_v17  ;;  %501 = vmatmul.mubr.f32.gmra.mrb[4].mxu0 %v190_v18  ;;  %v323_v55 = vld [vmem:[%s1629_s14 + $0x358] sm:$0xff]  ;;  %v341_v59 = vld [vmem:[%s1629_s14 + $0x3e8] sm:$0xff]  ;;  %v1474_v60 = vpack.c.bf16 %v291_v52, %v290_v51  ;;  %v1476_v62 = vpack.c.bf16 %v309_v57, %v308_v56  ;;  %v292_v63 = vld [vmem:[%s1629_s14 + $0x260] sm:$0xff] }
  0x3e   : > { %1463 = vmatpush3.bf16.msra.mxu0 %v1462_v15  ;;  %586 = vmatmul.mubr.f32.gmra.mrb[4].mxu1 %v192_v23  ;;  %v1506_v61 = vpack.c.bf16 %v323_v55, %v322_v53  ;;  %v293_v0 = vld [vmem:[%s1629_s14 + $0x268] sm:$0xff]  ;;  %v324_v1 = vld [vmem:[%s1629_s14 + $0x360] sm:$0xff]  ;;  %v1508_v2 = vpack.c.bf16 %v341_v59, %v340_v58  ;;  %v310_v4 = vld [vmem:[%s1629_s14 + $0x2f0] sm:$0xff] }
  0x3f   : > { %1495 = vmatpush3.bf16.msra.mxu1 %v1494_v19  ;;  %1465 = vmatprep.subr.bf16.mxu0 %v1464_v20  ;;  %v325_v3 = vld [vmem:[%s1629_s14 + $0x368] sm:$0xff]  ;;  %v311_v5 = vld [vmem:[%s1629_s14 + $0x2f8] sm:$0xff]  ;;  %v342_v6 = vld [vmem:[%s1629_s14 + $0x3f0] sm:$0xff]  ;;  %v1478_v8 = vpack.c.bf16 %v293_v0, %v292_v63 }
  0x40   : > { %1497 = vmatprep.subr.bf16.mxu1 %v1496_v24  ;;  %505 = vmatprep.mubr.f32.mxu0 %v204_v32  ;;  %v343_v7 = vld [vmem:[%s1629_s14 + $0x3f8] sm:$0xff]  ;;  %v1510_v9 = vpack.c.bf16 %v325_v3, %v324_v1  ;;  %v1480_v10 = vpack.c.bf16 %v311_v5, %v310_v4  ;;  %v294_v11 = vld [vmem:[%s1629_s14 + $0x270] sm:$0xff]  ;;  %v360_v16 = vld [vmem:[%s1629_s14 + $0x480] sm:$0xff] }
  0x41   : > { %590 = vmatprep.mubr.f32.mxu1 %v206_v33  ;;  %506 = vmatmul.mubr.f32.gmra.mrb[6].mxu0 %v203_v34  ;;  %v295_v12 = vld [vmem:[%s1629_s14 + $0x278] sm:$0xff]  ;;  %v326_v13 = vld [vmem:[%s1629_s14 + $0x370] sm:$0xff]  ;;  %v1512_v14 = vpack.c.bf16 %v343_v7, %v342_v6  ;;  %v361_v17 = vld [vmem:[%s1629_s14 + $0x488] sm:$0xff] }
  0x42   : > { %1467 = vmatpush3.bf16.msra.mxu0 %v1466_v31  ;;  %591 = vmatmul.mubr.f32.gmra.mrb[6].mxu1 %v205_v39  ;;  %v327_v15 = vld [vmem:[%s1629_s14 + $0x378] sm:$0xff]  ;;  %v392_v18 = vld [vmem:[%s1629_s14 + $0x580] sm:$0xff]  ;;  %v393_v19 = vld [vmem:[%s1629_s14 + $0x588] sm:$0xff]  ;;  %v1482_v20 = vpack.c.bf16 %v295_v12, %v294_v11  ;;  %v1516_v22 = vpack.c.bf16 %v361_v17, %v360_v16 }
  0x43   : > { %1499 = vmatpush3.bf16.msra.mxu1 %v1498_v35  ;;  %1469 = vmatprep.subr.bf16.mxu0 %v1468_v36  ;;  %v1514_v21 = vpack.c.bf16 %v327_v15, %v326_v13  ;;  %v344_v23 = vld [vmem:[%s1629_s14 + $0x400] sm:$0xff]  ;;  %v345_v24 = vld [vmem:[%s1629_s14 + $0x408] sm:$0xff]  ;;  %v1548_v25 = vpack.c.bf16 %v393_v19, %v392_v18  ;;  %v362_v28 = vld [vmem:[%s1629_s14 + $0x490] sm:$0xff] }
  0x44   : > { %1501 = vmatprep.subr.bf16.mxu1 %v1500_v40  ;;  %660 = vmatprep.mubr.f32.mxu0 %v169_v47  ;;  %v376_v26 = vld [vmem:[%s1629_s14 + $0x500] sm:$0xff]  ;;  %v377_v27 = vld [vmem:[%s1629_s14 + $0x508] sm:$0xff]  ;;  %v363_v29 = vld [vmem:[%s1629_s14 + $0x498] sm:$0xff]  ;;  %v1518_v34 = vpack.c.bf16 %v345_v24, %v344_v23 }
  0x45   : > { %745 = vmatprep.mubr.f32.mxu1 %v171_v48  ;;  %v394_v30 = vld [vmem:[%s1629_s14 + $0x590] sm:$0xff]  ;;  %v395_v31 = vld [vmem:[%s1629_s14 + $0x598] sm:$0xff]  ;;  %v168_v32 = vld [vmem:[%s1685_s18 + $0x20] sm:$0xff]  ;;  %v1550_v35 = vpack.c.bf16 %v377_v27, %v376_v26  ;;  %v1520_v39 = vpack.c.bf16 %v363_v29, %v362_v28 }
  0x46   : > { %1471 = vmatpush3.bf16.msra.mxu0 %v1470_v46  ;;  %v170_v33 = vld [vmem:[%s1685_s18 + $0x30] sm:$0xff]  ;;  %v347_v38 = vld [vmem:[%s1629_s14 + $0x418] sm:$0xff]  ;;  %v1552_v40 = vpack.c.bf16 %v395_v31, %v394_v30  ;;  %v364_v43 = vld [vmem:[%s1629_s14 + $0x4a0] sm:$0xff] }
  0x47   : > { %1503 = vmatpush3.bf16.msra.mxu1 %v1502_v49  ;;  %1473 = vmatprep.subr.bf16.mxu0 %v1472_v50  ;;  %v182_v36 = vld [vmem:[%s1685_s18 + $0x90] sm:$0xff]  ;;  %v379_v42 = vld [vmem:[%s1629_s14 + $0x518] sm:$0xff]  ;;  %v365_v44 = vld [vmem:[%s1629_s14 + $0x4a8] sm:$0xff] }
  0x48   : > { %1505 = vmatprep.subr.bf16.mxu1 %v1504_v54  ;;  %v346_v37 = vld [vmem:[%s1629_s14 + $0x410] sm:$0xff]  ;;  %v396_v45 = vld [vmem:[%s1629_s14 + $0x5a0] sm:$0xff]  ;;  %v397_v46 = vld [vmem:[%s1629_s14 + $0x5a8] sm:$0xff]  ;;  %v1524_v56 = vpack.c.bf16 %v365_v44, %v364_v43 }
  0x49   : > { %v378_v41 = vld [vmem:[%s1629_s14 + $0x510] sm:$0xff]  ;;  %v181_v47 = vld [vmem:[%s1685_s18 + $0x88] sm:$0xff]  ;;  %v184_v48 = vld [vmem:[%s1685_s18 + $0xa0] sm:$0xff]  ;;  %v1522_v49 = vpack.c.bf16 %v347_v38, %v346_v37  ;;  %v1556_v57 = vpack.c.bf16 %v397_v46, %v396_v45 }
  0x4a   : > { %1475 = vmatpush3.bf16.msra.mxu0 %v1474_v60  ;;  %v183_v50 = vld [vmem:[%s1685_s18 + $0x98] sm:$0xff]  ;;  %v1554_v51 = vpack.c.bf16 %v379_v42, %v378_v41  ;;  %v348_v53 = vld [vmem:[%s1629_s14 + $0x420] sm:$0xff]  ;;  %v349_v54 = vld [vmem:[%s1629_s14 + $0x428] sm:$0xff] }
  0x4b   : > { %1507 = vmatpush3.bf16.msra.mxu1 %v1506_v61  ;;  %1477 = vmatprep.subr.bf16.mxu0 %v1476_v62  ;;  %v195_v52 = vld [vmem:[%s1685_s18 + $0xf8] sm:$0xff]  ;;  %v194_v55 = vld [vmem:[%s1685_s18 + $0xf0] sm:$0xff]  ;;  %v380_v58 = vld [vmem:[%s1629_s14 + $0x520] sm:$0xff]  ;;  %v1526_v1 = vpack.c.bf16 %v349_v54, %v348_v53 }
  0x4c   : > { %1509 = vmatprep.subr.bf16.mxu1 %v1508_v2  ;;  %v381_v59 = vld [vmem:[%s1629_s14 + $0x528] sm:$0xff]  ;;  %v366_v60 = vld [vmem:[%s1629_s14 + $0x4b0] sm:$0xff]  ;;  %v367_v61 = vld [vmem:[%s1629_s14 + $0x4b8] sm:$0xff] }
  0x4d   : > { %v398_v62 = vld [vmem:[%s1629_s14 + $0x5b0] sm:$0xff]  ;;  %v399_v63 = vld [vmem:[%s1629_s14 + $0x5b8] sm:$0xff]  ;;  %v197_v0 = vld [vmem:[%s1685_s18 + $0x108] sm:$0xff]  ;;  %v1558_v4 = vpack.c.bf16 %v381_v59, %v380_v58 }
  0x4e   : > { %1479 = vmatpush3.bf16.msra.mxu0 %v1478_v8  ;;  %v196_v2 = vld [vmem:[%s1685_s18 + $0x100] sm:$0xff]  ;;  %v350_v5 = vld [vmem:[%s1629_s14 + $0x430] sm:$0xff]  ;;  %v351_v6 = vld [vmem:[%s1629_s14 + $0x438] sm:$0xff]  ;;  %v1528_v8 = vpack.c.bf16 %v367_v61, %v366_v60 }
  0x4f   : > { %1511 = vmatpush3.bf16.msra.mxu1 %v1510_v9  ;;  %1481 = vmatprep.subr.bf16.mxu0 %v1480_v10  ;;  %v208_v3 = vld [vmem:[%s1685_s18 + $0x160] sm:$0xf]  ;;  %v382_v7 = vld [vmem:[%s1629_s14 + $0x530] sm:$0xff]  ;;  %v1560_v9 = vpack.c.bf16 %v399_v63, %v398_v62  ;;  %v383_v10 = vld [vmem:[%s1629_s14 + $0x538] sm:$0xff]  ;;  %v1530_v17 = vpack.c.bf16 %v351_v6, %v350_v5 }
  0x50   : > { %1513 = vmatprep.subr.bf16.mxu1 %v1512_v14  ;;  %v368_v11 = vld [vmem:[%s1629_s14 + $0x4c0] sm:$0xff]  ;;  %v369_v12 = vld [vmem:[%s1629_s14 + $0x4c8] sm:$0xff]  ;;  %v207_v15 = vld [vmem:[%s1685_s18 + $0x158] sm:$0xf]  ;;  %v1562_v19 = vpack.c.bf16 %v383_v10, %v382_v7 }
  0x51   : > { %v400_v13 = vld [vmem:[%s1629_s14 + $0x5c0] sm:$0xff]  ;;  %v401_v14 = vld [vmem:[%s1629_s14 + $0x5c8] sm:$0xff]  ;;  %v210_v16 = vld [vmem:[%s1685_s18 + $0x170] sm:$0xf] }
  0x52   : > { %1483 = vmatpush3.bf16.msra.mxu0 %v1482_v20  ;;  %v209_v18 = vld [vmem:[%s1685_s18 + $0x168] sm:$0xf]  ;;  %v1532_v20 = vpack.c.bf16 %v369_v12, %v368_v11  ;;  %v384_v23 = vld [vmem:[%s1629_s14 + $0x540] sm:$0xff]  ;;  %v1564_v24 = vpack.c.bf16 %v401_v14, %v400_v13  ;;  %v370_v26 = vld [vmem:[%s1629_s14 + $0x4d0] sm:$0xff] }
  0x53   : > { %1515 = vmatpush3.bf16.msra.mxu1 %v1514_v21  ;;  %1517 = vmatprep.subr.bf16.mxu0 %v1516_v22  ;;  %v352_v21 = vld [vmem:[%s1629_s14 + $0x440] sm:$0xff]  ;;  %v353_v22 = vld [vmem:[%s1629_s14 + $0x448] sm:$0xff]  ;;  %v371_v27 = vld [vmem:[%s1629_s14 + $0x4d8] sm:$0xff] }
  0x54   : > { %1549 = vmatprep.subr.bf16.mxu1 %v1548_v25  ;;  %v385_v25 = vld [vmem:[%s1629_s14 + $0x548] sm:$0xff]  ;;  %v402_v28 = vld [vmem:[%s1629_s14 + $0x5d0] sm:$0xff]  ;;  %v403_v29 = vld [vmem:[%s1629_s14 + $0x5d8] sm:$0xff]  ;;  %v1534_v31 = vpack.c.bf16 %v353_v22, %v352_v21 }
  0x55   : > { %661 = vmatmul.mubr.f32.vlgmr.msra.gmra.mrb[8].mxu0 %v168_v32  ;;  %v173_v30 = vld [vmem:[%s1685_s18 + $0x48] sm:$0xff]  ;;  %v175_v32 = vld [vmem:[%s1685_s18 + $0x58] sm:$0xff]  ;;  %v386_v37 = vld [vmem:[%s1629_s14 + $0x550] sm:$0xff]  ;;  %v1568_v38 = vpack.c.bf16 %v403_v29, %v402_v28 }
  0x56   : > { %746 = vmatmul.mubr.f32.vlgmr.msra.gmra.mrb[8].mxu1 %v170_v33  ;;  %1519 = vmatpush3.bf16.msra.mxu0 %v1518_v34  ;;  %v1566_v33 = vpack.c.bf16 %v385_v25, %v384_v23  ;;  %v1536_v34 = vpack.c.bf16 %v371_v27, %v370_v26  ;;  %v373_v41 = vld [vmem:[%s1629_s14 + $0x4e8] sm:$0xff]  ;;  %v404_v42 = vld [vmem:[%s1629_s14 + $0x5e0] sm:$0xff]  ;;  %v375_v53 = vld [vmem:[%s1629_s14 + $0x4f8] sm:$0xff] }
  0x57   : > { %1551 = vmatpush3.bf16.msra.mxu1 %v1550_v35  ;;  %665 = vmatprep.mubr.f32.mxu0 %v182_v36  ;;  %v354_v35 = vld [vmem:[%s1629_s14 + $0x450] sm:$0xff]  ;;  %v355_v36 = vld [vmem:[%s1629_s14 + $0x458] sm:$0xff]  ;;  %v405_v43 = vld [vmem:[%s1629_s14 + $0x5e8] sm:$0xff] }
  0x58   : > { %1521 = vmatprep.subr.bf16.mxu0 %v1520_v39  ;;  %1553 = vmatprep.subr.bf16.mxu1 %v1552_v40  ;;  %v387_v39 = vld [vmem:[%s1629_s14 + $0x558] sm:$0xff]  ;;  %v372_v40 = vld [vmem:[%s1629_s14 + $0x4e0] sm:$0xff]  ;;  %v1538_v44 = vpack.c.bf16 %v355_v36, %v354_v35  ;;  %v406_v54 = vld [vmem:[%s1629_s14 + $0x5f0] sm:$0xff] }
  0x59   : > { %666 = vmatmul.mubr.f32.gmra.mrb[10].mxu0 %v181_v47  ;;  %750 = vmatprep.mubr.f32.mxu1 %v184_v48  ;;  %v1570_v45 = vpack.c.bf16 %v387_v39, %v386_v37  ;;  %v1540_v46 = vpack.c.bf16 %v373_v41, %v372_v40  ;;  %v356_v47 = vld [vmem:[%s1629_s14 + $0x460] sm:$0xff]  ;;  %v357_v48 = vld [vmem:[%s1629_s14 + $0x468] sm:$0xff]  ;;  %v358_v59 = vld [vmem:[%s1629_s14 + $0x470] sm:$0xff] }
  0x5a   : > { %1523 = vmatpush3.bf16.msra.mxu0 %v1522_v49  ;;  %751 = vmatmul.mubr.f32.gmra.mrb[10].mxu1 %v183_v50  ;;  %v388_v49 = vld [vmem:[%s1629_s14 + $0x560] sm:$0xff]  ;;  %v1572_v50 = vpack.c.bf16 %v405_v43, %v404_v42  ;;  %v359_v60 = vld [vmem:[%s1629_s14 + $0x478] sm:$0xff]  ;;  %v390_v62 = vld [vmem:[%s1629_s14 + $0x570] sm:$0xff] }
  0x5b   : > { %1555 = vmatpush3.bf16.msra.mxu1 %v1554_v51  ;;  %670 = vmatprep.mubr.f32.mxu0 %v195_v52  ;;  %v389_v51 = vld [vmem:[%s1629_s14 + $0x568] sm:$0xff]  ;;  %v374_v52 = vld [vmem:[%s1629_s14 + $0x4f0] sm:$0xff]  ;;  %v391_v63 = vld [vmem:[%s1629_s14 + $0x578] sm:$0xff] }
  0x5c   : > { %1525 = vmatprep.subr.bf16.mxu0 %v1524_v56  ;;  %1557 = vmatprep.subr.bf16.mxu1 %v1556_v57  ;;  %v1542_v56 = vpack.c.bf16 %v357_v48, %v356_v47  ;;  %v1574_v57 = vpack.c.bf16 %v389_v51, %v388_v49  ;;  %v1544_v58 = vpack.c.bf16 %v375_v53, %v374_v52  ;;  %v186_v5 = vld [vmem:[%s1685_s18 + $0xb0] sm:$0xff]  ;;  %v188_v6 = vld [vmem:[%s1685_s18 + $0xc0] sm:$0xff]  ;;  %v185_v7 = vld [vmem:[%s1685_s18 + $0xa8] sm:$0xff] }
  0x5d   : > { %671 = vmatmul.mubr.f32.gmra.mrb[12].mxu0 %v194_v55  ;;  %755 = vmatprep.mubr.f32.mxu1 %v197_v0  ;;  %v407_v55 = vld [vmem:[%s1629_s14 + $0x5f8] sm:$0xff]  ;;  %v1546_v0 = vpack.c.bf16 %v359_v60, %v358_v59  ;;  %v201_v10 = vld [vmem:[%s1685_s18 + $0x128] sm:$0xff]  ;;  %v198_v11 = vld [vmem:[%s1685_s18 + $0x110] sm:$0xff] }
  0x5e   : > { %1527 = vmatpush3.bf16.msra.mxu0 %v1526_v1  ;;  %756 = vmatmul.mubr.f32.gmra.mrb[12].mxu1 %v196_v2  ;;  %v1576_v61 = vpack.c.bf16 %v407_v55, %v406_v54  ;;  %v1578_v1 = vpack.c.bf16 %v391_v63, %v390_v62  ;;  %v408_v2 = vld [vmem:[%s1629_s14 + $0x600] sm:$0xf]  ;;  %v214_v14 = vld [vmem:[%s1685_s18 + $0x190] sm:$0xf] }
  0x5f   : > { %1559 = vmatpush3.bf16.msra.mxu1 %v1558_v4  ;;  %675 = vmatprep.mubr.f32.mxu0 %v208_v3  ;;  %v172_v3 = vld [vmem:[%s1685_s18 + $0x40] sm:$0xff]  ;;  %v174_v4 = vld [vmem:[%s1685_s18 + $0x50] sm:$0xff] }
  0x60   : > { %1529 = vmatprep.subr.bf16.mxu0 %v1528_v8  ;;  %1561 = vmatprep.subr.bf16.mxu1 %v1560_v9  ;;  %v187_v8 = vld [vmem:[%s1685_s18 + $0xb8] sm:$0xff]  ;;  %v200_v12 = vld [vmem:[%s1685_s18 + $0x120] sm:$0xff] }
  0x61   : > { %676 = vmatmul.mubr.f32.gmra.mrb[14].mxu0 %v207_v15  ;;  %760 = vmatprep.mubr.f32.mxu1 %v210_v16  ;;  %v199_v9 = vld [vmem:[%s1685_s18 + $0x118] sm:$0xff]  ;;  %v212_v13 = vld [vmem:[%s1685_s18 + $0x180] sm:$0xf]  ;;  %v213_v16 = vld [vmem:[%s1685_s18 + $0x188] sm:$0xf] }
  0x62   : > { %1531 = vmatpush3.bf16.msra.mxu0 %v1530_v17  ;;  %761 = vmatmul.mubr.f32.gmra.mrb[14].mxu1 %v209_v18  ;;  %v211_v15 = vld [vmem:[%s1685_s18 + $0x178] sm:$0xf]  ;;  %v176_v17 = vld [vmem:[%s1685_s18 + $0x60] sm:$0xff]  ;;  %v202_v18 = vld [vmem:[%s1685_s18 + $0x130] sm:$0xff] }
  0x63   : > { %1563 = vmatpush3.bf16.msra.mxu1 %v1562_v19  ;;  %1533 = vmatprep.subr.bf16.mxu0 %v1532_v20  ;;  %v189_v19 = vld [vmem:[%s1685_s18 + $0xc8] sm:$0xff]  ;;  %v215_v20 = vld [vmem:[%s1685_s18 + $0x198] sm:$0xf] }
  0x64   : > { %1565 = vmatprep.subr.bf16.mxu1 %v1564_v24  ;;  %830 = vmatprep.mubr.f32.mxu0 %v173_v30 }
  0x65   : > { %915 = vmatprep.mubr.f32.mxu1 %v175_v32 }
  0x66   : > { %1535 = vmatpush3.bf16.msra.mxu0 %v1534_v31 }
  0x67   : > { %1567 = vmatpush3.bf16.msra.mxu1 %v1566_v33  ;;  %1537 = vmatprep.subr.bf16.mxu0 %v1536_v34 }
  0x68   : > { %1569 = vmatprep.subr.bf16.mxu1 %v1568_v38 }
  0x6a   : > { %1539 = vmatpush3.bf16.msra.mxu0 %v1538_v44 }
  0x6b   : > { %1571 = vmatpush3.bf16.msra.mxu1 %v1570_v45  ;;  %1541 = vmatprep.subr.bf16.mxu0 %v1540_v46 }
  0x6c   : > { %1573 = vmatprep.subr.bf16.mxu1 %v1572_v50 }
  0x6e   : > { %1543 = vmatpush3.bf16.msra.mxu0 %v1542_v56 }
  0x6f   : > { %1575 = vmatpush3.bf16.msra.mxu1 %v1574_v57  ;;  %1545 = vmatprep.subr.bf16.mxu0 %v1544_v58 }
  0x70   : > { %1577 = vmatprep.subr.bf16.mxu1 %v1576_v61 }
  0x72   : > { %1547 = vmatpush3.bf16.msra.mxu0 %v1546_v0 }
  0x73   : > { %1579 = vmatpush3.bf16.msra.mxu1 %v1578_v1  ;;  %1380 = vmatprep.subr.msk.mxu0 %vm422_vm0, %v408_v2 }
  0x74   : > { %1580 = vmatprep.subr.msk.mxu1 %vm422_vm0, %v408_v2 }
  0x75   : > { %831 = vmatmul.mubr.f32.vlgmr.msra.gmra.mrb[16].mxu0 %v172_v3 }
  0x76   : > { %916 = vmatmul.mubr.f32.vlgmr.msra.gmra.mrb[16].mxu1 %v174_v4  ;;  %1381 = vmatpush3.msk.msra.mxu0 %vm422_vm0, %v408_v2 }
  0x77   : > { %1581 = vmatpush3.msk.msra.mxu1 %vm422_vm0, %v408_v2  ;;  %835 = vmatprep.mubr.f32.mxu0 %v186_v5 }
  0x78   : > { %920 = vmatprep.mubr.f32.mxu1 %v188_v6 }
  0x79   : > { %836 = vmatmul.mubr.f32.gmra.mrb[18].mxu0 %v185_v7 }
  0x7a   : > { %921 = vmatmul.mubr.f32.gmra.mrb[18].mxu1 %v187_v8  ;;  %840 = vmatprep.mubr.f32.mxu0 %v199_v9 }
  0x7b   : > { %925 = vmatprep.mubr.f32.mxu1 %v201_v10 }
  0x7d   : > { %841 = vmatmul.mubr.f32.gmra.mrb[20].mxu0 %v198_v11 }
  0x7e   : > { %926 = vmatmul.mubr.f32.gmra.mrb[20].mxu1 %v200_v12  ;;  %845 = vmatprep.mubr.f32.mxu0 %v212_v13 }
  0x7f   : > { %930 = vmatprep.mubr.f32.mxu1 %v214_v14 }
  0x81   : > { %846 = vmatmul.mubr.f32.gmra.mrb[22].mxu0 %v211_v15 }
  0x82   : > { %931 = vmatmul.mubr.f32.gmra.mrb[22].mxu1 %v213_v16  ;;  %1382 = vmatprep.mubr.msk.f32.mxu0 %vm409_vm1, %v176_v17 }
  0x83   : > { %1385 = vmatprep.mubr.msk.f32.mxu1 %vm409_vm1, %v202_v18 }
  0x85   : > { %1383 = vmatmul.mubr.msk.f32.vlgmr.msra.gmra.mrb[24].mxu0 %vm409_vm1, %v189_v19 }
  0x86   : > { %1386 = vmatmul.mubr.msk.f32.vlgmr.msra.gmra.mrb[24].mxu1 %vm409_vm1, %v215_v20 }
 0x108   : > { %v1143_v21 = vpop.f32.mrb[0].mxu0 }
 0x109   : > { %v1187_v22 = vpop.f32.mrb[0].mxu1  ;;  %v1144_v23 = vpop.f32.mrb[1].mxu0 }
 0x10a   : > { %v1145_v24 = vadd.f32 %v1144_v23, %v1143_v21  ;;  %v1188_v25 = vpop.f32.mrb[1].mxu1 }
 0x10b   : > { %v1189_v26 = vadd.f32 %v1188_v25, %v1187_v22 }
 0x10c   : > { %v1146_v27 = vpop.f32.mrb[2].mxu0 }
 0x10d   : > { %v578_v28 = vadd.f32 %v1189_v26, %v1145_v24  ;;  %v1190_v29 = vpop.f32.mrb[2].mxu1  ;;  %v1147_v30 = vpop.f32.mrb[3].mxu0 }
 0x10e   : > { %v1148_v31 = vadd.f32 %v1147_v30, %v1146_v27  ;;  %v1191_v32 = vpop.f32.mrb[3].mxu1 }
 0x10f   : > { %v1192_v33 = vadd.f32 %v1191_v32, %v1190_v29 }
 0x110   : > { %v1149_v34 = vpop.f32.mrb[4].mxu0 }
 0x111   : > { %v583_v35 = vadd.f32 %v1192_v33, %v1148_v31  ;;  %v1193_v36 = vpop.f32.mrb[4].mxu1  ;;  %v1150_v37 = vpop.f32.mrb[5].mxu0 }
 0x112   : > { %v1151_v38 = vadd.f32 %v1150_v37, %v1149_v34  ;;  %v1194_v39 = vpop.f32.mrb[5].mxu1 }
 0x113   : > { %v1195_v40 = vadd.f32 %v1194_v39, %v1193_v36 }
 0x114   : > { %v1152_v41 = vpop.f32.mrb[6].mxu0 }
 0x115   : > { %v588_v42 = vadd.f32 %v1195_v40, %v1151_v38  ;;  %v1196_v43 = vpop.f32.mrb[6].mxu1  ;;  %v1153_v44 = vpop.f32.mrb[7].mxu0 }
 0x116   : > { %v1154_v45 = vadd.f32 %v1153_v44, %v1152_v41  ;;  %v1197_v46 = vpop.f32.mrb[7].mxu1 }
 0x117   : > { %v1198_v47 = vadd.f32 %v1197_v46, %v1196_v43 }
 0x119   : > { %v593_v48 = vadd.f32 %v1198_v47, %v1154_v45 }
 0x128   : > { %v1231_v49 = vpop.f32.mrb[8].mxu0 }
 0x129   : > { %v1232_v50 = vpop.f32.mrb[9].mxu0  ;;  %v1275_v51 = vpop.f32.mrb[8].mxu1 }
 0x12a   : > { %v1233_v52 = vadd.f32 %v1232_v50, %v1231_v49  ;;  %v1276_v53 = vpop.f32.mrb[9].mxu1 }
 0x12b   : > { %v1277_v54 = vadd.f32 %v1276_v53, %v1275_v51 }
 0x12c   : > { %v663_v55 = vadd.f32 %v1233_v52, %v578_v28  ;;  %v1234_v56 = vpop.f32.mrb[10].mxu0 }
 0x12d   : > { %v1235_v57 = vpop.f32.mrb[11].mxu0  ;;  %v1278_v58 = vpop.f32.mrb[10].mxu1 }
 0x12e   : > { %v748_v59 = vadd.f32 %v1277_v54, %v663_v55  ;;  %v1236_v60 = vadd.f32 %v1235_v57, %v1234_v56  ;;  %v1279_v61 = vpop.f32.mrb[11].mxu1 }
 0x12f   : > { %v1280_v62 = vadd.f32 %v1279_v61, %v1278_v58 }
 0x130   : > { %v668_v63 = vadd.f32 %v1236_v60, %v583_v35  ;;  %v1237_v0 = vpop.f32.mrb[12].mxu0 }
 0x131   : > { %v1238_v1 = vpop.f32.mrb[13].mxu0  ;;  %v1281_v2 = vpop.f32.mrb[12].mxu1 }
 0x132   : > { %v753_v3 = vadd.f32 %v1280_v62, %v668_v63  ;;  %v1239_v4 = vadd.f32 %v1238_v1, %v1237_v0  ;;  %v1282_v5 = vpop.f32.mrb[13].mxu1 }
 0x133   : > { %v1283_v6 = vadd.f32 %v1282_v5, %v1281_v2 }
 0x134   : > { %v673_v7 = vadd.f32 %v1239_v4, %v588_v42  ;;  %v1240_v8 = vpop.f32.mrb[14].mxu0 }
 0x135   : > { %v1241_v9 = vpop.f32.mrb[15].mxu0  ;;  %v1284_v10 = vpop.f32.mrb[14].mxu1 }
 0x136   : > { %v758_v11 = vadd.f32 %v1283_v6, %v673_v7  ;;  %v1242_v12 = vadd.f32 %v1241_v9, %v1240_v8  ;;  %v1285_v13 = vpop.f32.mrb[15].mxu1 }
 0x137   : > { %v1286_v14 = vadd.f32 %v1285_v13, %v1284_v10 }
 0x138   : > { %v678_v15 = vadd.f32 %v1242_v12, %v593_v48 }
 0x13a   : > { %v763_v16 = vadd.f32 %v1286_v14, %v678_v15 }
 0x148   : > { %v1319_v17 = vpop.f32.mrb[16].mxu0 }
 0x149   : > { %v1320_v18 = vpop.f32.mrb[17].mxu0  ;;  %v1363_v19 = vpop.f32.mrb[16].mxu1 }
 0x14a   : > { %v1321_v20 = vadd.f32 %v1320_v18, %v1319_v17  ;;  %v1364_v21 = vpop.f32.mrb[17].mxu1 }
 0x14b   : > { %v1365_v22 = vadd.f32 %v1364_v21, %v1363_v19 }
 0x14c   : > { %v833_v23 = vadd.f32 %v1321_v20, %v748_v59  ;;  %v1322_v24 = vpop.f32.mrb[18].mxu0 }
 0x14d   : > { %v1323_v25 = vpop.f32.mrb[19].mxu0  ;;  %v1366_v26 = vpop.f32.mrb[18].mxu1 }
 0x14e   : > { %v1324_v27 = vadd.f32 %v1323_v25, %v1322_v24  ;;  %v1367_v28 = vpop.f32.mrb[19].mxu1  ;;  %v918_v29 = vadd.f32 %v1365_v22, %v833_v23 }
 0x14f   : > { %v1368_v30 = vadd.f32 %v1367_v28, %v1366_v26 }
 0x150   : > { %v838_v31 = vadd.f32 %v1324_v27, %v753_v3  ;;  %v1325_v32 = vpop.f32.mrb[20].mxu0 }
 0x151   : > { %v1326_v33 = vpop.f32.mrb[21].mxu0  ;;  %v1369_v34 = vpop.f32.mrb[20].mxu1 }
 0x152   : > { %v1327_v35 = vadd.f32 %v1326_v33, %v1325_v32  ;;  %v1370_v36 = vpop.f32.mrb[21].mxu1  ;;  %v923_v37 = vadd.f32 %v1368_v30, %v838_v31 }
 0x153   : > { %v1371_v38 = vadd.f32 %v1370_v36, %v1369_v34 }
 0x154   : > { %v843_v39 = vadd.f32 %v1327_v35, %v758_v11  ;;  %v1328_v40 = vpop.f32.mrb[22].mxu0 }
 0x155   : > { %v1329_v41 = vpop.f32.mrb[23].mxu0  ;;  %v1372_v42 = vpop.f32.mrb[22].mxu1 }
 0x156   : > { %v1330_v43 = vadd.f32 %v1329_v41, %v1328_v40  ;;  %v1373_v44 = vpop.f32.mrb[23].mxu1  ;;  %v928_v45 = vadd.f32 %v1371_v38, %v843_v39 }
 0x157   : > { %v1374_v46 = vadd.f32 %v1373_v44, %v1372_v42 }
 0x158   : > { %v848_v47 = vadd.f32 %v1330_v43, %v763_v16  ;;  %v1384_v48 = vpop.f32.mrb[24].mxu0 }
 0x159   : > { %v1008_v49 = vadd.f32 %v1384_v48, %v923_v37  ;;  %v1387_v50 = vpop.f32.mrb[24].mxu1  ;;  %v1002_v51 = vpop.f32.mrb[25].mxu0 }
 0x15a   : > { %v933_v52 = vadd.f32 %v1374_v46, %v848_v47  ;;  %v1003_v53 = vadd.f32 %v1002_v51, %v918_v29  ;;  %v1012_v54 = vpop.f32.mrb[25].mxu1 }
 0x15b   : > { %1023 = vst.msk [vmem:[%s163_s22 + $0x8] sm:$0xff] %vm1021_vm2, %v1008_v49  ;;  %v1013_v55 = vadd.f32 %v1012_v54, %v928_v45 }
 0x15c   : > { %v1018_v56 = vadd.f32 %v1387_v50, %v933_v52  ;;  %1022 = vst.msk [vmem:[%s163_s22] sm:$0xff] %vm1021_vm2, %v1003_v53 }
 0x15d   : > { %1024 = vst.msk [vmem:[%s163_s22 + $0x10] sm:$0xff] %vm1021_vm2, %v1013_v55 }
 0x15e   : > { %1026 = vst.msk [vmem:[%s163_s22 + $0x18] sm:$0xf] %vm1025_vm3, %v1018_v56 }
 0x15f PF: > { %s12_s9 = sadd.s32 1, %s1598_s9  }
 0x160   : > { %p9_p4 = scmp.ge.s32.totalorder %s12_s9, 4  }
 0x162   :  { %11 = sbr.rel (!%p9_p4) target bundleno = 1 (0x1), region = 61 }

// kernel: net_forward.3
= control target key start
LH: loop header
LB: loop body
LE: loop exit
PB: predicated region body
PF: predicated region fallthrough
CT: control target
= control target key end

     0   :  { %15 = vsyncpa [#allocation3], 0  ;;  %s7433_s0 = inlined_call_operand.vmem [shape: f32[2,169,9], index: 0, kind: input, shape index: {}]   ;;  %s7434_s1 = inlined_call_operand.vmem [shape: f32[9,32], index: 1, kind: input, shape index: {}]   ;;  %s7435_s2 = inlined_call_operand.vmem [shape: f32[1,32], index: 2, kind: input, shape index: {}]   ;;  %s7436_s3 = inlined_call_operand.vmem [shape: f32[9,36,169], index: 3, kind: input, shape index: {}]   ;;  %s7437_s4 = inlined_call_operand.vmem [shape: f32[9,32,64], index: 4, kind: input, shape index: {}]   ;;  %s7438_s5 = inlined_call_operand.vmem [shape: f32[1,64], index: 5, kind: input, shape index: {}]   ;;  %s7439_s6 = inlined_call_operand.vmem [shape: f32[64,8], index: 6, kind: input, shape index: {}]   ;;  %s7440_s7 = inlined_call_operand.vmem [shape: f32[9,16,36], index: 7, kind: input, shape index: {}]   ;;  %s7441_s8 = inlined_call_operand.vmem [shape: f32[9,8,10], index: 8, kind: input, shape index: {}]   ;;  %s7442_s9 = inlined_call_operand.vmem [shape: f32[1,10], index: 9, kind: input, shape index: {}]   ;;  %s7443_s10 = inlined_call_operand.hbm [shape: f32[2,1,10], index: 10, kind: output, shape index: {}]  }
   0x1   :  { %17 = vsyncpa [#allocation3 + $0x1], 0  ;;  %s6088_s13 = smov 0   ;;  %s6090_s14 = smov 0  }
   0x2   :  { %s6092_s15 = smov 0   ;;  %s6094_s16 = smov 0  }
   0x3 LB: > { %s6109_s17 = sadd.s32 4294967295, %s6026_s16   ;;  %s4486_s18 = sadd.s32 4294967294, %s6026_s16   ;;  %s6026_s16 = sphi %s6094_s16, %s7451_s16   ;;  %s6022_s15 = sphi %s6092_s15, %s7450_s15   ;;  %s6018_s14 = sphi %s6090_s14, %s7449_s14   ;;  %s6014_s13 = sphi %s6088_s13, %s7448_s13  }
   0x4   : > { %s6113_s19 = sadd.s32 1, %s6026_s16   ;;  %s245_s20 = sadd.s32 1, %s6022_s15 }
   0x5   : > { %s242_s21 = ssub.s32 %s6026_s16, %s6113_s19  ;;  %p255_p0 = scmp.ne.s32.totalorder %s6022_s15, %s6018_s14 }
   0x6   : > { %p243_p1 = scmp.eq.s32.totalorder %s242_s21, 0  ;;  %p256_p2 = scmp.eq.s32.totalorder %s6109_s17, 1 }
   0x7   : > { %p261_p3 = scmp.ne.s32.totalorder %s6018_s14, %s6014_s13  ;;  %p262_p4 = scmp.eq.s32.totalorder %s4486_s18, 1 }
   0x8   : > { %s6124_s22 = scalar_select %p243_p1, %s6022_s15, %s245_s20  }
   0x9   : > { %p6126_p5 = por %p256_p2, %p255_p0  ;;  %p6130_p6 = por %p262_p4, %p261_p3 }
   0xa   : > { %p4489_p7 = scmp.ge.s32.totalorder %s6026_s16, 1  ;;  %p315_p8 = scmp.lt.s32.totalorder %s6026_s16, 3 }
   0xc   : > { %p316_p9 = pnand %p4489_p7, %p315_p8 }
   0xd   : > { %v379_v0 = vld [vmem:[%s7434_s1] sm:$0xff] (!%p316_p9)  ;;  %v380_v1 = vld [vmem:[%s7434_s1 + $0x8] sm:$0x1] (!%p316_p9)  ;;  %vm455_vm0 = vcmask (!%p316_p9), 1040384   ;;  %p352_p10 = scmp.lt.s32.totalorder (!%p316_p9), %s6109_s17, 1  ;;  %vm6028_vm1 = vmmov (!%p316_p9), 1  }
   0xe   : > { %319 = sbr.rel (%p316_p9) target bundleno = 4020 (0xfb4), region = 60  ;;  %v5450_v2 = vpack.c.bf16 (!%p316_p9), %v380_v1, %v379_v0  ;;  %vm6143_vm2 = vmpackc.low (!%p316_p9), %vm455_vm0, %vm6028_vm1  ;;  %vm388_vm3 = vcmask (!%p316_p9), 72704   ;;  %v6029_v26 = vmov (!%p316_p9), 0.0|0.0   ;;  %v657_v27 = vld [vmem:[%s7436_s3 + $0x8] sm:$0xff] (!%p316_p9)  ;;  %vm666_vm4 = vcmask (!%p316_p9), 334848   ;;  %v4522_v28 = vld [vmem:[%s7436_s3 + $0x58] sm:$0xff] (!%p316_p9) }
   0xf   : > { %5490 = vmatprep.subr.bf16.mxu0 (!%p316_p9), %v6029_v26  ;;  %4532 = vmatprep.mubr.msk.f32.mxu0 (!%p316_p9), %vm666_vm4, %v4522_v28  ;;  %v6214_v29 = vld [vmem:[%s7435_s2] ss:$0 sm:$0xff] (!%p316_p9)  ;;  %vm6030_vm5 = vmmov (!%p316_p9), 0   ;;  %vm900_vm6 = vcmask (!%p316_p9), 261120   ;;  %v4706_v3 = vld [vmem:[%s7436_s3 + $0x2a8] sm:$0xff] (!%p316_p9)  ;;  %vm2753_vm7 = vcmask (!%p316_p9), 523264  }
  0x10   : > { %5452 = vmatprep.subr.msk.bf16.mxu1 (!%p316_p9), %vm6143_vm2, %v5450_v2  ;;  %vm2861_vm8 = vcmask (!%p316_p9), 293888   ;;  %vm2868_vm9 = vcmask (!%p316_p9), 1043456   ;;  %vm3034_vm10 = vcmask (!%p316_p9), 64512   ;;  %vm4391_vm11 = vcmask (!%p316_p9), 80896   ;;  %s350_s12 = sand.u32 (!%p316_p9), 1, %s6018_s14  }
  0x11   : > { %5455 = vmatpush3.bf16.msk.msra.mxu1 (!%p316_p9), %vm6143_vm2, %v5450_v2  ;;  %s351_s20 = scalar_lea.vmem (!%p316_p9), [#allocation2], %s350_s12  ;;  %vm4416_vm12 = vcmask (!%p316_p9), 73728   ;;  %s4419_s28 = scalar_lea.sflag (!%p316_p9), [#allocation3], %s350_s12 }
  0x12   : > { %5456 = vmatprep.subr.bf16.mxu1 (!%p316_p9), %v6029_v26  ;;  %s4431_s21 = sshll.u32 (!%p316_p9), %s351_s20, 4  ;;  %s7393_s21 = int_to_ptr.vmem [resolvable:$true] %s4431_s21 }
  0x15   : > { %s353_s29 = scalar_select %p352_p10, %s6109_s17, 1 }
  0x17   : > { %s5916_s30 = smul.u32 176, %s353_s29  ;;  %s5964_s29 = scalar_lea.vmem %s7393_s21, 16 }
  0x18   : > { %p5965_p11 = scmp.ne.s32.totalorder %s7393_s21, %s5964_s29 }
  0x19   : > { %s6155_s18 = scalar_lea.vmem %s7433_s0, %s5916_s30 }
  0x1a   : > { %v357_v4 = vld [vmem:[%s6155_s18] sm:$0xff]  ;;  %v358_v5 = vld [vmem:[%s6155_s18 + $0x8] sm:$0xff]  ;;  %v359_v6 = vld [vmem:[%s6155_s18 + $0x10] sm:$0xff]  ;;  %p5966_p12 = pnand %p5965_p11, %p6126_p5 }
  0x1b   : > { %5017 = vmatprep.mubr.msk.f32.mxu1 %vm388_vm3, %v357_v4  ;;  %v360_v7 = vld [vmem:[%s6155_s18 + $0x18] sm:$0xff]  ;;  %v361_v8 = vld [vmem:[%s6155_s18 + $0x20] sm:$0xff]  ;;  %v362_v9 = vld [vmem:[%s6155_s18 + $0x28] sm:$0xff] }
  0x1c   : > { %5018 = vmatmul.mubr.msk.f32.vlgmr.msra.gmra.mrb[0].mxu1 %vm388_vm3, %v358_v5  ;;  %v363_v10 = vld [vmem:[%s6155_s18 + $0x30] sm:$0xff]  ;;  %v364_v11 = vld [vmem:[%s6155_s18 + $0x38] sm:$0xff]  ;;  %v365_v12 = vld [vmem:[%s6155_s18 + $0x40] sm:$0xff]  ;;  %p5967_p13 = pneg %p5966_p12 }
  0x1d   : > { %5020 = vmatprep.mubr.msk.f32.mxu1 %vm388_vm3, %v359_v6  ;;  %v366_v13 = vld [vmem:[%s6155_s18 + $0x48] sm:$0xff]  ;;  %v367_v14 = vld [vmem:[%s6155_s18 + $0x50] sm:$0xff]  ;;  %v368_v15 = vld [vmem:[%s6155_s18 + $0x58] sm:$0xff] }
  0x1e   : > { %v369_v16 = vld [vmem:[%s6155_s18 + $0x60] sm:$0xff]  ;;  %v370_v17 = vld [vmem:[%s6155_s18 + $0x68] sm:$0xff]  ;;  %v371_v18 = vld [vmem:[%s6155_s18 + $0x70] sm:$0xff] }
  0x1f   : > { %v372_v19 = vld [vmem:[%s6155_s18 + $0x78] sm:$0xff]  ;;  %v373_v20 = vld [vmem:[%s6155_s18 + $0x80] sm:$0xff]  ;;  %v374_v21 = vld [vmem:[%s6155_s18 + $0x88] sm:$0xff] }
  0x20   : > { %5021 = vmatmul.mubr.msk.f32.gmra.mrb[2].mxu1 %vm388_vm3, %v360_v7  ;;  %v375_v22 = vld [vmem:[%s6155_s18 + $0x90] sm:$0xff]  ;;  %v376_v23 = vld [vmem:[%s6155_s18 + $0x98] sm:$0xff]  ;;  %v377_v24 = vld [vmem:[%s6155_s18 + $0xa0] sm:$0xff] }
  0x21   : > { %5023 = vmatprep.mubr.msk.f32.mxu1 %vm388_vm3, %v361_v8  ;;  %v378_v25 = vld [vmem:[%s6155_s18 + $0xa8] sm:$0x1]  ;;  %s4802_s18 = sshll.u32 %s6109_s17, 4  ;;  %s6032_s17 = smov [#allocation2]  }
  0x22   : > { %s7391_s27 = scalar_lea.hbm %s7443_s10, %s4802_s18  ;;  %s5968_s30 = sshll.u32 %s6032_s17, 4  ;;  %s5969_s30 = int_to_ptr.vmem [resolvable:$false] %s5968_s30 }
  0x23   : > { %s5970_s11 = scalar_lea.vmem %s5969_s30, 32  ;;  %p5971_p0 = scmp.lt.s32.totalorder %s7393_s21, %s5969_s30 }
  0x24   : > { %5024 = vmatmul.mubr.msk.f32.gmra.mrb[4].mxu1 %vm388_vm3, %v362_v9  ;;  %p5972_p1 = scmp.lt.s32.totalorder %s5970_s11, %s5964_s29 }
  0x25   : > { %5026 = vmatprep.mubr.msk.f32.mxu1 %vm388_vm3, %v363_v10 }
  0x26   : > { %p5973_p2 = por %p5972_p1, %p5971_p0 }
  0x28   : > { %5027 = vmatmul.mubr.msk.f32.gmra.mrb[6].mxu1 %vm388_vm3, %v364_v11  ;;  %p5974_p3 = pnand %p5973_p2, %p5967_p13 }
  0x29   : > { %5029 = vmatprep.mubr.msk.f32.mxu1 %vm388_vm3, %v365_v12 }
  0x2c   : > { %5030 = vmatmul.mubr.msk.f32.gmra.mrb[8].mxu1 %vm388_vm3, %v366_v13 }
  0x2d   : > { %5032 = vmatprep.mubr.msk.f32.mxu1 %vm388_vm3, %v367_v14 }
  0x30   : > { %5033 = vmatmul.mubr.msk.f32.gmra.mrb[10].mxu1 %vm388_vm3, %v368_v15 }
  0x31   : > { %5035 = vmatprep.mubr.msk.f32.mxu1 %vm388_vm3, %v369_v16 }
  0x34   : > { %5036 = vmatmul.mubr.msk.f32.gmra.mrb[12].mxu1 %vm388_vm3, %v370_v17 }
  0x35   : > { %5038 = vmatprep.mubr.msk.f32.mxu1 %vm388_vm3, %v371_v18 }
  0x38   : > { %5039 = vmatmul.mubr.msk.f32.gmra.mrb[14].mxu1 %vm388_vm3, %v372_v19 }
  0x39   : > { %5041 = vmatprep.mubr.msk.f32.mxu1 %vm388_vm3, %v373_v20 }
  0x3c   : > { %5042 = vmatmul.mubr.msk.f32.gmra.mrb[16].mxu1 %vm388_vm3, %v374_v21 }
  0x3d   : > { %5044 = vmatprep.mubr.msk.f32.mxu1 %vm388_vm3, %v375_v22 }
  0x40   : > { %5045 = vmatmul.mubr.msk.f32.gmra.mrb[18].mxu1 %vm388_vm3, %v376_v23 }
  0x41   : > { %5047 = vmatprep.mubr.msk.f32.mxu1 %vm388_vm3, %v377_v24 }
  0x44   : > { %5048 = vmatmul.mubr.msk.f32.gmra.mrb[20].mxu1 %vm388_vm3, %v378_v25 }
  0x45   : > { %4516 = vmatprep.mubr.msk.f32.mxu1 %vm666_vm4, %v657_v27 }
  0xef   : > { %v5019_v30 = vpop.f32.mrb[0].mxu1 }
  0xf0   : > { %v531_v31 = vadd.f32 %v5019_v30, %v6214_v29  ;;  %v525_v32 = vpop.f32.mrb[1].mxu1 }
  0xf1   : > { %v526_v33 = vadd.f32 %v6214_v29, %v525_v32 }
  0xf2   : > { %v635_v34 = vmax.f32 %v531_v31, 0.0 }
  0xf3   : > { %v634_v35 = vmax.f32 %v526_v33, 0.0  ;;  %v5022_v36 = vpop.f32.mrb[2].mxu1 }
  0xf4   : > { %v541_v37 = vadd.f32 %v5022_v36, %v6214_v29  ;;  %v535_v38 = vpop.f32.mrb[3].mxu1 }
  0xf5   : > { %v6219_v39 = vpack.c.bf16 %v635_v34, %v634_v35  ;;  %v536_v40 = vadd.f32 %v6214_v29, %v535_v38 }
  0xf6   : > { %v637_v41 = vmax.f32 %v541_v37, 0.0 }
  0xf7   : > { %v636_v42 = vmax.f32 %v536_v40, 0.0  ;;  %v5025_v43 = vpop.f32.mrb[4].mxu1  ;;  %5458 = vmatpush1.bf16.msra.mxu1 %v6219_v39  ;;  %5492 = vmatpush1.bf16.msra.mxu0 %v6219_v39 }
  0xf8   : > { %v551_v44 = vadd.f32 %v5025_v43, %v6214_v29  ;;  %v545_v45 = vpop.f32.mrb[5].mxu1  ;;  %5459 = vmatprep.subr.bf16.mxu1 %v6029_v26  ;;  %5493 = vmatprep.subr.bf16.mxu0 %v6029_v26 }
  0xf9   : > { %v6227_v46 = vpack.c.bf16 %v637_v41, %v636_v42  ;;  %v546_v47 = vadd.f32 %v6214_v29, %v545_v45 }
  0xfa   : > { %v639_v48 = vmax.f32 %v551_v44, 0.0 }
  0xfb   : > { %v638_v49 = vmax.f32 %v546_v47, 0.0  ;;  %v5028_v50 = vpop.f32.mrb[6].mxu1  ;;  %5461 = vmatpush1.bf16.msra.mxu1 %v6227_v46  ;;  %5495 = vmatpush1.bf16.msra.mxu0 %v6227_v46  ;;  %v4537_v47 = vld [vmem:[%s7437_s4 + $0x20] sm:$0xff] }
  0xfc   : > { %v561_v51 = vadd.f32 %v5028_v50, %v6214_v29  ;;  %v555_v52 = vpop.f32.mrb[7].mxu1  ;;  %5462 = vmatprep.subr.bf16.mxu1 %v6029_v26  ;;  %5496 = vmatprep.subr.bf16.mxu0 %v6029_v26  ;;  %v776_v50 = vld [vmem:[%s7437_s4 + $0x8] sm:$0xff] }
  0xfd   : > { %v6235_v53 = vpack.c.bf16 %v639_v48, %v638_v49  ;;  %v556_v54 = vadd.f32 %v6214_v29, %v555_v52  ;;  %v775_v49 = vld [vmem:[%s7437_s4] sm:$0xff]  ;;  %v4521_v52 = vld [vmem:[%s7436_s3 + $0x50] sm:$0xff] }
  0xfe   : > { %v641_v55 = vmax.f32 %v561_v51, 0.0  ;;  %v656_v51 = vld [vmem:[%s7436_s3] sm:$0xff] }
  0xff   : > { %v640_v56 = vmax.f32 %v556_v54, 0.0  ;;  %v5031_v57 = vpop.f32.mrb[8].mxu1  ;;  %5464 = vmatpush1.bf16.msra.mxu1 %v6235_v53  ;;  %5498 = vmatpush1.bf16.msra.mxu0 %v6235_v53  ;;  %v4524_v54 = vld [vmem:[%s7436_s3 + $0x68] sm:$0xff] }
 0x100   : > { %v571_v58 = vadd.f32 %v5031_v57, %v6214_v29  ;;  %v565_v59 = vpop.f32.mrb[9].mxu1  ;;  %5465 = vmatprep.subr.bf16.mxu1 %v6029_v26  ;;  %5499 = vmatprep.subr.bf16.mxu0 %v6029_v26  ;;  %v5531_v57 = vpack.c.bf16 %v776_v50, %v775_v49  ;;  %v4554_v49 = vld [vmem:[%s7436_s3 + $0xb8] sm:$0xff]  ;;  %v4553_v50 = vld [vmem:[%s7436_s3 + $0xb0] sm:$0xff] }
 0x101   : > { %v6243_v60 = vpack.c.bf16 %v641_v55, %v640_v56  ;;  %v566_v61 = vadd.f32 %v6214_v29, %v565_v59  ;;  %v659_v55 = vld [vmem:[%s7436_s3 + $0x18] sm:$0xff] }
 0x102   : > { %v643_v62 = vmax.f32 %v571_v58, 0.0  ;;  %v4539_v58 = vld [vmem:[%s7437_s4 + $0x30] sm:$0xff]  ;;  %v4540_v59 = vld [vmem:[%s7437_s4 + $0x38] sm:$0xff] }
 0x103   : > { %v642_v63 = vmax.f32 %v566_v61, 0.0  ;;  %v5034_v0 = vpop.f32.mrb[10].mxu1  ;;  %5467 = vmatpush1.bf16.msra.mxu1 %v6243_v60  ;;  %5501 = vmatpush1.bf16.msra.mxu0 %v6243_v60  ;;  %v777_v61 = vld [vmem:[%s7437_s4 + $0x10] sm:$0xff] }
 0x104   : > { %v581_v1 = vadd.f32 %v5034_v0, %v6214_v29  ;;  %v575_v2 = vpop.f32.mrb[11].mxu1  ;;  %5468 = vmatprep.subr.bf16.mxu1 %v6029_v26  ;;  %5502 = vmatprep.subr.bf16.mxu0 %v6029_v26  ;;  %v658_v0 = vld [vmem:[%s7436_s3 + $0x10] sm:$0xff] }
 0x105   : > { %v6251_v4 = vpack.c.bf16 %v643_v62, %v642_v63  ;;  %v576_v5 = vadd.f32 %v6214_v29, %v575_v2  ;;  %v778_v62 = vld [vmem:[%s7437_s4 + $0x18] sm:$0xff]  ;;  %v4523_v63 = vld [vmem:[%s7436_s3 + $0x60] sm:$0xff]  ;;  %v661_v2 = vld [vmem:[%s7436_s3 + $0x28] sm:$0xff] }
 0x106   : > { %v645_v6 = vmax.f32 %v581_v1, 0.0  ;;  %v4526_v1 = vld [vmem:[%s7436_s3 + $0x78] sm:$0xff] }
 0x107   : > { %v644_v7 = vmax.f32 %v576_v5, 0.0  ;;  %v5037_v8 = vpop.f32.mrb[12].mxu1  ;;  %5470 = vmatpush1.bf16.msra.mxu1 %v6251_v4  ;;  %5504 = vmatpush1.bf16.msra.mxu0 %v6251_v4  ;;  %v5528_v5 = vpack.c.bf16 %v4540_v59, %v4539_v58  ;;  %v4567_v58 = vld [vmem:[%s7437_s4 + $0x40] sm:$0xff]  ;;  %v4568_v59 = vld [vmem:[%s7437_s4 + $0x48] sm:$0xff] }
 0x108   : > { %v591_v9 = vadd.f32 %v5037_v8, %v6214_v29  ;;  %v585_v10 = vpop.f32.mrb[13].mxu1  ;;  %5471 = vmatprep.subr.bf16.mxu1 %v6029_v26  ;;  %5505 = vmatprep.subr.bf16.mxu0 %v6029_v26  ;;  %v660_v8 = vld [vmem:[%s7436_s3 + $0x20] sm:$0xff] }
 0x109   : > { %v6259_v11 = vpack.c.bf16 %v645_v6, %v644_v7  ;;  %v586_v12 = vadd.f32 %v6214_v29, %v585_v10  ;;  %v5534_v6 = vpack.c.bf16 %v778_v62, %v777_v61  ;;  %v4525_v7 = vld [vmem:[%s7436_s3 + $0x70] sm:$0xff]  ;;  %v663_v10 = vld [vmem:[%s7436_s3 + $0x38] sm:$0xff]  ;;  %v5571_v61 = vpack.c.bf16 %v4568_v59, %v4567_v58  ;;  %v4592_v59 = vld [vmem:[%s7437_s4 + $0x60] sm:$0xff] }
 0x10a   : > { %v647_v13 = vmax.f32 %v591_v9, 0.0  ;;  %v4528_v9 = vld [vmem:[%s7436_s3 + $0x88] sm:$0xff]  ;;  %v4569_v62 = vld [vmem:[%s7437_s4 + $0x50] sm:$0xff] }
 0x10b   : > { %v646_v14 = vmax.f32 %v586_v12, 0.0  ;;  %v5040_v15 = vpop.f32.mrb[14].mxu1  ;;  %5473 = vmatpush1.bf16.msra.mxu1 %v6259_v11  ;;  %5507 = vmatpush1.bf16.msra.mxu0 %v6259_v11  ;;  %v4527_v12 = vld [vmem:[%s7436_s3 + $0x80] sm:$0xff]  ;;  %v4584_v58 = vld [vmem:[%s7436_s3 + $0x130] sm:$0xf] }
 0x10c   : > { %v601_v16 = vadd.f32 %v5040_v15, %v6214_v29  ;;  %v595_v17 = vpop.f32.mrb[15].mxu1  ;;  %5474 = vmatprep.subr.bf16.mxu1 %v6029_v26  ;;  %5508 = vmatprep.subr.bf16.mxu0 %v6029_v26  ;;  %v665_v15 = vld [vmem:[%s7436_s3 + $0x48] sm:$0xf] }
 0x10d   : > { %v6267_v18 = vpack.c.bf16 %v647_v13, %v646_v14  ;;  %v596_v19 = vadd.f32 %v6214_v29, %v595_v17  ;;  %v662_v13 = vld [vmem:[%s7436_s3 + $0x30] sm:$0xff]  ;;  %v4530_v14 = vld [vmem:[%s7436_s3 + $0x98] sm:$0xf]  ;;  %v664_v17 = vld [vmem:[%s7436_s3 + $0x40] sm:$0xf] }
 0x10e   : > { %v649_v20 = vmax.f32 %v601_v16, 0.0  ;;  %v4529_v16 = vld [vmem:[%s7436_s3 + $0x90] sm:$0xf] }
 0x10f   : > { %v648_v21 = vmax.f32 %v596_v19, 0.0  ;;  %v5043_v22 = vpop.f32.mrb[16].mxu1  ;;  %5476 = vmatpush1.bf16.msra.mxu1 %v6267_v18  ;;  %5510 = vmatpush1.bf16.msra.mxu0 %v6267_v18  ;;  %v6031_v19 = vmov 0.0  }
 0x110   : > { %v611_v23 = vadd.f32 %v5043_v22, %v6214_v29  ;;  %v605_v24 = vpop.f32.mrb[17].mxu1  ;;  %5477 = vmatprep.subr.bf16.mxu1 %v6029_v26  ;;  %5511 = vmatprep.subr.bf16.mxu0 %v6029_v26 }
 0x111   : > { %v6275_v25 = vpack.c.bf16 %v649_v20, %v648_v21  ;;  %v606_v27 = vadd.f32 %v6214_v29, %v605_v24 }
 0x112   : > { %v651_v28 = vmax.f32 %v611_v23, 0.0 }
 0x113   : > { %v650_v30 = vmax.f32 %v606_v27, 0.0  ;;  %v5046_v31 = vpop.f32.mrb[18].mxu1  ;;  %5479 = vmatpush1.bf16.msra.mxu1 %v6275_v25  ;;  %5513 = vmatpush1.bf16.msra.mxu0 %v6275_v25 }
 0x114   : > { %v621_v32 = vadd.f32 %v5046_v31, %v6214_v29  ;;  %v615_v33 = vpop.f32.mrb[19].mxu1  ;;  %5480 = vmatprep.subr.bf16.mxu1 %v6029_v26  ;;  %5514 = vmatprep.subr.bf16.mxu0 %v6029_v26 }
 0x115   : > { %v6283_v34 = vpack.c.bf16 %v651_v28, %v650_v30  ;;  %v616_v35 = vadd.f32 %v6214_v29, %v615_v33 }
 0x116   : > { %v653_v36 = vmax.f32 %v621_v32, 0.0 }
 0x117   : > { %v652_v37 = vmax.f32 %v616_v35, 0.0  ;;  %v5049_v38 = vpop.f32.mrb[20].mxu1  ;;  %5482 = vmatpush1.bf16.msra.mxu1 %v6283_v34  ;;  %5516 = vmatpush1.bf16.msra.mxu0 %v6283_v34 }
 0x118   : > { %v631_v40 = vadd.f32 %v5049_v38, %v6214_v29  ;;  %v625_v41 = vpop.f32.mrb[21].mxu1  ;;  %5483 = vmatprep.subr.bf16.mxu1 %v6029_v26  ;;  %5517 = vmatprep.subr.bf16.mxu0 %v6029_v26 }
 0x119   : > { %v6291_v42 = vpack.c.bf16 %v653_v36, %v652_v37  ;;  %v626_v43 = vadd.f32 %v6214_v29, %v625_v41  ;;  %v4538_v29 = vld [vmem:[%s7437_s4 + $0x28] sm:$0xff] }
 0x11a   : > { %v655_v44 = vmax.f32 %v631_v40, 0.0  ;;  %v5525_v56 = vpack.c.bf16 %v4538_v29, %v4537_v47  ;;  %v4552_v41 = vld [vmem:[%s7436_s3 + $0xa8] sm:$0xff]  ;;  %v4551_v29 = vld [vmem:[%s7436_s3 + $0xa0] sm:$0xff] }
 0x11b   : > { %v654_v45 = vmax.f32 %v626_v43, 0.0  ;;  %5485 = vmatpush1.bf16.msra.mxu1 %v6291_v42  ;;  %5519 = vmatpush1.bf16.msra.mxu0 %v6291_v42 }
 0x11c   : > { %5486 = vmatprep.subr.bf16.mxu1 %v6029_v26  ;;  %5520 = vmatprep.subr.bf16.mxu0 %v6029_v26 }
 0x11d   : > { %v6301_v48 = vpack.c.bf16 %v655_v44, %v654_v45 }
 0x11f   : > { %5489 = vmatpush1.bf16.msk.msra.mxu1 %vm6143_vm2, %v6301_v48  ;;  %5523 = vmatpush1.bf16.msk.msra.mxu0 %vm6143_vm2, %v6301_v48 }
 0x120   : > { %5524 = vmatprep.subr.bf16.mxu1 %v6029_v26  ;;  %5530 = vmatprep.subr.bf16.mxu0 %v6029_v26 }
 0x122   : > { %750 = vmatmul.mubr.f32.vlgmr.msra.gmra.mrb[22].mxu1 %v656_v51  ;;  %870 = vmatmul.mubr.f32.vlgmr.msra.gmra.mrb[0].mxu0 %v4521_v52  ;;  %v4556_v51 = vld [vmem:[%s7436_s3 + $0xc8] sm:$0xff]  ;;  %v4555_v52 = vld [vmem:[%s7436_s3 + $0xc0] sm:$0xff] }
 0x123   : > { %4533 = vmatprep.mubr.msk.f32.mxu0 %vm666_vm4, %v4524_v54  ;;  %4517 = vmatprep.mubr.msk.f32.mxu1 %vm666_vm4, %v659_v55  ;;  %v4558_v54 = vld [vmem:[%s7436_s3 + $0xd8] sm:$0xff]  ;;  %v4557_v55 = vld [vmem:[%s7436_s3 + $0xd0] sm:$0xff] }
 0x124   : > { %5526 = vmatpush3.bf16.msra.mxu1 %v5525_v56  ;;  %5532 = vmatpush3.bf16.msra.mxu0 %v5531_v57  ;;  %v4560_v56 = vld [vmem:[%s7436_s3 + $0xe8] sm:$0xf]  ;;  %v4559_v57 = vld [vmem:[%s7436_s3 + $0xe0] sm:$0xf] }
 0x125   : > { %5527 = vmatprep.subr.bf16.mxu1 %v6029_v26  ;;  %5533 = vmatprep.subr.bf16.mxu0 %v6029_v26 }
 0x126   : > { %875 = vmatmul.mubr.f32.gmra.mrb[2].mxu0 %v4523_v63  ;;  %755 = vmatmul.mubr.f32.gmra.mrb[24].mxu1 %v658_v0  ;;  %v4570_v63 = vld [vmem:[%s7437_s4 + $0x58] sm:$0xff] }
 0x127   : > { %4534 = vmatprep.mubr.msk.f32.mxu0 %vm666_vm4, %v4526_v1  ;;  %4518 = vmatprep.mubr.msk.f32.mxu1 %vm666_vm4, %v661_v2  ;;  %v5574_v0 = vpack.c.bf16 %v4570_v63, %v4569_v62  ;;  %v4594_v62 = vld [vmem:[%s7437_s4 + $0x70] sm:$0xff] }
 0x128   : > { %5529 = vmatpush3.bf16.msra.mxu1 %v5528_v5  ;;  %5535 = vmatpush3.bf16.msra.mxu0 %v5534_v6 }
 0x129   : > { %5536 = vmatprep.subr.bf16.mxu1 %v6029_v26  ;;  %5570 = vmatprep.subr.bf16.mxu0 %v6029_v26 }
 0x12a   : > { %880 = vmatmul.mubr.f32.gmra.mrb[4].mxu0 %v4525_v7  ;;  %760 = vmatmul.mubr.f32.gmra.mrb[26].mxu1 %v660_v8 }
 0x12b   : > { %4535 = vmatprep.mubr.msk.f32.mxu0 %vm666_vm4, %v4528_v9  ;;  %4519 = vmatprep.mubr.msk.f32.mxu1 %vm666_vm4, %v663_v10 }
 0x12e   : > { %885 = vmatmul.mubr.f32.gmra.mrb[6].mxu0 %v4527_v12  ;;  %765 = vmatmul.mubr.f32.gmra.mrb[28].mxu1 %v662_v13 }
 0x12f   : > { %4536 = vmatprep.mubr.msk.f32.mxu0 %vm666_vm4, %v4530_v14  ;;  %4520 = vmatprep.mubr.msk.f32.mxu1 %vm666_vm4, %v665_v15 }
 0x132   : > { %890 = vmatmul.mubr.f32.gmra.mrb[8].mxu0 %v4529_v16  ;;  %770 = vmatmul.mubr.f32.gmra.mrb[30].mxu1 %v664_v17 }
 0x133   : > { %5058 = vmatprep.mubr.msk.f32.mxu1 %vm6030_vm5, %v6031_v19  ;;  %5081 = vmatprep.mubr.msk.f32.mxu0 %vm6030_vm5, %v6031_v19 }
 0x1f5   : > { %v751_v20 = vpop.f32.mrb[22].mxu1  ;;  %v871_v21 = vpop.f32.mrb[0].mxu0 }
 0x1f6   : > { %v873_v22 = vpop.f32.mrb[1].mxu0  ;;  %5059 = vmatmul.mubr.msk.f32.vlgmr.msra.gmra.mrb[32].mxu1 %vm900_vm6, %v871_v21  ;;  %5082 = vmatmul.mubr.msk.f32.vlgmr.msra.gmra.mrb[10].mxu0 %vm900_vm6, %v751_v20  ;;  %v753_v23 = vpop.f32.mrb[23].mxu1 }
 0x1f7   : > { %5538 = vmatpush1.bf16.msra.mxu1 %v6219_v39  ;;  %5061 = vmatprep.mubr.msk.f32.mxu1 %vm6030_vm5, %v6031_v19 }
 0x1f8   : > { %5539 = vmatprep.subr.bf16.mxu1 %v6029_v26  ;;  %5084 = vmatprep.mubr.msk.f32.mxu0 %vm6030_vm5, %v6031_v19 }
 0x1f9   : > { %v876_v24 = vpop.f32.mrb[2].mxu0  ;;  %v756_v27 = vpop.f32.mrb[24].mxu1  ;;  %5572 = vmatpush3.bf16.msra.mxu0 %v5571_v61  ;;  %v4593_v61 = vld [vmem:[%s7437_s4 + $0x68] sm:$0xff] }
 0x1fa   : > { %v878_v28 = vpop.f32.mrb[3].mxu0  ;;  %5062 = vmatmul.mubr.msk.f32.gmra.mrb[34].mxu1 %vm900_vm6, %v876_v24  ;;  %5085 = vmatmul.mubr.msk.f32.gmra.mrb[12].mxu0 %vm900_vm6, %v756_v27  ;;  %v758_v30 = vpop.f32.mrb[25].mxu1  ;;  %v5611_v63 = vpack.c.bf16 %v4593_v61, %v4592_v59 }
 0x1fb   : > { %5541 = vmatpush1.bf16.msra.mxu1 %v6227_v46  ;;  %5064 = vmatprep.mubr.msk.f32.mxu1 %vm6030_vm5, %v6031_v19 }
 0x1fc   : > { %5542 = vmatprep.subr.bf16.mxu1 %v6029_v26  ;;  %5087 = vmatprep.mubr.msk.f32.mxu0 %vm6030_vm5, %v6031_v19 }
 0x1fd   : > { %v881_v31 = vpop.f32.mrb[4].mxu0  ;;  %v761_v32 = vpop.f32.mrb[26].mxu1  ;;  %5573 = vmatprep.subr.bf16.mxu0 %v6029_v26 }
 0x1fe   : > { %v883_v33 = vpop.f32.mrb[5].mxu0  ;;  %5065 = vmatmul.mubr.msk.f32.gmra.mrb[36].mxu1 %vm900_vm6, %v881_v31  ;;  %5088 = vmatmul.mubr.msk.f32.gmra.mrb[14].mxu0 %vm900_vm6, %v761_v32  ;;  %v763_v35 = vpop.f32.mrb[27].mxu1 }
 0x1ff   : > { %5544 = vmatpush1.bf16.msra.mxu1 %v6235_v53  ;;  %5067 = vmatprep.mubr.msk.f32.mxu1 %vm6030_vm5, %v6031_v19 }
 0x200   : > { %5545 = vmatprep.subr.bf16.mxu1 %v6029_v26  ;;  %5090 = vmatprep.mubr.msk.f32.mxu0 %vm6030_vm5, %v6031_v19 }
 0x201   : > { %v886_v36 = vpop.f32.mrb[6].mxu0  ;;  %v766_v37 = vpop.f32.mrb[28].mxu1  ;;  %5575 = vmatpush3.bf16.msra.mxu0 %v5574_v0  ;;  %v4595_v0 = vld [vmem:[%s7437_s4 + $0x78] sm:$0xff] }
 0x202   : > { %v888_v38 = vpop.f32.mrb[7].mxu0  ;;  %5068 = vmatmul.mubr.msk.f32.gmra.mrb[38].mxu1 %vm900_vm6, %v886_v36  ;;  %5091 = vmatmul.mubr.msk.f32.gmra.mrb[16].mxu0 %vm900_vm6, %v766_v37  ;;  %v768_v40 = vpop.f32.mrb[29].mxu1 }
 0x203   : > { %5547 = vmatpush1.bf16.msra.mxu1 %v6243_v60  ;;  %5070 = vmatprep.mubr.msk.f32.mxu1 %vm6030_vm5, %v6031_v19 }
 0x204   : > { %5548 = vmatprep.subr.bf16.mxu1 %v6029_v26  ;;  %5093 = vmatprep.mubr.msk.f32.mxu0 %vm6030_vm5, %v6031_v19 }
 0x205   : > { %v891_v43 = vpop.f32.mrb[8].mxu0  ;;  %v771_v44 = vpop.f32.mrb[30].mxu1  ;;  %5576 = vmatprep.subr.bf16.mxu0 %v6029_v26 }
 0x206   : > { %v893_v45 = vpop.f32.mrb[9].mxu0  ;;  %5071 = vmatmul.mubr.msk.f32.gmra.mrb[40].mxu1 %vm900_vm6, %v891_v43  ;;  %5094 = vmatmul.mubr.msk.f32.gmra.mrb[18].mxu0 %vm900_vm6, %v771_v44  ;;  %v773_v47 = vpop.f32.mrb[31].mxu1 }
 0x207   : > { %5550 = vmatpush1.bf16.msra.mxu1 %v6251_v4  ;;  %4562 = vmatprep.mubr.msk.f32.mxu1 %vm666_vm4, %v4552_v41  ;;  %v4577_v45 = vld [vmem:[%s7436_s3 + $0xf8] sm:$0xff] }
 0x208   : > { %5551 = vmatprep.subr.bf16.mxu1 %v6029_v26  ;;  %5104 = vmatprep.mubr.msk.f32.mxu0 %vm6030_vm5, %v6031_v19 }
 0x20b   : > { %5553 = vmatpush1.bf16.msra.mxu1 %v6259_v11 }
 0x20c   : > { %5554 = vmatprep.subr.bf16.mxu1 %v6029_v26 }
 0x20f   : > { %5556 = vmatpush1.bf16.msra.mxu1 %v6267_v18 }
 0x210   : > { %5557 = vmatprep.subr.bf16.mxu1 %v6029_v26 }
 0x213   : > { %5559 = vmatpush1.bf16.msra.mxu1 %v6275_v25 }
 0x214   : > { %5560 = vmatprep.subr.bf16.mxu1 %v6029_v26 }
 0x217   : > { %5562 = vmatpush1.bf16.msra.mxu1 %v6283_v34 }
 0x218   : > { %5563 = vmatprep.subr.bf16.mxu1 %v6029_v26 }
 0x21b   : > { %5565 = vmatpush1.bf16.msra.mxu1 %v6291_v42 }
 0x21c   : > { %5566 = vmatprep.subr.bf16.mxu1 %v6029_v26 }
 0x21f   : > { %5569 = vmatpush1.bf16.msk.msra.mxu1 %vm6143_vm2, %v6301_v48 }
 0x220   : > { %5610 = vmatprep.subr.bf16.mxu1 %v6029_v26 }
 0x222   : > { %1202 = vmatmul.mubr.f32.vlgmr.msra.gmra.mrb[42].mxu1 %v4551_v29 }
 0x223   : > { %4563 = vmatprep.mubr.msk.f32.mxu1 %vm666_vm4, %v4554_v49  ;;  %v4576_v49 = vld [vmem:[%s7436_s3 + $0xf0] sm:$0xff]  ;;  %5612 = vmatpush3.bf16.msra.mxu1 %v5611_v63 }
 0x224   : > { %5613 = vmatprep.subr.bf16.mxu1 %v6029_v26 }
 0x226   : > { %1207 = vmatmul.mubr.f32.gmra.mrb[44].mxu1 %v4553_v50  ;;  %v4579_v50 = vld [vmem:[%s7436_s3 + $0x108] sm:$0xff] }
 0x227   : > { %4564 = vmatprep.mubr.msk.f32.mxu1 %vm666_vm4, %v4556_v51  ;;  %v4578_v51 = vld [vmem:[%s7436_s3 + $0x100] sm:$0xff] }
 0x22a   : > { %1212 = vmatmul.mubr.f32.gmra.mrb[46].mxu1 %v4555_v52  ;;  %v4581_v52 = vld [vmem:[%s7436_s3 + $0x118] sm:$0xff] }
 0x22b   : > { %4565 = vmatprep.mubr.msk.f32.mxu1 %vm666_vm4, %v4558_v54  ;;  %v4580_v54 = vld [vmem:[%s7436_s3 + $0x110] sm:$0xff] }
 0x22e   : > { %1217 = vmatmul.mubr.f32.gmra.mrb[48].mxu1 %v4557_v55  ;;  %v4583_v55 = vld [vmem:[%s7436_s3 + $0x128] sm:$0xff] }
 0x22f   : > { %4566 = vmatprep.mubr.msk.f32.mxu1 %vm666_vm4, %v4560_v56  ;;  %v4582_v56 = vld [vmem:[%s7436_s3 + $0x120] sm:$0xff] }
 0x232   : > { %1222 = vmatmul.mubr.f32.gmra.mrb[50].mxu1 %v4559_v57  ;;  %v4585_v57 = vld [vmem:[%s7436_s3 + $0x138] sm:$0xf] }
 0x233   : > { %5127 = vmatprep.mubr.msk.f32.mxu1 %vm6030_vm5, %v6031_v19 }
 0x2c9   : > { %v982_v1 = vpop.f32.mrb[32].mxu1  ;;  %v1087_v2 = vpop.f32.mrb[10].mxu0 }
 0x2ca   : > { %v6505_v5 = vadd.f32 %v1087_v2, %v982_v1  ;;  %v5060_v6 = vpop.f32.mrb[33].mxu1  ;;  %v5083_v7 = vpop.f32.mrb[11].mxu0  ;;  %v5614_v1 = vpack.c.bf16 %v4595_v0, %v4594_v62 }
 0x2cc   : > { %5615 = vmatpush3.bf16.msra.mxu1 %v5614_v1 }
 0x2cd   : > { %v987_v8 = vpop.f32.mrb[34].mxu1  ;;  %v1092_v9 = vpop.f32.mrb[12].mxu0  ;;  %5616 = vmatprep.subr.bf16.mxu1 %v6029_v26 }
 0x2ce   : > { %v5063_v10 = vpop.f32.mrb[35].mxu1  ;;  %v6507_v12 = vadd.f32 %v1092_v9, %v987_v8  ;;  %v5086_v13 = vpop.f32.mrb[13].mxu0 }
 0x2d1   : > { %v992_v14 = vpop.f32.mrb[36].mxu1  ;;  %v1097_v15 = vpop.f32.mrb[14].mxu0 }
 0x2d2   : > { %v5066_v16 = vpop.f32.mrb[37].mxu1  ;;  %v6509_v17 = vadd.f32 %v1097_v15, %v992_v14  ;;  %v5089_v20 = vpop.f32.mrb[15].mxu0 }
 0x2d5   : > { %v997_v21 = vpop.f32.mrb[38].mxu1  ;;  %v1102_v22 = vpop.f32.mrb[16].mxu0 }
 0x2d6   : > { %v5069_v23 = vpop.f32.mrb[39].mxu1  ;;  %v6511_v24 = vadd.f32 %v1102_v22, %v997_v21  ;;  %v5092_v27 = vpop.f32.mrb[17].mxu0 }
 0x2d9   : > { %v1002_v28 = vpop.f32.mrb[40].mxu1  ;;  %v1107_v30 = vpop.f32.mrb[18].mxu0 }
 0x2da   : > { %v5072_v31 = vpop.f32.mrb[41].mxu1  ;;  %v6513_v32 = vadd.f32 %v1107_v30, %v1002_v28  ;;  %v5095_v33 = vpop.f32.mrb[19].mxu0 }
 0x2db   : > { %v4602_v33 = vld [vmem:[%s7436_s3 + $0x148] sm:$0xff] }
 0x2f5   : > { %v1203_v35 = vpop.f32.mrb[42].mxu1 }
 0x2f6   : > { %v1205_v36 = vpop.f32.mrb[43].mxu1  ;;  %5105 = vmatmul.mubr.msk.f32.vlgmr.msra.gmra.mrb[20].mxu0 %vm900_vm6, %v1203_v35 }
 0x2f7   : > { %5578 = vmatpush1.bf16.msra.mxu0 %v6219_v39  ;;  %5107 = vmatprep.mubr.msk.f32.mxu0 %vm6030_vm5, %v6031_v19 }
 0x2f8   : > { %5579 = vmatprep.subr.bf16.mxu0 %v6029_v26 }
 0x2f9   : > { %v1208_v37 = vpop.f32.mrb[44].mxu1 }
 0x2fa   : > { %5108 = vmatmul.mubr.msk.f32.gmra.mrb[22].mxu0 %vm900_vm6, %v1208_v37  ;;  %v1210_v38 = vpop.f32.mrb[45].mxu1  ;;  %v4601_v37 = vld [vmem:[%s7436_s3 + $0x140] sm:$0xff] }
 0x2fb   : > { %5581 = vmatpush1.bf16.msra.mxu0 %v6227_v46  ;;  %5110 = vmatprep.mubr.msk.f32.mxu0 %vm6030_vm5, %v6031_v19  ;;  %v4604_v38 = vld [vmem:[%s7436_s3 + $0x158] sm:$0xff] }
 0x2fc   : > { %5582 = vmatprep.subr.bf16.mxu0 %v6029_v26 }
 0x2fd   : > { %v1213_v40 = vpop.f32.mrb[46].mxu1 }
 0x2fe   : > { %5111 = vmatmul.mubr.msk.f32.gmra.mrb[24].mxu0 %vm900_vm6, %v1213_v40  ;;  %v1215_v41 = vpop.f32.mrb[47].mxu1  ;;  %v4603_v40 = vld [vmem:[%s7436_s3 + $0x150] sm:$0xff] }
 0x2ff   : > { %5584 = vmatpush1.bf16.msra.mxu0 %v6235_v53  ;;  %5113 = vmatprep.mubr.msk.f32.mxu0 %vm6030_vm5, %v6031_v19  ;;  %v4606_v41 = vld [vmem:[%s7436_s3 + $0x168] sm:$0xff] }
 0x300   : > { %5585 = vmatprep.subr.bf16.mxu0 %v6029_v26 }
 0x301   : > { %v1218_v43 = vpop.f32.mrb[48].mxu1 }
 0x302   : > { %5114 = vmatmul.mubr.msk.f32.gmra.mrb[26].mxu0 %vm900_vm6, %v1218_v43  ;;  %v1220_v44 = vpop.f32.mrb[49].mxu1  ;;  %v4605_v43 = vld [vmem:[%s7436_s3 + $0x160] sm:$0xff] }
 0x303   : > { %5587 = vmatpush1.bf16.msra.mxu0 %v6243_v60  ;;  %5116 = vmatprep.mubr.msk.f32.mxu0 %vm6030_vm5, %v6031_v19  ;;  %v4608_v44 = vld [vmem:[%s7436_s3 + $0x178] sm:$0xff] }
 0x304   : > { %5588 = vmatprep.subr.bf16.mxu0 %v6029_v26 }
 0x305   : > { %v1223_v47 = vpop.f32.mrb[50].mxu1 }
 0x306   : > { %5117 = vmatmul.mubr.msk.f32.gmra.mrb[28].mxu0 %vm900_vm6, %v1223_v47  ;;  %v1225_v29 = vpop.f32.mrb[51].mxu1  ;;  %v4610_v47 = vld [vmem:[%s7436_s3 + $0x188] sm:$0xf] }
 0x307   : > { %5590 = vmatpush1.bf16.msra.mxu0 %v6251_v4  ;;  %4587 = vmatprep.mubr.msk.f32.mxu0 %vm666_vm4, %v4577_v45  ;;  %v4607_v45 = vld [vmem:[%s7436_s3 + $0x170] sm:$0xff]  ;;  %v4609_v29 = vld [vmem:[%s7436_s3 + $0x180] sm:$0xf] }
 0x308   : > { %5591 = vmatprep.subr.bf16.mxu0 %v6029_v26 }
 0x30b   : > { %5593 = vmatpush1.bf16.msra.mxu0 %v6259_v11 }
 0x30c   : > { %5594 = vmatprep.subr.bf16.mxu0 %v6029_v26 }
 0x30f   : > { %5596 = vmatpush1.bf16.msra.mxu0 %v6267_v18 }
 0x310   : > { %5597 = vmatprep.subr.bf16.mxu0 %v6029_v26 }
 0x313   : > { %5599 = vmatpush1.bf16.msra.mxu0 %v6275_v25 }
 0x314   : > { %5600 = vmatprep.subr.bf16.mxu0 %v6029_v26 }
 0x317   : > { %5602 = vmatpush1.bf16.msra.mxu0 %v6283_v34 }
 0x318   : > { %5603 = vmatprep.subr.bf16.mxu0 %v6029_v26 }
 0x31b   : > { %5605 = vmatpush1.bf16.msra.mxu0 %v6291_v42 }
 0x31c   : > { %5606 = vmatprep.subr.bf16.mxu0 %v6029_v26 }
 0x31f   : > { %5609 = vmatpush1.bf16.msk.msra.mxu0 %vm6143_vm2, %v6301_v48 }
 0x320   : > { %5650 = vmatprep.subr.bf16.mxu0 %v6029_v26 }
 0x322   : > { %1433 = vmatmul.mubr.f32.vlgmr.msra.gmra.mrb[30].mxu0 %v4576_v49  ;;  %v4617_v49 = vld [vmem:[%s7437_s4 + $0x80] sm:$0xff] }
 0x323   : > { %4588 = vmatprep.mubr.msk.f32.mxu0 %vm666_vm4, %v4579_v50  ;;  %v4618_v50 = vld [vmem:[%s7437_s4 + $0x88] sm:$0xff] }
 0x326   : > { %1438 = vmatmul.mubr.f32.gmra.mrb[32].mxu0 %v4578_v51  ;;  %v4619_v51 = vld [vmem:[%s7437_s4 + $0x90] sm:$0xff] }
 0x327   : > { %4589 = vmatprep.mubr.msk.f32.mxu0 %vm666_vm4, %v4581_v52  ;;  %v5651_v52 = vpack.c.bf16 %v4618_v50, %v4617_v49 }
 0x329   : > { %5652 = vmatpush3.bf16.msra.mxu0 %v5651_v52 }
 0x32a   : > { %1443 = vmatmul.mubr.f32.gmra.mrb[34].mxu0 %v4580_v54  ;;  %v4620_v54 = vld [vmem:[%s7437_s4 + $0x98] sm:$0xff]  ;;  %5653 = vmatprep.subr.bf16.mxu0 %v6029_v26 }
 0x32b   : > { %4590 = vmatprep.mubr.msk.f32.mxu0 %vm666_vm4, %v4583_v55  ;;  %v5654_v55 = vpack.c.bf16 %v4620_v54, %v4619_v51 }
 0x32d   : > { %5655 = vmatpush3.bf16.msra.mxu0 %v5654_v55 }
 0x32e   : > { %1448 = vmatmul.mubr.f32.gmra.mrb[36].mxu0 %v4582_v56  ;;  %5656 = vmatprep.subr.bf16.mxu0 %v6029_v26 }
 0x32f   : > { %4591 = vmatprep.mubr.msk.f32.mxu0 %vm666_vm4, %v4585_v57 }
 0x332   : > { %1453 = vmatmul.mubr.f32.gmra.mrb[38].mxu0 %v4584_v58 }
 0x333   : > { %5150 = vmatprep.mubr.msk.f32.mxu0 %vm6030_vm5, %v6031_v19 }
 0x3c9   : > { %v1313_v2 = vpop.f32.mrb[20].mxu0 }
 0x3ca   : > { %v6604_v6 = vadd.f32 %v1313_v2, %v6505_v5  ;;  %v5106_v7 = vpop.f32.mrb[21].mxu0 }
 0x3cd   : > { %v1318_v8 = vpop.f32.mrb[22].mxu0 }
 0x3ce   : > { %v6607_v9 = vadd.f32 %v1318_v8, %v6507_v12  ;;  %v5109_v10 = vpop.f32.mrb[23].mxu0 }
 0x3d1   : > { %v1323_v13 = vpop.f32.mrb[24].mxu0 }
 0x3d2   : > { %v6610_v14 = vadd.f32 %v1323_v13, %v6509_v17  ;;  %v5112_v15 = vpop.f32.mrb[25].mxu0 }
 0x3d5   : > { %v1328_v16 = vpop.f32.mrb[26].mxu0 }
 0x3d6   : > { %v6613_v20 = vadd.f32 %v1328_v16, %v6511_v24  ;;  %v5115_v21 = vpop.f32.mrb[27].mxu0 }
 0x3d9   : > { %v1333_v22 = vpop.f32.mrb[28].mxu0 }
 0x3da   : > { %v6616_v5 = vadd.f32 %v1333_v22, %v6513_v32  ;;  %v5118_v23 = vpop.f32.mrb[29].mxu0 }
 0x3db   : > { %v4627_v23 = vld [vmem:[%s7436_s3 + $0x198] sm:$0xff] }
 0x3f5   : > { %v1434_v27 = vpop.f32.mrb[30].mxu0 }
 0x3f6   : > { %v1436_v28 = vpop.f32.mrb[31].mxu0  ;;  %5128 = vmatmul.mubr.msk.f32.vlgmr.msra.gmra.mrb[52].mxu1 %vm900_vm6, %v1434_v27 }
 0x3f7   : > { %5618 = vmatpush1.bf16.msra.mxu1 %v6219_v39  ;;  %5130 = vmatprep.mubr.msk.f32.mxu1 %vm6030_vm5, %v6031_v19 }
 0x3f8   : > { %5619 = vmatprep.subr.bf16.mxu1 %v6029_v26 }
 0x3f9   : > { %v1439_v12 = vpop.f32.mrb[32].mxu0 }
 0x3fa   : > { %5131 = vmatmul.mubr.msk.f32.gmra.mrb[54].mxu1 %vm900_vm6, %v1439_v12  ;;  %v1441_v17 = vpop.f32.mrb[33].mxu0  ;;  %v4626_v12 = vld [vmem:[%s7436_s3 + $0x190] sm:$0xff] }
 0x3fb   : > { %5621 = vmatpush1.bf16.msra.mxu1 %v6227_v46  ;;  %5133 = vmatprep.mubr.msk.f32.mxu1 %vm6030_vm5, %v6031_v19  ;;  %v4629_v17 = vld [vmem:[%s7436_s3 + $0x1a8] sm:$0xff] }
 0x3fc   : > { %5622 = vmatprep.subr.bf16.mxu1 %v6029_v26 }
 0x3fd   : > { %v1444_v24 = vpop.f32.mrb[34].mxu0 }
 0x3fe   : > { %5134 = vmatmul.mubr.msk.f32.gmra.mrb[56].mxu1 %vm900_vm6, %v1444_v24  ;;  %v1446_v30 = vpop.f32.mrb[35].mxu0  ;;  %v4628_v24 = vld [vmem:[%s7436_s3 + $0x1a0] sm:$0xff] }
 0x3ff   : > { %5624 = vmatpush1.bf16.msra.mxu1 %v6235_v53  ;;  %5136 = vmatprep.mubr.msk.f32.mxu1 %vm6030_vm5, %v6031_v19  ;;  %v4631_v30 = vld [vmem:[%s7436_s3 + $0x1b8] sm:$0xff] }
 0x400   : > { %5625 = vmatprep.subr.bf16.mxu1 %v6029_v26 }
 0x401   : > { %v1449_v31 = vpop.f32.mrb[36].mxu0 }
 0x402   : > { %5137 = vmatmul.mubr.msk.f32.gmra.mrb[58].mxu1 %vm900_vm6, %v1449_v31  ;;  %v1451_v32 = vpop.f32.mrb[37].mxu0  ;;  %v4630_v31 = vld [vmem:[%s7436_s3 + $0x1b0] sm:$0xff] }
 0x403   : > { %5627 = vmatpush1.bf16.msra.mxu1 %v6243_v60  ;;  %5139 = vmatprep.mubr.msk.f32.mxu1 %vm6030_vm5, %v6031_v19  ;;  %v4633_v32 = vld [vmem:[%s7436_s3 + $0x1c8] sm:$0xff] }
 0x404   : > { %5628 = vmatprep.subr.bf16.mxu1 %v6029_v26 }
 0x405   : > { %v1454_v35 = vpop.f32.mrb[38].mxu0 }
 0x406   : > { %5140 = vmatmul.mubr.msk.f32.gmra.mrb[60].mxu1 %vm900_vm6, %v1454_v35  ;;  %v1456_v36 = vpop.f32.mrb[39].mxu0  ;;  %v4635_v35 = vld [vmem:[%s7436_s3 + $0x1d8] sm:$0xf] }
 0x407   : > { %5630 = vmatpush1.bf16.msra.mxu1 %v6251_v4  ;;  %4612 = vmatprep.mubr.msk.f32.mxu1 %vm666_vm4, %v4602_v33  ;;  %v4632_v33 = vld [vmem:[%s7436_s3 + $0x1c0] sm:$0xff]  ;;  %v4634_v36 = vld [vmem:[%s7436_s3 + $0x1d0] sm:$0xf] }
 0x408   : > { %5631 = vmatprep.subr.bf16.mxu1 %v6029_v26 }
 0x40b   : > { %5633 = vmatpush1.bf16.msra.mxu1 %v6259_v11 }
 0x40c   : > { %5634 = vmatprep.subr.bf16.mxu1 %v6029_v26 }
 0x40f   : > { %5636 = vmatpush1.bf16.msra.mxu1 %v6267_v18 }
 0x410   : > { %5637 = vmatprep.subr.bf16.mxu1 %v6029_v26 }
 0x413   : > { %5639 = vmatpush1.bf16.msra.mxu1 %v6275_v25 }
 0x414   : > { %5640 = vmatprep.subr.bf16.mxu1 %v6029_v26 }
 0x417   : > { %5642 = vmatpush1.bf16.msra.mxu1 %v6283_v34 }
 0x418   : > { %5643 = vmatprep.subr.bf16.mxu1 %v6029_v26 }
 0x41b   : > { %5645 = vmatpush1.bf16.msra.mxu1 %v6291_v42 }
 0x41c   : > { %5646 = vmatprep.subr.bf16.mxu1 %v6029_v26 }
 0x41f   : > { %5649 = vmatpush1.bf16.msk.msra.mxu1 %vm6143_vm2, %v6301_v48 }
 0x420   : > { %5690 = vmatprep.subr.bf16.mxu1 %v6029_v26 }
 0x422   : > { %1664 = vmatmul.mubr.f32.vlgmr.msra.gmra.mrb[62].mxu1 %v4601_v37  ;;  %v4642_v37 = vld [vmem:[%s7437_s4 + $0xa0] sm:$0xff] }
 0x423   : > { %4613 = vmatprep.mubr.msk.f32.mxu1 %vm666_vm4, %v4604_v38  ;;  %v4643_v38 = vld [vmem:[%s7437_s4 + $0xa8] sm:$0xff] }
 0x426   : > { %1669 = vmatmul.mubr.f32.gmra.mrb[64].mxu1 %v4603_v40  ;;  %v4644_v40 = vld [vmem:[%s7437_s4 + $0xb0] sm:$0xff] }
 0x427   : > { %4614 = vmatprep.mubr.msk.f32.mxu1 %vm666_vm4, %v4606_v41  ;;  %v5691_v41 = vpack.c.bf16 %v4643_v38, %v4642_v37 }
 0x429   : > { %5692 = vmatpush3.bf16.msra.mxu1 %v5691_v41 }
 0x42a   : > { %1674 = vmatmul.mubr.f32.gmra.mrb[66].mxu1 %v4605_v43  ;;  %v4645_v43 = vld [vmem:[%s7437_s4 + $0xb8] sm:$0xff]  ;;  %5693 = vmatprep.subr.bf16.mxu1 %v6029_v26 }
 0x42b   : > { %4615 = vmatprep.mubr.msk.f32.mxu1 %vm666_vm4, %v4608_v44  ;;  %v5694_v44 = vpack.c.bf16 %v4645_v43, %v4644_v40 }
 0x42d   : > { %5695 = vmatpush3.bf16.msra.mxu1 %v5694_v44 }
 0x42e   : > { %1679 = vmatmul.mubr.f32.gmra.mrb[68].mxu1 %v4607_v45  ;;  %5696 = vmatprep.subr.bf16.mxu1 %v6029_v26 }
 0x42f   : > { %4616 = vmatprep.mubr.msk.f32.mxu1 %vm666_vm4, %v4610_v47 }
 0x432   : > { %1684 = vmatmul.mubr.f32.gmra.mrb[70].mxu1 %v4609_v29 }
 0x433   : > { %5173 = vmatprep.mubr.msk.f32.mxu1 %vm6030_vm5, %v6031_v19 }
 0x4c9   : > { %v1544_v56 = vpop.f32.mrb[52].mxu1 }
 0x4ca   : > { %v6707_v57 = vadd.f32 %v1544_v56, %v6604_v6  ;;  %v5129_v58 = vpop.f32.mrb[53].mxu1 }
 0x4cd   : > { %v1549_v59 = vpop.f32.mrb[54].mxu1 }
 0x4ce   : > { %v6710_v61 = vadd.f32 %v1549_v59, %v6607_v9  ;;  %v5132_v62 = vpop.f32.mrb[55].mxu1 }
 0x4d1   : > { %v1554_v63 = vpop.f32.mrb[56].mxu1 }
 0x4d2   : > { %v6713_v0 = vadd.f32 %v1554_v63, %v6610_v14  ;;  %v5135_v1 = vpop.f32.mrb[57].mxu1 }
 0x4d5   : > { %v1559_v2 = vpop.f32.mrb[58].mxu1 }
 0x4d6   : > { %v6716_v7 = vadd.f32 %v1559_v2, %v6613_v20  ;;  %v5138_v8 = vpop.f32.mrb[59].mxu1 }
 0x4d9   : > { %v1564_v10 = vpop.f32.mrb[60].mxu1 }
 0x4da   : > { %v6719_v6 = vadd.f32 %v1564_v10, %v6616_v5  ;;  %v5141_v13 = vpop.f32.mrb[61].mxu1 }
 0x4db   : > { %v4652_v13 = vld [vmem:[%s7436_s3 + $0x1e8] sm:$0xff] }
 0x4f5   : > { %v1665_v15 = vpop.f32.mrb[62].mxu1 }
 0x4f6   : > { %v1667_v16 = vpop.f32.mrb[63].mxu1  ;;  %5151 = vmatmul.mubr.msk.f32.vlgmr.msra.gmra.mrb[40].mxu0 %vm900_vm6, %v1665_v15 }
 0x4f7   : > { %5658 = vmatpush1.bf16.msra.mxu0 %v6219_v39  ;;  %5153 = vmatprep.mubr.msk.f32.mxu0 %vm6030_vm5, %v6031_v19 }
 0x4f8   : > { %5659 = vmatprep.subr.bf16.mxu0 %v6029_v26 }
 0x4f9   : > { %v1670_v9 = vpop.f32.mrb[64].mxu1 }
 0x4fa   : > { %5154 = vmatmul.mubr.msk.f32.gmra.mrb[42].mxu0 %vm900_vm6, %v1670_v9  ;;  %v1672_v14 = vpop.f32.mrb[65].mxu1  ;;  %v4651_v9 = vld [vmem:[%s7436_s3 + $0x1e0] sm:$0xff] }
 0x4fb   : > { %5661 = vmatpush1.bf16.msra.mxu0 %v6227_v46  ;;  %5156 = vmatprep.mubr.msk.f32.mxu0 %vm6030_vm5, %v6031_v19  ;;  %v4654_v14 = vld [vmem:[%s7436_s3 + $0x1f8] sm:$0xff] }
 0x4fc   : > { %5662 = vmatprep.subr.bf16.mxu0 %v6029_v26 }
 0x4fd   : > { %v1675_v20 = vpop.f32.mrb[66].mxu1 }
 0x4fe   : > { %5157 = vmatmul.mubr.msk.f32.gmra.mrb[44].mxu0 %vm900_vm6, %v1675_v20  ;;  %v1677_v21 = vpop.f32.mrb[67].mxu1  ;;  %v4653_v20 = vld [vmem:[%s7436_s3 + $0x1f0] sm:$0xff] }
 0x4ff   : > { %5664 = vmatpush1.bf16.msra.mxu0 %v6235_v53  ;;  %5159 = vmatprep.mubr.msk.f32.mxu0 %vm6030_vm5, %v6031_v19  ;;  %v4656_v21 = vld [vmem:[%s7436_s3 + $0x208] sm:$0xff] }
 0x500   : > { %5665 = vmatprep.subr.bf16.mxu0 %v6029_v26 }
 0x501   : > { %v1680_v22 = vpop.f32.mrb[68].mxu1 }
 0x502   : > { %5160 = vmatmul.mubr.msk.f32.gmra.mrb[46].mxu0 %vm900_vm6, %v1680_v22  ;;  %v1682_v5 = vpop.f32.mrb[69].mxu1  ;;  %v4655_v22 = vld [vmem:[%s7436_s3 + $0x200] sm:$0xff] }
 0x503   : > { %5667 = vmatpush1.bf16.msra.mxu0 %v6243_v60  ;;  %5162 = vmatprep.mubr.msk.f32.mxu0 %vm6030_vm5, %v6031_v19  ;;  %v4658_v5 = vld [vmem:[%s7436_s3 + $0x218] sm:$0xff] }
 0x504   : > { %5668 = vmatprep.subr.bf16.mxu0 %v6029_v26 }
 0x505   : > { %v1685_v27 = vpop.f32.mrb[70].mxu1 }
 0x506   : > { %5163 = vmatmul.mubr.msk.f32.gmra.mrb[48].mxu0 %vm900_vm6, %v1685_v27  ;;  %v1687_v28 = vpop.f32.mrb[71].mxu1  ;;  %v4660_v27 = vld [vmem:[%s7436_s3 + $0x228] sm:$0xf] }
 0x507   : > { %5670 = vmatpush1.bf16.msra.mxu0 %v6251_v4  ;;  %4637 = vmatprep.mubr.msk.f32.mxu0 %vm666_vm4, %v4627_v23  ;;  %v4657_v23 = vld [vmem:[%s7436_s3 + $0x210] sm:$0xff]  ;;  %v4659_v28 = vld [vmem:[%s7436_s3 + $0x220] sm:$0xf] }
 0x508   : > { %5671 = vmatprep.subr.bf16.mxu0 %v6029_v26 }
 0x50b   : > { %5673 = vmatpush1.bf16.msra.mxu0 %v6259_v11 }
 0x50c   : > { %5674 = vmatprep.subr.bf16.mxu0 %v6029_v26 }
 0x50f   : > { %5676 = vmatpush1.bf16.msra.mxu0 %v6267_v18 }
 0x510   : > { %5677 = vmatprep.subr.bf16.mxu0 %v6029_v26 }
 0x513   : > { %5679 = vmatpush1.bf16.msra.mxu0 %v6275_v25 }
 0x514   : > { %5680 = vmatprep.subr.bf16.mxu0 %v6029_v26 }
 0x517   : > { %5682 = vmatpush1.bf16.msra.mxu0 %v6283_v34 }
 0x518   : > { %5683 = vmatprep.subr.bf16.mxu0 %v6029_v26 }
 0x51b   : > { %5685 = vmatpush1.bf16.msra.mxu0 %v6291_v42 }
 0x51c   : > { %5686 = vmatprep.subr.bf16.mxu0 %v6029_v26 }
 0x51f   : > { %5689 = vmatpush1.bf16.msk.msra.mxu0 %vm6143_vm2, %v6301_v48 }
 0x520   : > { %5730 = vmatprep.subr.bf16.mxu0 %v6029_v26 }
 0x522   : > { %1895 = vmatmul.mubr.f32.vlgmr.msra.gmra.mrb[50].mxu0 %v4626_v12  ;;  %v4667_v12 = vld [vmem:[%s7437_s4 + $0xc0] sm:$0xff] }
 0x523   : > { %4638 = vmatprep.mubr.msk.f32.mxu0 %vm666_vm4, %v4629_v17  ;;  %v4668_v17 = vld [vmem:[%s7437_s4 + $0xc8] sm:$0xff] }
 0x526   : > { %1900 = vmatmul.mubr.f32.gmra.mrb[52].mxu0 %v4628_v24  ;;  %v4669_v24 = vld [vmem:[%s7437_s4 + $0xd0] sm:$0xff] }
 0x527   : > { %4639 = vmatprep.mubr.msk.f32.mxu0 %vm666_vm4, %v4631_v30  ;;  %v5731_v30 = vpack.c.bf16 %v4668_v17, %v4667_v12 }
 0x529   : > { %5732 = vmatpush3.bf16.msra.mxu0 %v5731_v30 }
 0x52a   : > { %1905 = vmatmul.mubr.f32.gmra.mrb[54].mxu0 %v4630_v31  ;;  %v4670_v31 = vld [vmem:[%s7437_s4 + $0xd8] sm:$0xff]  ;;  %5733 = vmatprep.subr.bf16.mxu0 %v6029_v26 }
 0x52b   : > { %4640 = vmatprep.mubr.msk.f32.mxu0 %vm666_vm4, %v4633_v32  ;;  %v5734_v32 = vpack.c.bf16 %v4670_v31, %v4669_v24 }
 0x52d   : > { %5735 = vmatpush3.bf16.msra.mxu0 %v5734_v32 }
 0x52e   : > { %1910 = vmatmul.mubr.f32.gmra.mrb[56].mxu0 %v4632_v33  ;;  %5736 = vmatprep.subr.bf16.mxu0 %v6029_v26 }
 0x52f   : > { %4641 = vmatprep.mubr.msk.f32.mxu0 %vm666_vm4, %v4635_v35 }
 0x532   : > { %1915 = vmatmul.mubr.f32.gmra.mrb[58].mxu0 %v4634_v36 }
 0x533   : > { %5196 = vmatprep.mubr.msk.f32.mxu0 %vm6030_vm5, %v6031_v19 }
 0x5c9   : > { %v1775_v45 = vpop.f32.mrb[40].mxu0 }
 0x5ca   : > { %v6810_v47 = vadd.f32 %v1775_v45, %v6707_v57  ;;  %v5152_v29 = vpop.f32.mrb[41].mxu0 }
 0x5cd   : > { %v1780_v49 = vpop.f32.mrb[42].mxu0 }
 0x5ce   : > { %v6813_v50 = vadd.f32 %v1780_v49, %v6710_v61  ;;  %v5155_v51 = vpop.f32.mrb[43].mxu0 }
 0x5d1   : > { %v1785_v52 = vpop.f32.mrb[44].mxu0 }
 0x5d2   : > { %v6816_v54 = vadd.f32 %v1785_v52, %v6713_v0  ;;  %v5158_v55 = vpop.f32.mrb[45].mxu0 }
 0x5d5   : > { %v1790_v56 = vpop.f32.mrb[46].mxu0 }
 0x5d6   : > { %v6819_v58 = vadd.f32 %v1790_v56, %v6716_v7  ;;  %v5161_v59 = vpop.f32.mrb[47].mxu0 }
 0x5d9   : > { %v1795_v62 = vpop.f32.mrb[48].mxu0 }
 0x5da   : > { %v6822_v57 = vadd.f32 %v1795_v62, %v6719_v6  ;;  %v5164_v63 = vpop.f32.mrb[49].mxu0 }
 0x5db   : > { %v4677_v63 = vld [vmem:[%s7436_s3 + $0x238] sm:$0xff] }
 0x5f5   : > { %v1896_v1 = vpop.f32.mrb[50].mxu0 }
 0x5f6   : > { %v1898_v2 = vpop.f32.mrb[51].mxu0  ;;  %5174 = vmatmul.mubr.msk.f32.vlgmr.msra.gmra.mrb[72].mxu1 %vm900_vm6, %v1896_v1 }
 0x5f7   : > { %5698 = vmatpush1.bf16.msra.mxu1 %v6219_v39  ;;  %5176 = vmatprep.mubr.msk.f32.mxu1 %vm6030_vm5, %v6031_v19 }
 0x5f8   : > { %5699 = vmatprep.subr.bf16.mxu1 %v6029_v26 }
 0x5f9   : > { %v1901_v61 = vpop.f32.mrb[52].mxu0 }
 0x5fa   : > { %5177 = vmatmul.mubr.msk.f32.gmra.mrb[74].mxu1 %vm900_vm6, %v1901_v61  ;;  %v1903_v0 = vpop.f32.mrb[53].mxu0  ;;  %v4676_v61 = vld [vmem:[%s7436_s3 + $0x230] sm:$0xff] }
 0x5fb   : > { %5701 = vmatpush1.bf16.msra.mxu1 %v6227_v46  ;;  %5179 = vmatprep.mubr.msk.f32.mxu1 %vm6030_vm5, %v6031_v19  ;;  %v4679_v0 = vld [vmem:[%s7436_s3 + $0x248] sm:$0xff] }
 0x5fc   : > { %5702 = vmatprep.subr.bf16.mxu1 %v6029_v26 }
 0x5fd   : > { %v1906_v7 = vpop.f32.mrb[54].mxu0 }
 0x5fe   : > { %5180 = vmatmul.mubr.msk.f32.gmra.mrb[76].mxu1 %vm900_vm6, %v1906_v7  ;;  %v1908_v8 = vpop.f32.mrb[55].mxu0  ;;  %v4678_v7 = vld [vmem:[%s7436_s3 + $0x240] sm:$0xff] }
 0x5ff   : > { %5704 = vmatpush1.bf16.msra.mxu1 %v6235_v53  ;;  %5182 = vmatprep.mubr.msk.f32.mxu1 %vm6030_vm5, %v6031_v19  ;;  %v4681_v8 = vld [vmem:[%s7436_s3 + $0x258] sm:$0xff] }
 0x600   : > { %5705 = vmatprep.subr.bf16.mxu1 %v6029_v26 }
 0x601   : > { %v1911_v10 = vpop.f32.mrb[56].mxu0 }
 0x602   : > { %5183 = vmatmul.mubr.msk.f32.gmra.mrb[78].mxu1 %vm900_vm6, %v1911_v10  ;;  %v1913_v6 = vpop.f32.mrb[57].mxu0  ;;  %v4680_v10 = vld [vmem:[%s7436_s3 + $0x250] sm:$0xff] }
 0x603   : > { %5707 = vmatpush1.bf16.msra.mxu1 %v6243_v60  ;;  %5185 = vmatprep.mubr.msk.f32.mxu1 %vm6030_vm5, %v6031_v19  ;;  %v4683_v6 = vld [vmem:[%s7436_s3 + $0x268] sm:$0xff] }
 0x604   : > { %5708 = vmatprep.subr.bf16.mxu1 %v6029_v26 }
 0x605   : > { %v1916_v15 = vpop.f32.mrb[58].mxu0 }
 0x606   : > { %5186 = vmatmul.mubr.msk.f32.gmra.mrb[80].mxu1 %vm900_vm6, %v1916_v15  ;;  %v1918_v16 = vpop.f32.mrb[59].mxu0  ;;  %v4685_v15 = vld [vmem:[%s7436_s3 + $0x278] sm:$0xf] }
 0x607   : > { %5710 = vmatpush1.bf16.msra.mxu1 %v6251_v4  ;;  %4662 = vmatprep.mubr.msk.f32.mxu1 %vm666_vm4, %v4652_v13  ;;  %v4682_v13 = vld [vmem:[%s7436_s3 + $0x260] sm:$0xff]  ;;  %v4684_v16 = vld [vmem:[%s7436_s3 + $0x270] sm:$0xf] }
 0x608   : > { %5711 = vmatprep.subr.bf16.mxu1 %v6029_v26 }
 0x60b   : > { %5713 = vmatpush1.bf16.msra.mxu1 %v6259_v11 }
 0x60c   : > { %5714 = vmatprep.subr.bf16.mxu1 %v6029_v26 }
 0x60f   : > { %5716 = vmatpush1.bf16.msra.mxu1 %v6267_v18 }
 0x610   : > { %5717 = vmatprep.subr.bf16.mxu1 %v6029_v26 }
 0x613   : > { %5719 = vmatpush1.bf16.msra.mxu1 %v6275_v25 }
 0x614   : > { %5720 = vmatprep.subr.bf16.mxu1 %v6029_v26 }
 0x617   : > { %5722 = vmatpush1.bf16.msra.mxu1 %v6283_v34 }
 0x618   : > { %5723 = vmatprep.subr.bf16.mxu1 %v6029_v26 }
 0x61b   : > { %5725 = vmatpush1.bf16.msra.mxu1 %v6291_v42 }
 0x61c   : > { %5726 = vmatprep.subr.bf16.mxu1 %v6029_v26 }
 0x61f   : > { %5729 = vmatpush1.bf16.msk.msra.mxu1 %vm6143_vm2, %v6301_v48 }
 0x620   : > { %5770 = vmatprep.subr.bf16.mxu1 %v6029_v26 }
 0x622   : > { %2126 = vmatmul.mubr.f32.vlgmr.msra.gmra.mrb[82].mxu1 %v4651_v9  ;;  %v4692_v9 = vld [vmem:[%s7437_s4 + $0xe0] sm:$0xff] }
 0x623   : > { %4663 = vmatprep.mubr.msk.f32.mxu1 %vm666_vm4, %v4654_v14  ;;  %v4693_v14 = vld [vmem:[%s7437_s4 + $0xe8] sm:$0xff] }
 0x626   : > { %2131 = vmatmul.mubr.f32.gmra.mrb[84].mxu1 %v4653_v20  ;;  %v4694_v20 = vld [vmem:[%s7437_s4 + $0xf0] sm:$0xff] }
 0x627   : > { %4664 = vmatprep.mubr.msk.f32.mxu1 %vm666_vm4, %v4656_v21  ;;  %v5771_v21 = vpack.c.bf16 %v4693_v14, %v4692_v9  ;;  %v2745_v9 = vld [vmem:[%s7439_s6] sm:$0xff]  ;;  %v2746_v14 = vld [vmem:[%s7439_s6 + $0x8] sm:$0xff] }
 0x629   : > { %5772 = vmatpush3.bf16.msra.mxu1 %v5771_v21  ;;  %v2747_v21 = vld [vmem:[%s7439_s6 + $0x10] sm:$0xff] }
 0x62a   : > { %2136 = vmatmul.mubr.f32.gmra.mrb[86].mxu1 %v4655_v22  ;;  %v4695_v22 = vld [vmem:[%s7437_s4 + $0xf8] sm:$0xff]  ;;  %5773 = vmatprep.subr.bf16.mxu1 %v6029_v26 }
 0x62b   : > { %4665 = vmatprep.mubr.msk.f32.mxu1 %vm666_vm4, %v4658_v5  ;;  %v5774_v5 = vpack.c.bf16 %v4695_v22, %v4694_v20  ;;  %v5817_v20 = vpack.c.bf16 %v2746_v14, %v2745_v9  ;;  %v2748_v22 = vld [vmem:[%s7439_s6 + $0x18] sm:$0xff]  ;;  %v4745_v9 = vld [vmem:[%s7440_s7 + $0x20] sm:$0xff]  ;;  %v4746_v14 = vld [vmem:[%s7440_s7 + $0x28] sm:$0xff] }
 0x62d   : > { %5775 = vmatpush3.bf16.msra.mxu1 %v5774_v5 }
 0x62e   : > { %2141 = vmatmul.mubr.f32.gmra.mrb[88].mxu1 %v4657_v23  ;;  %5776 = vmatprep.subr.bf16.mxu1 %v6029_v26 }
 0x62f   : > { %4666 = vmatprep.mubr.msk.f32.mxu1 %vm666_vm4, %v4660_v27 }
 0x632   : > { %2146 = vmatmul.mubr.f32.gmra.mrb[90].mxu1 %v4659_v28 }
 0x633   : > { %5219 = vmatprep.mubr.msk.f32.mxu1 %vm6030_vm5, %v6031_v19 }
 0x6c9   : > { %v2006_v33 = vpop.f32.mrb[72].mxu1 }
 0x6ca   : > { %v6913_v35 = vadd.f32 %v2006_v33, %v6810_v47  ;;  %v5175_v36 = vpop.f32.mrb[73].mxu1 }
 0x6cd   : > { %v2011_v37 = vpop.f32.mrb[74].mxu1 }
 0x6ce   : > { %v6916_v38 = vadd.f32 %v2011_v37, %v6813_v50  ;;  %v5178_v40 = vpop.f32.mrb[75].mxu1 }
 0x6d1   : > { %v2016_v41 = vpop.f32.mrb[76].mxu1 }
 0x6d2   : > { %v6919_v43 = vadd.f32 %v2016_v41, %v6816_v54  ;;  %v5181_v44 = vpop.f32.mrb[77].mxu1 }
 0x6d5   : > { %v2021_v45 = vpop.f32.mrb[78].mxu1 }
 0x6d6   : > { %v6922_v29 = vadd.f32 %v2021_v45, %v6819_v58  ;;  %v5184_v49 = vpop.f32.mrb[79].mxu1 }
 0x6d9   : > { %v2026_v51 = vpop.f32.mrb[80].mxu1 }
 0x6da   : > { %v6925_v47 = vadd.f32 %v2026_v51, %v6822_v57  ;;  %v5187_v52 = vpop.f32.mrb[81].mxu1 }
 0x6db   : > { %v4717_v52 = vld [vmem:[%s7437_s4 + $0x100] sm:$0xff] }
 0x6f5   : > { %v2127_v55 = vpop.f32.mrb[82].mxu1 }
 0x6f6   : > { %v2129_v56 = vpop.f32.mrb[83].mxu1  ;;  %5197 = vmatmul.mubr.msk.f32.vlgmr.msra.gmra.mrb[60].mxu0 %vm900_vm6, %v2127_v55  ;;  %v4718_v55 = vld [vmem:[%s7437_s4 + $0x108] sm:$0xff] }
 0x6f7   : > { %5738 = vmatpush1.bf16.msra.mxu0 %v6219_v39  ;;  %5199 = vmatprep.mubr.msk.f32.mxu0 %vm6030_vm5, %v6031_v19  ;;  %v4719_v56 = vld [vmem:[%s7437_s4 + $0x110] sm:$0xff] }
 0x6f8   : > { %5739 = vmatprep.subr.bf16.mxu0 %v6029_v26 }
 0x6f9   : > { %v2132_v50 = vpop.f32.mrb[84].mxu1 }
 0x6fa   : > { %5200 = vmatmul.mubr.msk.f32.gmra.mrb[62].mxu0 %vm900_vm6, %v2132_v50  ;;  %v2134_v54 = vpop.f32.mrb[85].mxu1  ;;  %v5811_v50 = vpack.c.bf16 %v4718_v55, %v4717_v52 }
 0x6fb   : > { %5741 = vmatpush1.bf16.msra.mxu0 %v6227_v46  ;;  %5202 = vmatprep.mubr.msk.f32.mxu0 %vm6030_vm5, %v6031_v19  ;;  %v4720_v54 = vld [vmem:[%s7437_s4 + $0x118] sm:$0xff] }
 0x6fc   : > { %5742 = vmatprep.subr.bf16.mxu0 %v6029_v26 }
 0x6fd   : > { %v2137_v58 = vpop.f32.mrb[86].mxu1 }
 0x6fe   : > { %5203 = vmatmul.mubr.msk.f32.gmra.mrb[64].mxu0 %vm900_vm6, %v2137_v58  ;;  %v2139_v59 = vpop.f32.mrb[87].mxu1  ;;  %v5814_v58 = vpack.c.bf16 %v4720_v54, %v4719_v56 }
 0x6ff   : > { %5744 = vmatpush1.bf16.msra.mxu0 %v6235_v53  ;;  %5205 = vmatprep.mubr.msk.f32.mxu0 %vm6030_vm5, %v6031_v19 }
 0x700   : > { %5745 = vmatprep.subr.bf16.mxu0 %v6029_v26 }
 0x701   : > { %v2142_v62 = vpop.f32.mrb[88].mxu1 }
 0x702   : > { %5206 = vmatmul.mubr.msk.f32.gmra.mrb[66].mxu0 %vm900_vm6, %v2142_v62  ;;  %v2144_v57 = vpop.f32.mrb[89].mxu1 }
 0x703   : > { %5747 = vmatpush1.bf16.msra.mxu0 %v6243_v60  ;;  %5208 = vmatprep.mubr.msk.f32.mxu0 %vm6030_vm5, %v6031_v19 }
 0x704   : > { %5748 = vmatprep.subr.bf16.mxu0 %v6029_v26 }
 0x705   : > { %v2147_v1 = vpop.f32.mrb[90].mxu1 }
 0x706   : > { %5209 = vmatmul.mubr.msk.f32.gmra.mrb[68].mxu0 %vm900_vm6, %v2147_v1  ;;  %v2149_v2 = vpop.f32.mrb[91].mxu1 }
 0x707   : > { %5750 = vmatpush1.bf16.msra.mxu0 %v6251_v4  ;;  %4687 = vmatprep.mubr.msk.f32.mxu0 %vm666_vm4, %v4677_v63 }
 0x708   : > { %5751 = vmatprep.subr.bf16.mxu0 %v6029_v26 }
 0x70b   : > { %5753 = vmatpush1.bf16.msra.mxu0 %v6259_v11 }
 0x70c   : > { %5754 = vmatprep.subr.bf16.mxu0 %v6029_v26 }
 0x70f   : > { %5756 = vmatpush1.bf16.msra.mxu0 %v6267_v18 }
 0x710   : > { %5757 = vmatprep.subr.bf16.mxu0 %v6029_v26 }
 0x713   : > { %5759 = vmatpush1.bf16.msra.mxu0 %v6275_v25 }
 0x714   : > { %5760 = vmatprep.subr.bf16.mxu0 %v6029_v26 }
 0x717   : > { %5762 = vmatpush1.bf16.msra.mxu0 %v6283_v34 }
 0x718   : > { %5763 = vmatprep.subr.bf16.mxu0 %v6029_v26 }
 0x71b   : > { %5765 = vmatpush1.bf16.msra.mxu0 %v6291_v42 }
 0x71c   : > { %5766 = vmatprep.subr.bf16.mxu0 %v6029_v26 }
 0x71f   : > { %5769 = vmatpush1.bf16.msk.msra.mxu0 %vm6143_vm2, %v6301_v48 }
 0x720   : > { %5810 = vmatprep.subr.bf16.mxu0 %v6029_v26 }
 0x722   : > { %2357 = vmatmul.mubr.f32.vlgmr.msra.gmra.mrb[70].mxu0 %v4676_v61 }
 0x723   : > { %4688 = vmatprep.mubr.msk.f32.mxu0 %vm666_vm4, %v4679_v0  ;;  %5812 = vmatpush3.bf16.msra.mxu0 %v5811_v50 }
 0x724   : > { %5813 = vmatprep.subr.bf16.mxu0 %v6029_v26 }
 0x726   : > { %2362 = vmatmul.mubr.f32.gmra.mrb[72].mxu0 %v4678_v7 }
 0x727   : > { %4689 = vmatprep.mubr.msk.f32.mxu0 %vm666_vm4, %v4681_v8  ;;  %5815 = vmatpush3.bf16.msra.mxu0 %v5814_v58 }
 0x728   : > { %5816 = vmatprep.subr.bf16.mxu0 %v6029_v26 }
 0x72a   : > { %2367 = vmatmul.mubr.f32.gmra.mrb[74].mxu0 %v4680_v10 }
 0x72b   : > { %4690 = vmatprep.mubr.msk.f32.mxu0 %vm666_vm4, %v4683_v6 }
 0x72e   : > { %2372 = vmatmul.mubr.f32.gmra.mrb[76].mxu0 %v4682_v13 }
 0x72f   : > { %4691 = vmatprep.mubr.msk.f32.mxu0 %vm666_vm4, %v4685_v15 }
 0x732   : > { %2377 = vmatmul.mubr.f32.gmra.mrb[78].mxu0 %v4684_v16 }
 0x733   : > { %5242 = vmatprep.mubr.msk.f32.mxu0 %vm6030_vm5, %v6031_v19 }
 0x7c9   : > { %v2237_v23 = vpop.f32.mrb[60].mxu0 }
 0x7ca   : > { %v7016_v27 = vadd.f32 %v2237_v23, %v6913_v35  ;;  %v5198_v28 = vpop.f32.mrb[61].mxu0 }
 0x7cd   : > { %v2242_v12 = vpop.f32.mrb[62].mxu0 }
 0x7ce   : > { %v7019_v17 = vadd.f32 %v2242_v12, %v6916_v38  ;;  %v5201_v24 = vpop.f32.mrb[63].mxu0 }
 0x7d1   : > { %v2247_v30 = vpop.f32.mrb[64].mxu0 }
 0x7d2   : > { %v7022_v31 = vadd.f32 %v2247_v30, %v6919_v43  ;;  %v5204_v32 = vpop.f32.mrb[65].mxu0 }
 0x7d5   : > { %v2252_v33 = vpop.f32.mrb[66].mxu0 }
 0x7d6   : > { %v7025_v36 = vadd.f32 %v2252_v33, %v6922_v29  ;;  %v5207_v37 = vpop.f32.mrb[67].mxu0 }
 0x7d7   : > { %v2750_v37 = vld [vmem:[%s7439_s6 + $0x28] sm:$0xff] }
 0x7d9   : > { %v2257_v40 = vpop.f32.mrb[68].mxu0 }
 0x7da   : > { %v7028_v35 = vadd.f32 %v2257_v40, %v6925_v47  ;;  %v5210_v41 = vpop.f32.mrb[69].mxu0 }
 0x7db   : > { %v2752_v41 = vld [vmem:[%s7439_s6 + $0x38] sm:$0xff] }
 0x7f5   : > { %v2358_v44 = vpop.f32.mrb[70].mxu0 }
 0x7f6   : > { %v2360_v45 = vpop.f32.mrb[71].mxu0  ;;  %5220 = vmatmul.mubr.msk.f32.vlgmr.msra.gmra.mrb[92].mxu1 %vm900_vm6, %v2358_v44 }
 0x7f7   : > { %5778 = vmatpush1.bf16.msra.mxu1 %v6219_v39  ;;  %5222 = vmatprep.mubr.msk.f32.mxu1 %vm6030_vm5, %v6031_v19 }
 0x7f8   : > { %5779 = vmatprep.subr.bf16.mxu1 %v6029_v26 }
 0x7f9   : > { %v2363_v38 = vpop.f32.mrb[72].mxu0 }
 0x7fa   : > { %5223 = vmatmul.mubr.msk.f32.gmra.mrb[94].mxu1 %vm900_vm6, %v2363_v38  ;;  %v2365_v43 = vpop.f32.mrb[73].mxu0  ;;  %v4726_v38 = vld [vmem:[%s7438_s5] ss:$0 sm:$0xff] }
 0x7fb   : > { %5781 = vmatpush1.bf16.msra.mxu1 %v6227_v46  ;;  %5225 = vmatprep.mubr.msk.f32.mxu1 %vm6030_vm5, %v6031_v19 }
 0x7fc   : > { %5782 = vmatprep.subr.bf16.mxu1 %v6029_v26 }
 0x7fd   : > { %v2368_v29 = vpop.f32.mrb[74].mxu0 }
 0x7fe   : > { %5226 = vmatmul.mubr.msk.f32.gmra.mrb[96].mxu1 %vm900_vm6, %v2368_v29  ;;  %v2370_v39 = vpop.f32.mrb[75].mxu0 }
 0x7ff   : > { %5784 = vmatpush1.bf16.msra.mxu1 %v6235_v53  ;;  %5228 = vmatprep.mubr.msk.f32.mxu1 %vm6030_vm5, %v6031_v19  ;;  %v4702_v53 = vld [vmem:[%s7436_s3 + $0x288] sm:$0xff] }
 0x800   : > { %5785 = vmatprep.subr.bf16.mxu1 %v6029_v26 }
 0x801   : > { %v2373_v49 = vpop.f32.mrb[76].mxu0 }
 0x802   : > { %5229 = vmatmul.mubr.msk.f32.gmra.mrb[98].mxu1 %vm900_vm6, %v2373_v49  ;;  %v2375_v46 = vpop.f32.mrb[77].mxu0 }
 0x803   : > { %5787 = vmatpush1.bf16.msra.mxu1 %v6243_v60  ;;  %5231 = vmatprep.mubr.msk.f32.mxu1 %vm6030_vm5, %v6031_v19  ;;  %v4701_v60 = vld [vmem:[%s7436_s3 + $0x280] sm:$0xff] }
 0x804   : > { %5788 = vmatprep.subr.bf16.mxu1 %v6029_v26 }
 0x805   : > { %v2378_v51 = vpop.f32.mrb[78].mxu0 }
 0x806   : > { %5232 = vmatmul.mubr.msk.f32.gmra.mrb[100].mxu1 %vm900_vm6, %v2378_v51  ;;  %v2380_v47 = vpop.f32.mrb[79].mxu0 }
 0x807   : > { %5790 = vmatpush1.bf16.msra.mxu1 %v6251_v4  ;;  %4712 = vmatprep.mubr.msk.f32.mxu1 %vm666_vm4, %v4702_v53  ;;  %v4704_v4 = vld [vmem:[%s7436_s3 + $0x298] sm:$0xff] }
 0x808   : > { %5791 = vmatprep.subr.bf16.mxu1 %v6029_v26 }
 0x80b   : > { %5793 = vmatpush1.bf16.msra.mxu1 %v6259_v11  ;;  %v4703_v11 = vld [vmem:[%s7436_s3 + $0x290] sm:$0xff] }
 0x80c   : > { %5794 = vmatprep.subr.bf16.mxu1 %v6029_v26 }
 0x80f   : > { %5796 = vmatpush1.bf16.msra.mxu1 %v6267_v18  ;;  %v4705_v18 = vld [vmem:[%s7436_s3 + $0x2a0] sm:$0xff] }
 0x810   : > { %5797 = vmatprep.subr.bf16.mxu1 %v6029_v26 }
 0x813   : > { %5799 = vmatpush1.bf16.msra.mxu1 %v6275_v25  ;;  %v4708_v25 = vld [vmem:[%s7436_s3 + $0x2b8] sm:$0xff] }
 0x814   : > { %5800 = vmatprep.subr.bf16.mxu1 %v6029_v26 }
 0x817   : > { %5802 = vmatpush1.bf16.msra.mxu1 %v6283_v34  ;;  %v4707_v34 = vld [vmem:[%s7436_s3 + $0x2b0] sm:$0xff] }
 0x818   : > { %5803 = vmatprep.subr.bf16.mxu1 %v6029_v26 }
 0x81b   : > { %5805 = vmatpush1.bf16.msra.mxu1 %v6291_v42  ;;  %v4710_v42 = vld [vmem:[%s7436_s3 + $0x2c8] sm:$0xf] }
 0x81c   : > { %5806 = vmatprep.subr.bf16.mxu1 %v6029_v26 }
 0x81f   : > { %5809 = vmatpush1.bf16.msk.msra.mxu1 %vm6143_vm2, %v6301_v48  ;;  %v4709_v48 = vld [vmem:[%s7436_s3 + $0x2c0] sm:$0xf] }
 0x822   : > { %2588 = vmatmul.mubr.f32.vlgmr.msra.gmra.mrb[102].mxu1 %v4701_v60 }
 0x823   : > { %4713 = vmatprep.mubr.msk.f32.mxu1 %vm666_vm4, %v4704_v4 }
 0x826   : > { %2593 = vmatmul.mubr.f32.gmra.mrb[104].mxu1 %v4703_v11 }
 0x827   : > { %4714 = vmatprep.mubr.msk.f32.mxu1 %vm666_vm4, %v4706_v3 }
 0x82a   : > { %2598 = vmatmul.mubr.f32.gmra.mrb[106].mxu1 %v4705_v18 }
 0x82b   : > { %4715 = vmatprep.mubr.msk.f32.mxu1 %vm666_vm4, %v4708_v25 }
 0x82e   : > { %2603 = vmatmul.mubr.f32.gmra.mrb[108].mxu1 %v4707_v34 }
 0x82f   : > { %4716 = vmatprep.mubr.msk.f32.mxu1 %vm666_vm4, %v4710_v42 }
 0x832   : > { %2608 = vmatmul.mubr.f32.gmra.mrb[110].mxu1 %v4709_v48 }
 0x8c9   : > { %v2468_v59 = vpop.f32.mrb[92].mxu1 }
 0x8ca   : > { %v2492_v62 = vadd.f32 %v2468_v59, %v7016_v27  ;;  %v5221_v57 = vpop.f32.mrb[93].mxu1  ;;  %v5820_v27 = vpack.c.bf16 %v2748_v22, %v2747_v21  ;;  %v4735_v59 = vld [vmem:[%s7440_s7 + $0x10] sm:$0xff]  ;;  %v4754_v21 = vld [vmem:[%s7440_s7 + $0x38] sm:$0xff] }
 0x8cb   : > { %5311 = vmatprep.mubr.msk.f32.mxu1 %vm2861_vm8, %v4735_v59  ;;  %v4769_v22 = vld [vmem:[%s7440_s7 + $0x50] sm:$0xff] }
 0x8cd   : > { %v2473_v63 = vpop.f32.mrb[94].mxu1 }
 0x8ce   : > { %v2493_v1 = vadd.f32 %v2473_v63, %v7019_v17  ;;  %v5224_v2 = vpop.f32.mrb[95].mxu1 }
 0x8d1   : > { %v2478_v61 = vpop.f32.mrb[96].mxu1 }
 0x8d2   : > { %v2494_v0 = vadd.f32 %v2478_v61, %v7022_v31  ;;  %v5227_v7 = vpop.f32.mrb[97].mxu1 }
 0x8d5   : > { %v2483_v8 = vpop.f32.mrb[98].mxu1 }
 0x8d6   : > { %v7119_v10 = vadd.f32 %v2483_v8, %v7025_v36  ;;  %v5230_v6 = vpop.f32.mrb[99].mxu1  ;;  %v2749_v36 = vld [vmem:[%s7439_s6 + $0x20] sm:$0xff] }
 0x8d7   : > { %v5823_v40 = vpack.c.bf16 %v2750_v37, %v2749_v36  ;;  %v4758_v36 = vld [vmem:[%s7441_s8 + $0x18] sm:$0xff] }
 0x8d9   : > { %v2488_v13 = vpop.f32.mrb[100].mxu1 }
 0x8da   : > { %v7122_v15 = vadd.f32 %v2488_v13, %v7028_v35  ;;  %v5233_v16 = vpop.f32.mrb[101].mxu1  ;;  %v2751_v35 = vld [vmem:[%s7439_s6 + $0x30] sm:$0xff] }
 0x8db   : > { %v5826_v44 = vpack.c.bf16 %v2752_v41, %v2751_v35  ;;  %v2860_v16 = vld [vmem:[%s7440_s7 + $0x8] sm:$0xff]  ;;  %v4761_v41 = vld [vmem:[%s7440_s7 + $0x40] sm:$0xff] }
 0x8f5   : > { %v2589_v5 = vpop.f32.mrb[102].mxu1 }
 0x8f6   : > { %v2591_v23 = vpop.f32.mrb[103].mxu1  ;;  %5243 = vmatmul.mubr.msk.f32.vlgmr.msra.gmra.mrb[80].mxu0 %vm900_vm6, %v2589_v5  ;;  %v4770_v5 = vld [vmem:[%s7440_s7 + $0x58] sm:$0xff] }
 0x8f7   : > { %5245 = vmatprep.mubr.msk.f32.mxu0 %vm6030_vm5, %v6031_v19  ;;  %5818 = vmatpush3.bf16.msra.mxu0 %v5817_v20  ;;  %v4753_v20 = vld [vmem:[%s7440_s7 + $0x30] sm:$0xff]  ;;  %v4777_v23 = vld [vmem:[%s7440_s7 + $0x60] sm:$0xff] }
 0x8f8   : > { %5819 = vmatprep.subr.bf16.mxu0 %v6029_v26 }
 0x8f9   : > { %v2594_v28 = vpop.f32.mrb[104].mxu1 }
 0x8fa   : > { %v2596_v12 = vpop.f32.mrb[105].mxu1  ;;  %5246 = vmatmul.mubr.msk.f32.gmra.mrb[82].mxu0 %vm900_vm6, %v2594_v28  ;;  %v4740_v28 = vld [vmem:[%s7441_s8 + $0x8] sm:$0xff] }
 0x8fb   : > { %5248 = vmatprep.mubr.msk.f32.mxu0 %vm6030_vm5, %v6031_v19  ;;  %5821 = vmatpush3.bf16.msra.mxu0 %v5820_v27  ;;  %v4778_v27 = vld [vmem:[%s7440_s7 + $0x68] sm:$0xff]  ;;  %v2947_v12 = vld [vmem:[%s7441_s8] sm:$0xff] }
 0x8fc   : > { %5822 = vmatprep.subr.bf16.mxu0 %v6029_v26 }
 0x8fd   : > { %v2599_v17 = vpop.f32.mrb[106].mxu1 }
 0x8fe   : > { %v2601_v24 = vpop.f32.mrb[107].mxu1  ;;  %5249 = vmatmul.mubr.msk.f32.gmra.mrb[84].mxu0 %vm900_vm6, %v2599_v17 }
 0x8ff   : > { %5251 = vmatprep.mubr.msk.f32.mxu0 %vm6030_vm5, %v6031_v19  ;;  %5824 = vmatpush3.bf16.msra.mxu0 %v5823_v40 }
 0x900   : > { %5825 = vmatprep.subr.bf16.mxu0 %v6029_v26 }
 0x901   : > { %v2604_v30 = vpop.f32.mrb[108].mxu1 }
 0x902   : > { %v2606_v31 = vpop.f32.mrb[109].mxu1  ;;  %5252 = vmatmul.mubr.msk.f32.gmra.mrb[86].mxu0 %vm900_vm6, %v2604_v30 }
 0x903   : > { %5254 = vmatprep.mubr.msk.f32.mxu0 %vm6030_vm5, %v6031_v19  ;;  %5827 = vmatpush3.bf16.msra.mxu0 %v5826_v44  ;;  %v4762_v44 = vld [vmem:[%s7440_s7 + $0x48] sm:$0xff] }
 0x905   : > { %v2609_v32 = vpop.f32.mrb[110].mxu1 }
 0x906   : > { %5255 = vmatmul.mubr.msk.f32.gmra.mrb[88].mxu0 %vm900_vm6, %v2609_v32  ;;  %v2611_v33 = vpop.f32.mrb[111].mxu1  ;;  %v4750_v32 = vld [vmem:[%s7441_s8 + $0x10] sm:$0xff] }
 0x907   : > { %5273 = vmatprep.mubr.msk.f32.mxu0 %vm6030_vm5, %v6031_v19 }
 0x9c9   : > { %v2699_v45 = vpop.f32.mrb[80].mxu0 }
 0x9ca   : > { %v2723_v43 = vadd.f32 %v2699_v45, %v2492_v62  ;;  %v5244_v29 = vpop.f32.mrb[81].mxu0  ;;  %v2859_v62 = vld [vmem:[%s7440_s7] sm:$0xff] }
 0x9cb   : > { %v4766_v45 = vld [vmem:[%s7441_s8 + $0x20] sm:$0xff] }
 0x9cc   : > { %v2735_v39 = vadd.f32 %v4726_v38, %v2723_v43  ;;  %v4774_v43 = vld [vmem:[%s7441_s8 + $0x28] sm:$0xff] }
 0x9cd   : > { %v2704_v49 = vpop.f32.mrb[82].mxu0 }
 0x9ce   : > { %v2740_v26 = vmax.f32 %v2735_v39, 0.0  ;;  %v2724_v46 = vadd.f32 %v2704_v49, %v2493_v1  ;;  %v5247_v53 = vpop.f32.mrb[83].mxu0 }
 0x9d0   : > { %v2736_v51 = vadd.f32 %v4726_v38, %v2724_v46  ;;  %5274 = vmatmul.mubr.msk.f32.vlgmr.msra.gmra.mrb[90].mxu0 %vm2753_vm7, %v2740_v26  ;;  %v4793_v26 = vld [vmem:[%s7440_s7 + $0x80] sm:$0xff]  ;;  %v4794_v46 = vld [vmem:[%s7440_s7 + $0x88] sm:$0xff] }
 0x9d1   : > { %v2709_v47 = vpop.f32.mrb[84].mxu0  ;;  %5276 = vmatprep.mubr.msk.f32.mxu0 %vm6030_vm5, %v6031_v19 }
 0x9d2   : > { %v2741_v60 = vmax.f32 %v2736_v51, 0.0  ;;  %v2725_v4 = vadd.f32 %v2709_v47, %v2494_v0  ;;  %v5250_v11 = vpop.f32.mrb[85].mxu0  ;;  %v4782_v47 = vld [vmem:[%s7441_s8 + $0x30] sm:$0xff] }
 0x9d3   : > { %v4790_v11 = vld [vmem:[%s7441_s8 + $0x38] sm:$0xff] }
 0x9d4   : > { %v2737_v3 = vadd.f32 %v4726_v38, %v2725_v4  ;;  %5277 = vmatmul.mubr.msk.f32.gmra.mrb[92].mxu0 %vm2753_vm7, %v2741_v60  ;;  %v4785_v60 = vld [vmem:[%s7440_s7 + $0x70] sm:$0xff]  ;;  %v4786_v4 = vld [vmem:[%s7440_s7 + $0x78] sm:$0xff] }
 0x9d5   : > { %v2714_v18 = vpop.f32.mrb[86].mxu0  ;;  %5279 = vmatprep.mubr.msk.f32.mxu0 %vm6030_vm5, %v6031_v19 }
 0x9d6   : > { %v2742_v25 = vmax.f32 %v2737_v3, 0.0  ;;  %v2726_v34 = vadd.f32 %v2714_v18, %v7119_v10  ;;  %v5253_v42 = vpop.f32.mrb[87].mxu0  ;;  %v4798_v18 = vld [vmem:[%s7441_s8 + $0x40] sm:$0xff] }
 0x9d8   : > { %v2738_v48 = vadd.f32 %v4726_v38, %v2726_v34  ;;  %5280 = vmatmul.mubr.msk.f32.gmra.mrb[94].mxu0 %vm2753_vm7, %v2742_v25 }
 0x9d9   : > { %v2719_v52 = vpop.f32.mrb[88].mxu0  ;;  %5282 = vmatprep.mubr.msk.f32.mxu0 %vm6030_vm5, %v6031_v19 }
 0x9da   : > { %v2743_v55 = vmax.f32 %v2738_v48, 0.0  ;;  %v2727_v56 = vadd.f32 %v2719_v52, %v7122_v15  ;;  %v5256_v50 = vpop.f32.mrb[89].mxu0  ;;  %v4736_v15 = vld [vmem:[%s7440_s7 + $0x18] sm:$0xff]  ;;  %v4801_v48 = vld [vmem:[%s7442_s9] ss:$0 sm:$0xff] }
 0x9dc   : > { %v2739_v54 = vadd.f32 %v4726_v38, %v2727_v56  ;;  %5283 = vmatmul.mubr.msk.f32.gmra.mrb[96].mxu0 %vm2753_vm7, %v2743_v55 }
 0x9dd   : > { %5285 = vmatprep.mubr.msk.f32.mxu0 %vm6030_vm5, %v6031_v19 }
 0x9de   : > { %v2744_v58 = vmax.f32 %v2739_v54, 0.0 }
 0x9e0   : > { %5286 = vmatmul.mubr.msk.f32.gmra.mrb[98].mxu0 %vm2753_vm7, %v2744_v58 }
 0x9e1   : > { %5298 = vmatprep.mubr.msk.f32.mxu0 %vm2861_vm8, %v2859_v62 }
 0xaa3   : > { %v2835_v57 = vpop.f32.mrb[90].mxu0 }
 0xaa4   : > { %v5275_v63 = vpop.f32.mrb[91].mxu0 }
 0xaa7   : > { %v2840_v1 = vpop.f32.mrb[92].mxu0 }
 0xaa8   : > { %v7192_v19 = vpack.c.bf16 %v2840_v1, %v2835_v57  ;;  %v5278_v2 = vpop.f32.mrb[93].mxu0 }
 0xaaa   : > { %5829 = vmatprep.subr.bf16.mxu0 %v7192_v19  ;;  %5837 = vmatprep.subr.bf16.mxu1 %v7192_v19 }
 0xaab   : > { %v2845_v61 = vpop.f32.mrb[94].mxu0  ;;  %5831 = vmatpush3.bf16.msra.mxu0 %v7192_v19  ;;  %5839 = vmatpush3.bf16.msra.mxu1 %v7192_v19 }
 0xaac   : > { %v5281_v0 = vpop.f32.mrb[95].mxu0 }
 0xaaf   : > { %v2850_v7 = vpop.f32.mrb[96].mxu0 }
 0xab0   : > { %v7198_v8 = vpack.c.bf16 %v2850_v7, %v2845_v61  ;;  %v5284_v10 = vpop.f32.mrb[97].mxu0 }
 0xab2   : > { %5833 = vmatprep.subr.bf16.mxu0 %v7198_v8  ;;  %5841 = vmatprep.subr.bf16.mxu1 %v7198_v8 }
 0xab3   : > { %v7202_v6 = vpop.f32.mrb[98].mxu0  ;;  %5835 = vmatpush3.bf16.msra.mxu0 %v7198_v8  ;;  %5843 = vmatpush3.bf16.msra.mxu1 %v7198_v8 }
 0xab4   : > { %v5287_v13 = vpop.f32.mrb[99].mxu0  ;;  %5296 = vmatprep.subr.msk.mxu0 %vm2868_vm9, %v7202_v6  ;;  %5309 = vmatprep.subr.msk.mxu1 %vm2868_vm9, %v7202_v6 }
 0xab7   : > { %5297 = vmatpush3.msk.msra.mxu0 %vm2868_vm9, %v7202_v6  ;;  %5310 = vmatpush3.msk.msra.mxu1 %vm2868_vm9, %v7202_v6 }
 0xab8   : > { %5312 = vmatmul.mubr.msk.f32.vlgmr.msra.gmra.mrb[112].mxu1 %vm2861_vm8, %v4736_v15  ;;  %5845 = vmatprep.subr.bf16.mxu1 %v7192_v19 }
 0xab9   : > { %5847 = vmatpush3.bf16.msra.mxu1 %v7192_v19  ;;  %5299 = vmatmul.mubr.msk.f32.vlgmr.msra.gmra.mrb[100].mxu0 %vm2861_vm8, %v2860_v16 }
 0xaba   : > { %5849 = vmatprep.subr.bf16.mxu1 %v7198_v8  ;;  %5334 = vmatprep.mubr.msk.f32.mxu1 %vm2861_vm8, %v4745_v9 }
 0xabb   : > { %5314 = vmatprep.subr.mxu0 %v4740_v28 }
 0xabc   : > { %5315 = vmatpush3.msra.mxu0 %v4740_v28 }
 0xabd   : > { %5851 = vmatpush3.bf16.msra.mxu1 %v7198_v8  ;;  %5319 = vmatprep.subr.mxu0 %v2947_v12 }
 0xabe   : > { %5332 = vmatprep.subr.msk.mxu1 %vm2868_vm9, %v7202_v6 }
 0xac1   : > { %5333 = vmatpush3.msk.msra.mxu1 %vm2868_vm9, %v7202_v6 }
 0xac2   : > { %5853 = vmatprep.subr.bf16.mxu1 %v7192_v19  ;;  %5335 = vmatmul.mubr.msk.f32.vlgmr.msra.gmra.mrb[114].mxu1 %vm2861_vm8, %v4746_v14 }
 0xac3   : > { %5855 = vmatpush3.bf16.msra.mxu1 %v7192_v19  ;;  %5352 = vmatprep.mubr.msk.f32.mxu1 %vm2861_vm8, %v4753_v20 }
 0xac4   : > { %5857 = vmatprep.subr.bf16.mxu1 %v7198_v8 }
 0xac7   : > { %5859 = vmatpush3.bf16.msra.mxu1 %v7198_v8 }
 0xac8   : > { %5350 = vmatprep.subr.msk.mxu1 %vm2868_vm9, %v7202_v6 }
 0xacb   : > { %5351 = vmatpush3.msk.msra.mxu1 %vm2868_vm9, %v7202_v6 }
 0xacc   : > { %5869 = vmatprep.subr.bf16.mxu1 %v7192_v19  ;;  %5353 = vmatmul.mubr.msk.f32.vlgmr.msra.gmra.mrb[116].mxu1 %vm2861_vm8, %v4754_v21 }
 0xacd   : > { %5871 = vmatpush3.bf16.msra.mxu1 %v7192_v19  ;;  %5388 = vmatprep.mubr.msk.f32.mxu1 %vm2861_vm8, %v4769_v22 }
 0xace   : > { %5873 = vmatprep.subr.bf16.mxu1 %v7198_v8 }
 0xad1   : > { %5875 = vmatpush3.bf16.msra.mxu1 %v7198_v8 }
 0xad2   : > { %5386 = vmatprep.subr.msk.mxu1 %vm2868_vm9, %v7202_v6 }
 0xad5   : > { %5387 = vmatpush3.msk.msra.mxu1 %vm2868_vm9, %v7202_v6 }
 0xad6   : > { %5877 = vmatprep.subr.bf16.mxu1 %v7192_v19  ;;  %5389 = vmatmul.mubr.msk.f32.vlgmr.msra.gmra.mrb[118].mxu1 %vm2861_vm8, %v4770_v5 }
 0xad7   : > { %5879 = vmatpush3.bf16.msra.mxu1 %v7192_v19  ;;  %5406 = vmatprep.mubr.msk.f32.mxu1 %vm2861_vm8, %v4777_v23 }
 0xad8   : > { %5881 = vmatprep.subr.bf16.mxu1 %v7198_v8 }
 0xadb   : > { %5883 = vmatpush3.bf16.msra.mxu1 %v7198_v8 }
 0xadc   : > { %5404 = vmatprep.subr.msk.mxu1 %vm2868_vm9, %v7202_v6 }
 0xadf   : > { %5405 = vmatpush3.msk.msra.mxu1 %vm2868_vm9, %v7202_v6 }
 0xae0   : > { %5893 = vmatprep.subr.bf16.mxu1 %v7192_v19  ;;  %5407 = vmatmul.mubr.msk.f32.vlgmr.msra.gmra.mrb[120].mxu1 %vm2861_vm8, %v4778_v27 }
 0xae1   : > { %5895 = vmatpush3.bf16.msra.mxu1 %v7192_v19  ;;  %5442 = vmatprep.mubr.msk.f32.mxu1 %vm2861_vm8, %v4793_v26 }
 0xae2   : > { %5897 = vmatprep.subr.bf16.mxu1 %v7198_v8 }
 0xae5   : > { %5899 = vmatpush3.bf16.msra.mxu1 %v7198_v8 }
 0xae6   : > { %5440 = vmatprep.subr.msk.mxu1 %vm2868_vm9, %v7202_v6 }
 0xae9   : > { %5441 = vmatpush3.msk.msra.mxu1 %vm2868_vm9, %v7202_v6 }
 0xaea   : > { %5443 = vmatmul.mubr.msk.f32.vlgmr.msra.gmra.mrb[122].mxu1 %vm2861_vm8, %v4794_v46 }
 0xb8b   : > { %v5313_v17 = vpop.f32.mrb[112].mxu1 }
 0xb8c   : > { %v3023_v24 = vpop.f32.mrb[113].mxu1  ;;  %v5300_v30 = vpop.f32.mrb[100].mxu0 }
 0xb8d   : > { %5316 = vmatprep.mubr.msk.f32.mxu0 %vm3034_vm10, %v3023_v24  ;;  %v2938_v31 = vpop.f32.mrb[101].mxu0 }
 0xb8e   : > { %5317 = vmatmul.mubr.msk.f32.vlgmr.msra.gmra.mrb[102].mxu0 %vm3034_vm10, %v5313_v17 }
 0xb8f   : > { %5320 = vmatpush3.msra.mxu0 %v2947_v12  ;;  %5321 = vmatprep.mubr.msk.f32.mxu0 %vm3034_vm10, %v2938_v31 }
 0xb90   : > { %5337 = vmatprep.subr.mxu0 %v4750_v32 }
 0xb95   : > { %v5336_v33 = vpop.f32.mrb[114].mxu1 }
 0xb96   : > { %5322 = vmatmul.mubr.msk.f32.vlgmr.msra.gmra.mrb[102].mxu0 %vm3034_vm10, %v5300_v30  ;;  %v3272_v37 = vpop.f32.mrb[115].mxu1 }
 0xb97   : > { %5338 = vmatpush3.msra.mxu0 %v4750_v32  ;;  %5339 = vmatprep.mubr.msk.f32.mxu0 %vm3034_vm10, %v3272_v37 }
 0xb98   : > { %5355 = vmatprep.subr.mxu0 %v4758_v36 }
 0xb9e   : > { %5340 = vmatmul.mubr.msk.f32.vlgmr.msra.gmra.mrb[102].mxu0 %vm3034_vm10, %v5336_v33 }
 0xb9f   : > { %5356 = vmatpush3.msra.mxu0 %v4758_v36  ;;  %v5354_v40 = vpop.f32.mrb[116].mxu1 }
 0xba0   : > { %5861 = vmatprep.subr.bf16.mxu0 %v7192_v19  ;;  %v3441_v35 = vpop.f32.mrb[117].mxu1 }
 0xba1   : > { %5357 = vmatprep.mubr.msk.f32.mxu0 %vm3034_vm10, %v3441_v35 }
 0xba6   : > { %5358 = vmatmul.mubr.msk.f32.vlgmr.msra.gmra.mrb[102].mxu0 %vm3034_vm10, %v5354_v40 }
 0xba7   : > { %5863 = vmatpush3.bf16.msra.mxu0 %v7192_v19  ;;  %5370 = vmatprep.mubr.msk.f32.mxu0 %vm2861_vm8, %v4761_v41 }
 0xba8   : > { %5865 = vmatprep.subr.bf16.mxu0 %v7198_v8 }
 0xba9   : > { %v5390_v38 = vpop.f32.mrb[118].mxu1 }
 0xbaa   : > { %v3779_v29 = vpop.f32.mrb[119].mxu1 }
 0xbab   : > { %5867 = vmatpush3.bf16.msra.mxu0 %v7198_v8 }
 0xbac   : > { %5368 = vmatprep.subr.msk.mxu0 %vm2868_vm9, %v7202_v6 }
 0xbaf   : > { %5369 = vmatpush3.msk.msra.mxu0 %vm2868_vm9, %v7202_v6 }
 0xbb0   : > { %5371 = vmatmul.mubr.msk.f32.vlgmr.msra.gmra.mrb[104].mxu0 %vm2861_vm8, %v4762_v44  ;;  %5373 = vmatprep.subr.mxu0 %v4766_v45 }
 0xbb1   : > { %5374 = vmatpush3.msra.mxu0 %v4766_v45 }
 0xbb2   : > { %5391 = vmatprep.subr.mxu0 %v4774_v43 }
 0xbb3   : > { %v5408_v39 = vpop.f32.mrb[120].mxu1 }
 0xbb4   : > { %v3948_v49 = vpop.f32.mrb[121].mxu1 }
 0xbbd   : > { %v5444_v3 = vpop.f32.mrb[122].mxu1 }
 0xbbe   : > { %v4286_v25 = vpop.f32.mrb[123].mxu1 }
 0xc83   : > { %v5372_v53 = vpop.f32.mrb[104].mxu0 }
 0xc84   : > { %v3610_v51 = vpop.f32.mrb[105].mxu0 }
 0xc85   : > { %5375 = vmatprep.mubr.msk.f32.mxu0 %vm3034_vm10, %v3610_v51 }
 0xc86   : > { %5376 = vmatmul.mubr.msk.f32.vlgmr.msra.gmra.mrb[102].mxu0 %vm3034_vm10, %v5372_v53 }
 0xc87   : > { %5392 = vmatpush3.msra.mxu0 %v4774_v43  ;;  %5393 = vmatprep.mubr.msk.f32.mxu0 %vm3034_vm10, %v3779_v29 }
 0xc88   : > { %5409 = vmatprep.subr.mxu0 %v4782_v47 }
 0xc8e   : > { %5394 = vmatmul.mubr.msk.f32.vlgmr.msra.gmra.mrb[102].mxu0 %vm3034_vm10, %v5390_v38 }
 0xc8f   : > { %5410 = vmatpush3.msra.mxu0 %v4782_v47  ;;  %5411 = vmatprep.mubr.msk.f32.mxu0 %vm3034_vm10, %v3948_v49 }
 0xc90   : > { %5885 = vmatprep.subr.bf16.mxu0 %v7192_v19 }
 0xc96   : > { %5412 = vmatmul.mubr.msk.f32.vlgmr.msra.gmra.mrb[102].mxu0 %vm3034_vm10, %v5408_v39 }
 0xc97   : > { %5887 = vmatpush3.bf16.msra.mxu0 %v7192_v19  ;;  %5424 = vmatprep.mubr.msk.f32.mxu0 %vm2861_vm8, %v4785_v60 }
 0xc98   : > { %5889 = vmatprep.subr.bf16.mxu0 %v7198_v8 }
 0xc9b   : > { %5891 = vmatpush3.bf16.msra.mxu0 %v7198_v8 }
 0xc9c   : > { %5422 = vmatprep.subr.msk.mxu0 %vm2868_vm9, %v7202_v6 }
 0xc9f   : > { %5423 = vmatpush3.msk.msra.mxu0 %vm2868_vm9, %v7202_v6 }
 0xca0   : > { %5425 = vmatmul.mubr.msk.f32.vlgmr.msra.gmra.mrb[106].mxu0 %vm2861_vm8, %v4786_v4  ;;  %5427 = vmatprep.subr.mxu0 %v4790_v11 }
 0xca1   : > { %5428 = vmatpush3.msra.mxu0 %v4790_v11 }
 0xca2   : > { %5445 = vmatprep.subr.mxu0 %v4798_v18 }
 0xd73   : > { %v5426_v34 = vpop.f32.mrb[106].mxu0 }
 0xd74   : > { %v4117_v42 = vpop.f32.mrb[107].mxu0 }
 0xd75   : > { %5429 = vmatprep.mubr.msk.f32.mxu0 %vm3034_vm10, %v4117_v42 }
 0xd76   : > { %5430 = vmatmul.mubr.msk.f32.vlgmr.msra.gmra.mrb[102].mxu0 %vm3034_vm10, %v5426_v34 }
 0xd77   : > { %5446 = vmatpush3.msra.mxu0 %v4798_v18  ;;  %5447 = vmatprep.mubr.msk.f32.mxu0 %vm3034_vm10, %v4286_v25 }
 0xd7e   : > { %5448 = vmatmul.mubr.msk.f32.vlgmr.msra.gmra.mrb[102].mxu0 %vm3034_vm10, %v5444_v3 }
 0xe51   : > { %v5449_v52 = vpop.f32.mrb[102].mxu0 }
 0xe52   : > { %v4388_v55 = vadd.f32 %v5449_v52, %v4801_v48  ;;  %v4369_v56 = vpop.f32.mrb[103].mxu0 }
 0xe53   : > { %v4387_v50 = vadd.f32 %v4801_v48, %v4369_v56 }
 0xe54   : > { %v4390_v54 = vmax.f32 %v4388_v55, 0.0 }
 0xe55   : > { %v4389_v58 = vmax.f32 %v4387_v50, 0.0 }
 0xe56   : > { %v4393_v59 = vsel %vm4391_vm11, %v4390_v54, 0.0 }
 0xe57   : > { %v4392_v62 = vsel %vm4391_vm11, %v4389_v58, 0.0 }
 0xe58   : > { %v4394_v57 = vadd.f32 %v4393_v59, %v4392_v62 }
 0xe5a   : > { %v4395_v63 = vrot.slane %v4394_v57, 4 }
 0xe5c   : > { %v4396_v1 = vadd.f32 %v4395_v63, %v4394_v57 }
 0xe5e   : > { %v4397_v19 = vrot.slane %v4396_v1, 2 }
 0xe60   : > { %v4398_v2 = vadd.f32 %v4397_v19, %v4396_v1 }
 0xe62   : > { %v4399_v61 = vrot.slane %v4398_v2, 1 }
 0xe64   : > { %v4400_v0 = vadd.f32 %v4399_v61, %v4398_v2 }
 0xe66   : > { %v4402_v7 = vmul.f32 0.0625, %v4400_v0 }
 0xe68   : > { %v4403_v8 = vsel %vm4391_vm11, %v4402_v7, -inf }
 0xe69   : > { %4404 = vmax.xlane.f32.xlu0 %v4403_v8 }
 0xef6   : > { %v4405_v10 = vpop.xlane.xlu0 %4404 }
 0xef7   : > { %v4406_v6 = vsub.f32 %v4402_v7, %v4405_v10 }
 0xef9   : > { %v4407_v13 = vmul.f32 1.442695, %v4406_v6 }
 0xefb   : > { %5960 = vpow2.f32 %v4407_v13 }
 0xf05   : > { %v5961_v15 = vpop.eup %5960 }
 0xf06   : > { %v4409_v16 = vsel %vm4391_vm11, %v5961_v15, 0.0 }
 0xf07   : > { %4410 = vadd.xlane.f32.xlu0 %v4409_v16 }
 0xf94   : > { %v4411_v9 = vpop.xlane.xlu0 %4410 }
 0xf95   : > { %5962 = vlog2.f32 %v4411_v9 }
 0xf9f   : > { %v5963_v14 = vpop.eup %5962 }
 0xfa0   : > { %v4413_v20 = vmul.f32 0.6931472, %v5963_v14 }
 0xfa2   : > { %v4414_v21 = vadd.f32 %v4413_v20, %v4405_v10 }
 0xfa4   : > { %v4415_v22 = vsub.f32 %v4402_v7, %v4414_v21 }
 0xfa6   : > { %4417 = vst.msk [vmem:[%s351_s20] sm:$0x1] %vm4416_vm12, %v4415_v22 }
 0xfa7   : > { %5977 = shalt.err (!%p5974_p3)
}
 0xfa8   : > { %s5978_s12 = scalar_lea.hbm %s7391_s27, 16  ;;  %s5982_s25 = scalar_lea.hbm %s7443_s10, 32 }
 0xfa9   : > { %p5979_p4 = scmp.ne.s32.totalorder %s7391_s27, %s5978_s12  ;;  %p5983_p9 = scmp.lt.u32.totalorder %s7391_s27, %s7443_s10 }
 0xfaa   : > { %p5984_p10 = scmp.lt.u32.totalorder %s5982_s25, %s5978_s12  ;;  %p5986_p12 = scmp.lt.u32.totalorder %s5978_s12, %s7391_s27 }
 0xfab   : > { %p5980_p7 = pnand %p5979_p4, %p6126_p5 }
 0xfac   : > { %p5985_p11 = por %p5984_p10, %p5983_p9 }
 0xfad   : > { %p5981_p8 = pneg %p5980_p7 }
 0xfae   : > { %p5987_p13 = por %p5986_p12, %p5985_p11 }
 0xfb0   : > { %p5988_p0 = pnand %p5987_p13, %p5981_p8 }
 0xfb2   : > { %5991 = shalt.err (!%p5988_p0)
}
 0xfb3   : > { %5917 = dma.vmem_to_hbm [thread:$0]  (%p6126_p5), %s7393_s21, 16, %s7391_s27, %s4419_s28  }
 0xfb4 PF: > { %p5923_p1 = scmp.ge.s32.totalorder %s6026_s16, 2  ;;  %s4443_s29 = sand.u32 1, %s6014_s13  }
 0xfb5   : > { %s4444_s30 = scalar_lea.sflag [#allocation3], %s4443_s29 }
 0xfb6   : > { %p5920_p2 = pnand %p5923_p1, %p6130_p6 }
 0xfb8   : > { %6009 = dma.done.wait (!%p5920_p2), %s4444_s30, 16  }
 0xfb9   : > { %6011 = vsyncadd (!%p5920_p2), %s4444_s30, 4294967280  ;;  %p20_p3 = scmp.ge.s32.totalorder %s6113_s19, 4   ;;  %s7448_s13 = smov %s6018_s14 }
 0xfba   : > { %s7449_s14 = smov %s6022_s15  ;;  %s7450_s15 = smov %s6124_s22 }
 0xfbb   : > { %s7451_s16 = smov %s6113_s19  ;;  %22 = sbr.rel (!%p20_p3) target bundleno = 3 (0x3), region = 127 }
 0xfc2   :  { %4448 = vsyncpa [#allocation3], 1 }
 0xfc3   :  { %4450 = vsyncpa [#allocation3 + $0x1], 1 }

</bundles_post_ra>
